<compile_context>
chip_gen: v7x
topology: tpu7x:2x2x1
jax: 0.10.0
libtpu: 0.0.40
codegen_flags: <defaults>
</compile_context>

<pallas_src>
import math

import jax
import jax.numpy as jnp
from jax import lax
from jax.experimental import pallas as pl
from jax.experimental.pallas import tpu as pltpu

# dtype fed to the MXU (accumulation + all elementwise math stay f32).
MXU_DTYPE = jnp.bfloat16


def _pnet_dims(H, W):
    """Static shape bookkeeping for valid 3x3 convs + floor-mode 2x2/2 pool."""
    H1, W1 = H - 2, W - 2            # conv1 (valid, stride 1)
    Hp, Wp = H1 // 2, W1 // 2        # MaxPool2d(2,2): default ceil_mode=False -> floor
    H2, W2 = Hp - 2, Wp - 2          # conv2
    H3, W3 = H2 - 2, W2 - 2          # conv3 / heads
    # "wide-slab" row counts: activations keep the input row stride W so every
    # conv tap / pool tap is a contiguous slice.
    L1 = (H1 - 1) * W + W1           # conv1 output slab rows
    Np = (Hp - 1) * W + Wp           # pooled slab rows
    L2 = (H2 - 1) * W + W2           # conv2 output slab rows
    L3 = (H3 - 1) * W + W3           # conv3 / head slab rows
    return H1, W1, Hp, Wp, H2, W2, H3, W3, L1, Np, L2, L3


# ------------------------------ fused kernel --------------------------------

def _make_pnet_kernel(H, W, mxu_dtype):
    (H1, W1, Hp, Wp, H2, W2, H3, W3, L1, Np, L2, L3) = _pnet_dims(H, W)

    def conv3x3(src_ref, L, cin, w_ref, b_ref, al_ref, col_scr):
        """Valid 3x3 conv + bias + PReLU over a whole wide slab.

        src_ref: (rows, cin) mxu_dtype ref in wide layout (row stride W).
        Builds the (L, 9*cin) im2col LHS in lane ranges of `col_scr`, then one
        MXU matmul with f32 accumulation; bias + per-channel PReLU in f32.
        """
        for t in range(9):
            dy, dx = divmod(t, 3)
            off = dy * W + dx
            col_scr[0:L, t * cin:(t + 1) * cin] = src_ref[off:off + L, :]
        acc = jnp.dot(col_scr[0:L, 0:9 * cin], w_ref[...],
                      preferred_element_type=jnp.float32)
        acc = acc + b_ref[...]                                 # (1, Cout) bcast
        return jnp.where(acc > 0, acc, al_ref[...] * acc)      # PReLU

    def kernel(x_ref, w1r, b1r, al1, w2r, b2r, al2, w3r, b3r, al3, whr, bhr,
               out_ref, col_scr, act1_scr, pool_scr, act2_scr):
        # ---- conv1 (3->10) + PReLU: one (L1, 27) x (27, 10) matmul ----------
        act1_scr[...] = conv3x3(x_ref, L1, 3, w1r, b1r, al1, col_scr)

        # ---- fused 2x2/2 max-pool (floor mode) ------------------------------
        # element-wise max of the four window taps, gathered with stride-2
        # sublane loads; the pooled slab keeps row stride W so conv2's taps
        # stay contiguous slices.
        pool_scr[...] = jnp.maximum(
            jnp.maximum(act1_scr[pl.ds(0, Np, stride=2), :],
                        act1_scr[pl.ds(1, Np, stride=2), :]),
            jnp.maximum(act1_scr[pl.ds(W, Np, stride=2), :],
                        act1_scr[pl.ds(W + 1, Np, stride=2), :]),
        ).astype(mxu_dtype)

        # ---- conv2 (10->16) + PReLU: one (L2, 90) x (90, 16) matmul ---------
        act2_scr[...] = conv3x3(pool_scr, L2, 10, w2r, b2r, al2,
                                col_scr).astype(mxu_dtype)

        # ---- conv3 (16->32) + PReLU: one (L3, 144) x (144, 32) matmul -------
        act3 = conv3x3(act2_scr, L3, 16, w3r, b3r, al3, col_scr)

        # ---- fused 1x1 heads: conv4_1 (sigmoid) + conv4_2 -------------------
        h = jnp.dot(act3.astype(mxu_dtype), whr[...],
                    preferred_element_type=jnp.float32) + bhr[...]
        col = lax.broadcasted_iota(jnp.int32, h.shape, 1)
        sig = 1.0 / (1.0 + jnp.exp(-h))                        # f32 sigmoid
        out_ref[...] = jnp.where(col == 0, sig, h)             # sigmoid on label col

    return kernel


# -------------------------------- wrapper ------------------------------------

def _conv_w3x3(w_oihw, dtype):
    """PyTorch OIHW 3x3 conv weight -> (9*I, O), row order (dy, dx, cin)."""
    O, I, kh, kw = w_oihw.shape
    return jnp.transpose(w_oihw, (2, 3, 1, 0)).reshape(kh * kw * I, O).astype(dtype)


def pnet_forward(x_nchw, params):
    x = jnp.transpose(x_nchw, (0, 2, 3, 1))                    # NCHW -> NHWC
    N, H, W, Cin = x.shape
    assert Cin == 3 and H >= 12 and W >= 12, (N, Cin, H, W)
    (H1, W1, Hp, Wp, H2, W2, H3, W3, L1, Np, L2, L3) = _pnet_dims(H, W)

    xb = x.reshape(N, H * W, Cin).astype(MXU_DTYPE)            # bf16 DMA payload

    w1 = _conv_w3x3(params["w1"], MXU_DTYPE)                   # (27, 10)
    w2 = _conv_w3x3(params["w2"], MXU_DTYPE)                   # (90, 16)
    w3 = _conv_w3x3(params["w3"], MXU_DTYPE)                   # (144, 32)
    b1 = params["b1"].reshape(1, -1).astype(jnp.float32)
    b2 = params["b2"].reshape(1, -1).astype(jnp.float32)
    b3 = params["b3"].reshape(1, -1).astype(jnp.float32)
    a1 = params["a1"].reshape(1, -1).astype(jnp.float32)
    a2 = params["a2"].reshape(1, -1).astype(jnp.float32)
    a3 = params["a3"].reshape(1, -1).astype(jnp.float32)

    # fused heads: conv4_1 (1 ch) + conv4_2 (4 ch) as one (32, 5) matmul
    w41 = params["w4_1"].reshape(1, 32)
    w42 = params["w4_2"].reshape(4, 32)
    wh = jnp.concatenate([w41, w42], axis=0).T.astype(MXU_DTYPE)        # (32, 5)
    bh = jnp.concatenate([params["b4_1"], params["b4_2"]]
                         ).reshape(1, 5).astype(jnp.float32)

    kernel = _make_pnet_kernel(H, W, MXU_DTYPE)
    heads_wide = pl.pallas_call(
        kernel,
        out_shape=jax.ShapeDtypeStruct((N, L3, 5), jnp.float32),
        grid=(N,),
        in_specs=[
            pl.BlockSpec((None, H * W, Cin), lambda n: (n, 0, 0)),   # image
            pl.BlockSpec((27, 10), lambda n: (0, 0)),                # w1
            pl.BlockSpec((1, 10), lambda n: (0, 0)),                 # b1
            pl.BlockSpec((1, 10), lambda n: (0, 0)),                 # a1
            pl.BlockSpec((90, 16), lambda n: (0, 0)),                # w2
            pl.BlockSpec((1, 16), lambda n: (0, 0)),                 # b2
            pl.BlockSpec((1, 16), lambda n: (0, 0)),                 # a2
            pl.BlockSpec((144, 32), lambda n: (0, 0)),               # w3
            pl.BlockSpec((1, 32), lambda n: (0, 0)),                 # b3
            pl.BlockSpec((1, 32), lambda n: (0, 0)),                 # a3
            pl.BlockSpec((32, 5), lambda n: (0, 0)),                 # head weights
            pl.BlockSpec((1, 5), lambda n: (0, 0)),                  # head biases
        ],
        out_specs=pl.BlockSpec((None, L3, 5), lambda n: (n, 0, 0)),
        scratch_shapes=[
            pltpu.VMEM((L1, 9 * 16), MXU_DTYPE),    # shared im2col LHS scratch
            pltpu.VMEM((L1, 10), jnp.float32),      # conv1+PReLU slab (f32, pre-pool)
            pltpu.VMEM((Np, 10), MXU_DTYPE),        # pooled slab (wide layout)
            pltpu.VMEM((L2, 16), MXU_DTYPE),        # conv2+PReLU slab
        ],
        compiler_params=pltpu.CompilerParams(
            dimension_semantics=("parallel",)),     # batch across v7x's 2 TCs
    )(xb, w1, b1, a1, w2, b2, a2, w3, b3, a3, wh, bh)

    # crop the wide slab (row stride W) down to the valid (H3, W3) head grid
    hw = jnp.pad(heads_wide, ((0, 0), (0, H3 * W - L3), (0, 0)))
    hw = hw.reshape(N, H3, W, 5)[:, :, :W3, :]
    heads = jnp.transpose(hw, (0, 3, 1, 2))                    # -> NCHW
    label = heads[:, 0:1]                                      # sigmoid(conv4_1(x))
    offset = heads[:, 1:5]                                     # conv4_2(x)
    return label, offset


# ----------------------------- parameter init --------------------------------

def _xavier_uniform(key, shape):
    O, I, kh, kw = shape
    fan_in, fan_out = I * kh * kw, O * kh * kw
    bound = math.sqrt(6.0 / (fan_in + fan_out))
    return jax.random.uniform(key, shape, jnp.float32, -bound, bound)


def init_pnet_params(key):
    ks = jax.random.split(key, 6)
    p = {}
    # pre_layer
    p["w1"] = _xavier_uniform(ks[0], (10, 3, 3, 3));  p["b1"] = jnp.full((10,), 0.1, jnp.float32)
    p["a1"] = jnp.full((10,), 0.25, jnp.float32)                       # PReLU(10)
    p["w2"] = _xavier_uniform(ks[1], (16, 10, 3, 3)); p["b2"] = jnp.full((16,), 0.1, jnp.float32)
    p["a2"] = jnp.full((16,), 0.25, jnp.float32)                       # PReLU(16)
    p["w3"] = _xavier_uniform(ks[2], (32, 16, 3, 3)); p["b3"] = jnp.full((32,), 0.1, jnp.float32)
    p["a3"] = jnp.full((32,), 0.25, jnp.float32)                       # PReLU(32)
    # heads
    p["w4_1"] = _xavier_uniform(ks[3], (1, 32, 1, 1));  p["b4_1"] = jnp.full((1,), 0.1, jnp.float32)
    p["w4_2"] = _xavier_uniform(ks[4], (4, 32, 1, 1));  p["b4_2"] = jnp.full((4,), 0.1, jnp.float32)
    # conv4_3 exists in the PyTorch __init__ but is unused in forward(); kept for parity
    p["w4_3"] = _xavier_uniform(ks[5], (12, 32, 1, 1)); p["b4_3"] = jnp.full((12,), 0.1, jnp.float32)
    return p


# --------------------------------- main ---------------------------------------

if __name__ == "__main__":
    key = jax.random.PRNGKey(0)
    k_in, k_par = jax.random.split(key)

    # small, shape-consistent input: (N=2, C=3, H=16, W=16)
    x = jax.random.normal(k_in, (2, 3, 16, 16), jnp.float32)
    params = init_pnet_params(k_par)

    label, offset = jax.jit(pnet_forward)(x, params)
    jax.block_until_ready((label, offset))

    assert label.shape == (2, 1, 3, 3), label.shape    # 16 ->14 ->7 ->5 ->3
    assert offset.shape == (2, 4, 3, 3), offset.shape
    assert bool(jnp.all(jnp.isfinite(label))) and bool(jnp.all(jnp.isfinite(offset)))
    print("KERNEL_OK")
</pallas_src>

<mosaic_0001>
module attributes {stable_mosaic.version = 11 : i64} {
  func.func @kernel(%arg0: i32, %arg1: memref<1x256x3xbf16, #tpu.memory_space<vmem>>, %arg2: memref<27x10xbf16, #tpu.memory_space<vmem>>, %arg3: memref<1x10xf32, #tpu.memory_space<vmem>>, %arg4: memref<1x10xf32, #tpu.memory_space<vmem>>, %arg5: memref<90x16xbf16, #tpu.memory_space<vmem>>, %arg6: memref<1x16xf32, #tpu.memory_space<vmem>>, %arg7: memref<1x16xf32, #tpu.memory_space<vmem>>, %arg8: memref<144x32xbf16, #tpu.memory_space<vmem>>, %arg9: memref<1x32xf32, #tpu.memory_space<vmem>>, %arg10: memref<1x32xf32, #tpu.memory_space<vmem>>, %arg11: memref<32x5xbf16, #tpu.memory_space<vmem>>, %arg12: memref<1x5xf32, #tpu.memory_space<vmem>>, %arg13: memref<1x35x5xf32, #tpu.memory_space<vmem>>, %arg14: memref<222x144xbf16, #tpu.memory_space<vmem>>, %arg15: memref<222x10xf32, #tpu.memory_space<vmem>>, %arg16: memref<103x10xbf16, #tpu.memory_space<vmem>>, %arg17: memref<69x16xbf16, #tpu.memory_space<vmem>>) attributes {dimension_semantics = [#tpu.dimension_semantics<parallel>], iteration_bounds = array<i64: 2>, scalar_prefetch = 0 : i64, scratch_operands = 4 : i64, tpu.core_type = #tpu.core_type<tc>, window_params = [{transform_indices = @transform_0, window_bounds = array<i64: 1, 256, 3>}, {pipeline_mode = #tpu.pipeline_mode<synchronous>, transform_indices = @transform_1, window_bounds = array<i64: 27, 10>}, {pipeline_mode = #tpu.pipeline_mode<synchronous>, transform_indices = @transform_2, window_bounds = array<i64: 1, 10>}, {pipeline_mode = #tpu.pipeline_mode<synchronous>, transform_indices = @transform_3, window_bounds = array<i64: 1, 10>}, {pipeline_mode = #tpu.pipeline_mode<synchronous>, transform_indices = @transform_4, window_bounds = array<i64: 90, 16>}, {pipeline_mode = #tpu.pipeline_mode<synchronous>, transform_indices = @transform_5, window_bounds = array<i64: 1, 16>}, {pipeline_mode = #tpu.pipeline_mode<synchronous>, transform_indices = @transform_6, window_bounds = array<i64: 1, 16>}, {pipeline_mode = #tpu.pipeline_mode<synchronous>, transform_indices = @transform_7, window_bounds = array<i64: 144, 32>}, {pipeline_mode = #tpu.pipeline_mode<synchronous>, transform_indices = @transform_8, window_bounds = array<i64: 1, 32>}, {pipeline_mode = #tpu.pipeline_mode<synchronous>, transform_indices = @transform_9, window_bounds = array<i64: 1, 32>}, {pipeline_mode = #tpu.pipeline_mode<synchronous>, transform_indices = @transform_10, window_bounds = array<i64: 32, 5>}, {pipeline_mode = #tpu.pipeline_mode<synchronous>, transform_indices = @transform_11, window_bounds = array<i64: 1, 5>}, {transform_indices = @transform_12, window_bounds = array<i64: 1, 35, 5>}]} {
    %c0 = arith.constant 0 : index
    %c0_0 = arith.constant 0 : index
    %c0_1 = arith.constant 0 : index
    %0 = vector.load %arg1[%c0, %c0_0, %c0_1] : memref<1x256x3xbf16, #tpu.memory_space<vmem>>, vector<1x222x3xbf16>
    %1 = vector.shape_cast %0 : vector<1x222x3xbf16> to vector<222x3xbf16>
    %c0_2 = arith.constant 0 : index
    %c0_3 = arith.constant 0 : index
    %2 = vector.load %arg14[%c0_2, %c0_3] : memref<222x144xbf16, #tpu.memory_space<vmem>>, vector<222x3xbf16>
    tpu.vector_store %arg14[%c0_2, %c0_3], %1 {strides = array<i32>} : memref<222x144xbf16, #tpu.memory_space<vmem>>, vector<222x3xbf16>,
    %c0_4 = arith.constant 0 : index
    %c1 = arith.constant 1 : index
    %c0_5 = arith.constant 0 : index
    %3 = vector.load %arg1[%c0_4, %c1, %c0_5] : memref<1x256x3xbf16, #tpu.memory_space<vmem>>, vector<1x222x3xbf16>
    %4 = vector.shape_cast %3 : vector<1x222x3xbf16> to vector<222x3xbf16>
    %c0_6 = arith.constant 0 : index
    %c3 = arith.constant 3 : index
    %5 = vector.load %arg14[%c0_6, %c3] : memref<222x144xbf16, #tpu.memory_space<vmem>>, vector<222x3xbf16>
    tpu.vector_store %arg14[%c0_6, %c3], %4 {strides = array<i32>} : memref<222x144xbf16, #tpu.memory_space<vmem>>, vector<222x3xbf16>,
    %c0_7 = arith.constant 0 : index
    %c2 = arith.constant 2 : index
    %c0_8 = arith.constant 0 : index
    %6 = vector.load %arg1[%c0_7, %c2, %c0_8] : memref<1x256x3xbf16, #tpu.memory_space<vmem>>, vector<1x222x3xbf16>
    %7 = vector.shape_cast %6 : vector<1x222x3xbf16> to vector<222x3xbf16>
    %c0_9 = arith.constant 0 : index
    %c6 = arith.constant 6 : index
    %8 = vector.load %arg14[%c0_9, %c6] : memref<222x144xbf16, #tpu.memory_space<vmem>>, vector<222x3xbf16>
    tpu.vector_store %arg14[%c0_9, %c6], %7 {strides = array<i32>} : memref<222x144xbf16, #tpu.memory_space<vmem>>, vector<222x3xbf16>,
    %c0_10 = arith.constant 0 : index
    %c16 = arith.constant 16 : index
    %c0_11 = arith.constant 0 : index
    %9 = vector.load %arg1[%c0_10, %c16, %c0_11] : memref<1x256x3xbf16, #tpu.memory_space<vmem>>, vector<1x222x3xbf16>
    %10 = vector.shape_cast %9 : vector<1x222x3xbf16> to vector<222x3xbf16>
    %c0_12 = arith.constant 0 : index
    %c9 = arith.constant 9 : index
    %11 = vector.load %arg14[%c0_12, %c9] : memref<222x144xbf16, #tpu.memory_space<vmem>>, vector<222x3xbf16>
    tpu.vector_store %arg14[%c0_12, %c9], %10 {strides = array<i32>} : memref<222x144xbf16, #tpu.memory_space<vmem>>, vector<222x3xbf16>,
    %c0_13 = arith.constant 0 : index
    %c17 = arith.constant 17 : index
    %c0_14 = arith.constant 0 : index
    %12 = vector.load %arg1[%c0_13, %c17, %c0_14] : memref<1x256x3xbf16, #tpu.memory_space<vmem>>, vector<1x222x3xbf16>
    %13 = vector.shape_cast %12 : vector<1x222x3xbf16> to vector<222x3xbf16>
    %c0_15 = arith.constant 0 : index
    %c12 = arith.constant 12 : index
    %14 = vector.load %arg14[%c0_15, %c12] : memref<222x144xbf16, #tpu.memory_space<vmem>>, vector<222x3xbf16>
    tpu.vector_store %arg14[%c0_15, %c12], %13 {strides = array<i32>} : memref<222x144xbf16, #tpu.memory_space<vmem>>, vector<222x3xbf16>,
    %c0_16 = arith.constant 0 : index
    %c18 = arith.constant 18 : index
    %c0_17 = arith.constant 0 : index
    %15 = vector.load %arg1[%c0_16, %c18, %c0_17] : memref<1x256x3xbf16, #tpu.memory_space<vmem>>, vector<1x222x3xbf16>
    %16 = vector.shape_cast %15 : vector<1x222x3xbf16> to vector<222x3xbf16>
    %c0_18 = arith.constant 0 : index
    %c15 = arith.constant 15 : index
    %17 = vector.load %arg14[%c0_18, %c15] : memref<222x144xbf16, #tpu.memory_space<vmem>>, vector<222x3xbf16>
    tpu.vector_store %arg14[%c0_18, %c15], %16 {strides = array<i32>} : memref<222x144xbf16, #tpu.memory_space<vmem>>, vector<222x3xbf16>,
    %c0_19 = arith.constant 0 : index
    %c32 = arith.constant 32 : index
    %c0_20 = arith.constant 0 : index
    %18 = vector.load %arg1[%c0_19, %c32, %c0_20] : memref<1x256x3xbf16, #tpu.memory_space<vmem>>, vector<1x222x3xbf16>
    %19 = vector.shape_cast %18 : vector<1x222x3xbf16> to vector<222x3xbf16>
    %c0_21 = arith.constant 0 : index
    %c18_22 = arith.constant 18 : index
    %20 = vector.load %arg14[%c0_21, %c18_22] : memref<222x144xbf16, #tpu.memory_space<vmem>>, vector<222x3xbf16>
    tpu.vector_store %arg14[%c0_21, %c18_22], %19 {strides = array<i32>} : memref<222x144xbf16, #tpu.memory_space<vmem>>, vector<222x3xbf16>,
    %c0_23 = arith.constant 0 : index
    %c33 = arith.constant 33 : index
    %c0_24 = arith.constant 0 : index
    %21 = vector.load %arg1[%c0_23, %c33, %c0_24] : memref<1x256x3xbf16, #tpu.memory_space<vmem>>, vector<1x222x3xbf16>
    %22 = vector.shape_cast %21 : vector<1x222x3xbf16> to vector<222x3xbf16>
    %c0_25 = arith.constant 0 : index
    %c21 = arith.constant 21 : index
    %23 = vector.load %arg14[%c0_25, %c21] : memref<222x144xbf16, #tpu.memory_space<vmem>>, vector<222x3xbf16>
    tpu.vector_store %arg14[%c0_25, %c21], %22 {strides = array<i32>} : memref<222x144xbf16, #tpu.memory_space<vmem>>, vector<222x3xbf16>,
    %c0_26 = arith.constant 0 : index
    %c34 = arith.constant 34 : index
    %c0_27 = arith.constant 0 : index
    %24 = vector.load %arg1[%c0_26, %c34, %c0_27] : memref<1x256x3xbf16, #tpu.memory_space<vmem>>, vector<1x222x3xbf16>
    %25 = vector.shape_cast %24 : vector<1x222x3xbf16> to vector<222x3xbf16>
    %c0_28 = arith.constant 0 : index
    %c24 = arith.constant 24 : index
    %26 = vector.load %arg14[%c0_28, %c24] : memref<222x144xbf16, #tpu.memory_space<vmem>>, vector<222x3xbf16>
    tpu.vector_store %arg14[%c0_28, %c24], %25 {strides = array<i32>} : memref<222x144xbf16, #tpu.memory_space<vmem>>, vector<222x3xbf16>,
    %c0_29 = arith.constant 0 : index
    %c0_30 = arith.constant 0 : index
    %27 = vector.load %arg14[%c0_29, %c0_30] : memref<222x144xbf16, #tpu.memory_space<vmem>>, vector<222x27xbf16>
    %c0_31 = arith.constant 0 : index
    %c0_32 = arith.constant 0 : index
    %28 = vector.load %arg2[%c0_31, %c0_32] : memref<27x10xbf16, #tpu.memory_space<vmem>>, vector<27x10xbf16>
    %cst = arith.constant dense<0.000000e+00> : vector<222x10xf32>
    %29 = tpu.matmul %27, %28, %cst {dimension_numbers = #tpu.dot_dimension_numbers<[1], [0], [0], [1], [0, 0, 1, 1], [], []>} : vector<222x27xbf16>, vector<27x10xbf16>, vector<222x10xf32> -> vector<222x10xf32>
    %c0_33 = arith.constant 0 : index
    %c0_34 = arith.constant 0 : index
    %30 = vector.load %arg3[%c0_33, %c0_34] : memref<1x10xf32, #tpu.memory_space<vmem>>, vector<1x10xf32>
    %31 = vector.broadcast %30 : vector<1x10xf32> to vector<222x10xf32>
    %32 = arith.addf %29, %31 : vector<222x10xf32>
    %cst_35 = arith.constant 0.000000e+00 : f32
    %33 = vector.broadcast %cst_35 : f32 to vector<222x10xf32>
    %34 = arith.cmpf ogt, %32, %33 : vector<222x10xf32>
    %c0_36 = arith.constant 0 : index
    %c0_37 = arith.constant 0 : index
    %35 = vector.load %arg4[%c0_36, %c0_37] : memref<1x10xf32, #tpu.memory_space<vmem>>, vector<1x10xf32>
    %36 = vector.broadcast %35 : vector<1x10xf32> to vector<222x10xf32>
    %37 = arith.mulf %36, %32 : vector<222x10xf32>
    %38 = arith.select %34, %32, %37 : vector<222x10xi1>, vector<222x10xf32>
    %c0_38 = arith.constant 0 : index
    %c0_39 = arith.constant 0 : index
    %39 = vector.load %arg15[%c0_38, %c0_39] : memref<222x10xf32, #tpu.memory_space<vmem>>, vector<222x10xf32>
    tpu.vector_store %arg15[%c0_38, %c0_39], %38 {strides = array<i32>} : memref<222x10xf32, #tpu.memory_space<vmem>>, vector<222x10xf32>,
    %c0_40 = arith.constant 0 : index
    %c0_41 = arith.constant 0 : index
    %40 = tpu.strided_load %arg15[%c0_40, %c0_41] {strides = array<i32: 2, 1>} : memref<222x10xf32, #tpu.memory_space<vmem>>, vector<103x10xf32>
    %c1_42 = arith.constant 1 : index
    %c0_43 = arith.constant 0 : index
    %41 = tpu.strided_load %arg15[%c1_42, %c0_43] {strides = array<i32: 2, 1>} : memref<222x10xf32, #tpu.memory_space<vmem>>, vector<103x10xf32>
    %42 = arith.maximumf %40, %41 : vector<103x10xf32>
    %c16_44 = arith.constant 16 : index
    %c0_45 = arith.constant 0 : index
    %43 = tpu.strided_load %arg15[%c16_44, %c0_45] {strides = array<i32: 2, 1>} : memref<222x10xf32, #tpu.memory_space<vmem>>, vector<103x10xf32>
    %c17_46 = arith.constant 17 : index
    %c0_47 = arith.constant 0 : index
    %44 = tpu.strided_load %arg15[%c17_46, %c0_47] {strides = array<i32: 2, 1>} : memref<222x10xf32, #tpu.memory_space<vmem>>, vector<103x10xf32>
    %45 = arith.maximumf %43, %44 : vector<103x10xf32>
    %46 = arith.maximumf %42, %45 : vector<103x10xf32>
    %47 = arith.truncf %46 : vector<103x10xf32> to vector<103x10xbf16>
    %c0_48 = arith.constant 0 : index
    %c0_49 = arith.constant 0 : index
    %48 = vector.load %arg16[%c0_48, %c0_49] : memref<103x10xbf16, #tpu.memory_space<vmem>>, vector<103x10xbf16>
    tpu.vector_store %arg16[%c0_48, %c0_49], %47 {strides = array<i32>} : memref<103x10xbf16, #tpu.memory_space<vmem>>, vector<103x10xbf16>,
    %c0_50 = arith.constant 0 : index
    %c0_51 = arith.constant 0 : index
    %49 = vector.load %arg16[%c0_50, %c0_51] : memref<103x10xbf16, #tpu.memory_space<vmem>>, vector<69x10xbf16>
    %c0_52 = arith.constant 0 : index
    %c0_53 = arith.constant 0 : index
    %50 = vector.load %arg14[%c0_52, %c0_53] : memref<222x144xbf16, #tpu.memory_space<vmem>>, vector<69x10xbf16>
    tpu.vector_store %arg14[%c0_52, %c0_53], %49 {strides = array<i32>} : memref<222x144xbf16, #tpu.memory_space<vmem>>, vector<69x10xbf16>,
    %c1_54 = arith.constant 1 : index
    %c0_55 = arith.constant 0 : index
    %51 = vector.load %arg16[%c1_54, %c0_55] : memref<103x10xbf16, #tpu.memory_space<vmem>>, vector<69x10xbf16>
    %c0_56 = arith.constant 0 : index
    %c10 = arith.constant 10 : index
    %52 = vector.load %arg14[%c0_56, %c10] : memref<222x144xbf16, #tpu.memory_space<vmem>>, vector<69x10xbf16>
    tpu.vector_store %arg14[%c0_56, %c10], %51 {strides = array<i32>} : memref<222x144xbf16, #tpu.memory_space<vmem>>, vector<69x10xbf16>,
    %c2_57 = arith.constant 2 : index
    %c0_58 = arith.constant 0 : index
    %53 = vector.load %arg16[%c2_57, %c0_58] : memref<103x10xbf16, #tpu.memory_space<vmem>>, vector<69x10xbf16>
    %c0_59 = arith.constant 0 : index
    %c20 = arith.constant 20 : index
    %54 = vector.load %arg14[%c0_59, %c20] : memref<222x144xbf16, #tpu.memory_space<vmem>>, vector<69x10xbf16>
    tpu.vector_store %arg14[%c0_59, %c20], %53 {strides = array<i32>} : memref<222x144xbf16, #tpu.memory_space<vmem>>, vector<69x10xbf16>,
    %c16_60 = arith.constant 16 : index
    %c0_61 = arith.constant 0 : index
    %55 = vector.load %arg16[%c16_60, %c0_61] : memref<103x10xbf16, #tpu.memory_space<vmem>>, vector<69x10xbf16>
    %c0_62 = arith.constant 0 : index
    %c30 = arith.constant 30 : index
    %56 = vector.load %arg14[%c0_62, %c30] : memref<222x144xbf16, #tpu.memory_space<vmem>>, vector<69x10xbf16>
    tpu.vector_store %arg14[%c0_62, %c30], %55 {strides = array<i32>} : memref<222x144xbf16, #tpu.memory_space<vmem>>, vector<69x10xbf16>,
    %c17_63 = arith.constant 17 : index
    %c0_64 = arith.constant 0 : index
    %57 = vector.load %arg16[%c17_63, %c0_64] : memref<103x10xbf16, #tpu.memory_space<vmem>>, vector<69x10xbf16>
    %c0_65 = arith.constant 0 : index
    %c40 = arith.constant 40 : index
    %58 = vector.load %arg14[%c0_65, %c40] : memref<222x144xbf16, #tpu.memory_space<vmem>>, vector<69x10xbf16>
    tpu.vector_store %arg14[%c0_65, %c40], %57 {strides = array<i32>} : memref<222x144xbf16, #tpu.memory_space<vmem>>, vector<69x10xbf16>,
    %c18_66 = arith.constant 18 : index
    %c0_67 = arith.constant 0 : index
    %59 = vector.load %arg16[%c18_66, %c0_67] : memref<103x10xbf16, #tpu.memory_space<vmem>>, vector<69x10xbf16>
    %c0_68 = arith.constant 0 : index
    %c50 = arith.constant 50 : index
    %60 = vector.load %arg14[%c0_68, %c50] : memref<222x144xbf16, #tpu.memory_space<vmem>>, vector<69x10xbf16>
    tpu.vector_store %arg14[%c0_68, %c50], %59 {strides = array<i32>} : memref<222x144xbf16, #tpu.memory_space<vmem>>, vector<69x10xbf16>,
    %c32_69 = arith.constant 32 : index
    %c0_70 = arith.constant 0 : index
    %61 = vector.load %arg16[%c32_69, %c0_70] : memref<103x10xbf16, #tpu.memory_space<vmem>>, vector<69x10xbf16>
    %c0_71 = arith.constant 0 : index
    %c60 = arith.constant 60 : index
    %62 = vector.load %arg14[%c0_71, %c60] : memref<222x144xbf16, #tpu.memory_space<vmem>>, vector<69x10xbf16>
    tpu.vector_store %arg14[%c0_71, %c60], %61 {strides = array<i32>} : memref<222x144xbf16, #tpu.memory_space<vmem>>, vector<69x10xbf16>,
    %c33_72 = arith.constant 33 : index
    %c0_73 = arith.constant 0 : index
    %63 = vector.load %arg16[%c33_72, %c0_73] : memref<103x10xbf16, #tpu.memory_space<vmem>>, vector<69x10xbf16>
    %c0_74 = arith.constant 0 : index
    %c70 = arith.constant 70 : index
    %64 = vector.load %arg14[%c0_74, %c70] : memref<222x144xbf16, #tpu.memory_space<vmem>>, vector<69x10xbf16>
    tpu.vector_store %arg14[%c0_74, %c70], %63 {strides = array<i32>} : memref<222x144xbf16, #tpu.memory_space<vmem>>, vector<69x10xbf16>,
    %c34_75 = arith.constant 34 : index
    %c0_76 = arith.constant 0 : index
    %65 = vector.load %arg16[%c34_75, %c0_76] : memref<103x10xbf16, #tpu.memory_space<vmem>>, vector<69x10xbf16>
    %c0_77 = arith.constant 0 : index
    %c80 = arith.constant 80 : index
    %66 = vector.load %arg14[%c0_77, %c80] : memref<222x144xbf16, #tpu.memory_space<vmem>>, vector<69x10xbf16>
    tpu.vector_store %arg14[%c0_77, %c80], %65 {strides = array<i32>} : memref<222x144xbf16, #tpu.memory_space<vmem>>, vector<69x10xbf16>,
    %c0_78 = arith.constant 0 : index
    %c0_79 = arith.constant 0 : index
    %67 = vector.load %arg14[%c0_78, %c0_79] : memref<222x144xbf16, #tpu.memory_space<vmem>>, vector<69x90xbf16>
    %c0_80 = arith.constant 0 : index
    %c0_81 = arith.constant 0 : index
    %68 = vector.load %arg5[%c0_80, %c0_81] : memref<90x16xbf16, #tpu.memory_space<vmem>>, vector<90x16xbf16>
    %cst_82 = arith.constant dense<0.000000e+00> : vector<69x16xf32>
    %69 = tpu.matmul %67, %68, %cst_82 {dimension_numbers = #tpu.dot_dimension_numbers<[1], [0], [0], [1], [0, 0, 1, 1], [], []>} : vector<69x90xbf16>, vector<90x16xbf16>, vector<69x16xf32> -> vector<69x16xf32>
    %c0_83 = arith.constant 0 : index
    %c0_84 = arith.constant 0 : index
    %70 = vector.load %arg6[%c0_83, %c0_84] : memref<1x16xf32, #tpu.memory_space<vmem>>, vector<1x16xf32>
    %71 = vector.broadcast %70 : vector<1x16xf32> to vector<69x16xf32>
    %72 = arith.addf %69, %71 : vector<69x16xf32>
    %cst_85 = arith.constant 0.000000e+00 : f32
    %73 = vector.broadcast %cst_85 : f32 to vector<69x16xf32>
    %74 = arith.cmpf ogt, %72, %73 : vector<69x16xf32>
    %c0_86 = arith.constant 0 : index
    %c0_87 = arith.constant 0 : index
    %75 = vector.load %arg7[%c0_86, %c0_87] : memref<1x16xf32, #tpu.memory_space<vmem>>, vector<1x16xf32>
    %76 = vector.broadcast %75 : vector<1x16xf32> to vector<69x16xf32>
    %77 = arith.mulf %76, %72 : vector<69x16xf32>
    %78 = arith.select %74, %72, %77 : vector<69x16xi1>, vector<69x16xf32>
    %79 = arith.truncf %78 : vector<69x16xf32> to vector<69x16xbf16>
    %c0_88 = arith.constant 0 : index
    %c0_89 = arith.constant 0 : index
    %80 = vector.load %arg17[%c0_88, %c0_89] : memref<69x16xbf16, #tpu.memory_space<vmem>>, vector<69x16xbf16>
    tpu.vector_store %arg17[%c0_88, %c0_89], %79 {strides = array<i32>} : memref<69x16xbf16, #tpu.memory_space<vmem>>, vector<69x16xbf16>,
    %c0_90 = arith.constant 0 : index
    %c0_91 = arith.constant 0 : index
    %81 = vector.load %arg17[%c0_90, %c0_91] : memref<69x16xbf16, #tpu.memory_space<vmem>>, vector<35x16xbf16>
    %c0_92 = arith.constant 0 : index
    %c0_93 = arith.constant 0 : index
    %82 = vector.load %arg14[%c0_92, %c0_93] : memref<222x144xbf16, #tpu.memory_space<vmem>>, vector<35x16xbf16>
    tpu.vector_store %arg14[%c0_92, %c0_93], %81 {strides = array<i32>} : memref<222x144xbf16, #tpu.memory_space<vmem>>, vector<35x16xbf16>,
    %c1_94 = arith.constant 1 : index
    %c0_95 = arith.constant 0 : index
    %83 = vector.load %arg17[%c1_94, %c0_95] : memref<69x16xbf16, #tpu.memory_space<vmem>>, vector<35x16xbf16>
    %c0_96 = arith.constant 0 : index
    %c16_97 = arith.constant 16 : index
    %84 = vector.load %arg14[%c0_96, %c16_97] : memref<222x144xbf16, #tpu.memory_space<vmem>>, vector<35x16xbf16>
    tpu.vector_store %arg14[%c0_96, %c16_97], %83 {strides = array<i32>} : memref<222x144xbf16, #tpu.memory_space<vmem>>, vector<35x16xbf16>,
    %c2_98 = arith.constant 2 : index
    %c0_99 = arith.constant 0 : index
    %85 = vector.load %arg17[%c2_98, %c0_99] : memref<69x16xbf16, #tpu.memory_space<vmem>>, vector<35x16xbf16>
    %c0_100 = arith.constant 0 : index
    %c32_101 = arith.constant 32 : index
    %86 = vector.load %arg14[%c0_100, %c32_101] : memref<222x144xbf16, #tpu.memory_space<vmem>>, vector<35x16xbf16>
    tpu.vector_store %arg14[%c0_100, %c32_101], %85 {strides = array<i32>} : memref<222x144xbf16, #tpu.memory_space<vmem>>, vector<35x16xbf16>,
    %c16_102 = arith.constant 16 : index
    %c0_103 = arith.constant 0 : index
    %87 = vector.load %arg17[%c16_102, %c0_103] : memref<69x16xbf16, #tpu.memory_space<vmem>>, vector<35x16xbf16>
    %c0_104 = arith.constant 0 : index
    %c48 = arith.constant 48 : index
    %88 = vector.load %arg14[%c0_104, %c48] : memref<222x144xbf16, #tpu.memory_space<vmem>>, vector<35x16xbf16>
    tpu.vector_store %arg14[%c0_104, %c48], %87 {strides = array<i32>} : memref<222x144xbf16, #tpu.memory_space<vmem>>, vector<35x16xbf16>,
    %c17_105 = arith.constant 17 : index
    %c0_106 = arith.constant 0 : index
    %89 = vector.load %arg17[%c17_105, %c0_106] : memref<69x16xbf16, #tpu.memory_space<vmem>>, vector<35x16xbf16>
    %c0_107 = arith.constant 0 : index
    %c64 = arith.constant 64 : index
    %90 = vector.load %arg14[%c0_107, %c64] : memref<222x144xbf16, #tpu.memory_space<vmem>>, vector<35x16xbf16>
    tpu.vector_store %arg14[%c0_107, %c64], %89 {strides = array<i32>} : memref<222x144xbf16, #tpu.memory_space<vmem>>, vector<35x16xbf16>,
    %c18_108 = arith.constant 18 : index
    %c0_109 = arith.constant 0 : index
    %91 = vector.load %arg17[%c18_108, %c0_109] : memref<69x16xbf16, #tpu.memory_space<vmem>>, vector<35x16xbf16>
    %c0_110 = arith.constant 0 : index
    %c80_111 = arith.constant 80 : index
    %92 = vector.load %arg14[%c0_110, %c80_111] : memref<222x144xbf16, #tpu.memory_space<vmem>>, vector<35x16xbf16>
    tpu.vector_store %arg14[%c0_110, %c80_111], %91 {strides = array<i32>} : memref<222x144xbf16, #tpu.memory_space<vmem>>, vector<35x16xbf16>,
    %c32_112 = arith.constant 32 : index
    %c0_113 = arith.constant 0 : index
    %93 = vector.load %arg17[%c32_112, %c0_113] : memref<69x16xbf16, #tpu.memory_space<vmem>>, vector<35x16xbf16>
    %c0_114 = arith.constant 0 : index
    %c96 = arith.constant 96 : index
    %94 = vector.load %arg14[%c0_114, %c96] : memref<222x144xbf16, #tpu.memory_space<vmem>>, vector<35x16xbf16>
    tpu.vector_store %arg14[%c0_114, %c96], %93 {strides = array<i32>} : memref<222x144xbf16, #tpu.memory_space<vmem>>, vector<35x16xbf16>,
    %c33_115 = arith.constant 33 : index
    %c0_116 = arith.constant 0 : index
    %95 = vector.load %arg17[%c33_115, %c0_116] : memref<69x16xbf16, #tpu.memory_space<vmem>>, vector<35x16xbf16>
    %c0_117 = arith.constant 0 : index
    %c112 = arith.constant 112 : index
    %96 = vector.load %arg14[%c0_117, %c112] : memref<222x144xbf16, #tpu.memory_space<vmem>>, vector<35x16xbf16>
    tpu.vector_store %arg14[%c0_117, %c112], %95 {strides = array<i32>} : memref<222x144xbf16, #tpu.memory_space<vmem>>, vector<35x16xbf16>,
    %c34_118 = arith.constant 34 : index
    %c0_119 = arith.constant 0 : index
    %97 = vector.load %arg17[%c34_118, %c0_119] : memref<69x16xbf16, #tpu.memory_space<vmem>>, vector<35x16xbf16>
    %c0_120 = arith.constant 0 : index
    %c128 = arith.constant 128 : index
    %98 = vector.load %arg14[%c0_120, %c128] : memref<222x144xbf16, #tpu.memory_space<vmem>>, vector<35x16xbf16>
    tpu.vector_store %arg14[%c0_120, %c128], %97 {strides = array<i32>} : memref<222x144xbf16, #tpu.memory_space<vmem>>, vector<35x16xbf16>,
    %c0_121 = arith.constant 0 : index
    %c0_122 = arith.constant 0 : index
    %99 = vector.load %arg14[%c0_121, %c0_122] : memref<222x144xbf16, #tpu.memory_space<vmem>>, vector<35x144xbf16>
    %c0_123 = arith.constant 0 : index
    %c0_124 = arith.constant 0 : index
    %100 = vector.load %arg8[%c0_123, %c0_124] : memref<144x32xbf16, #tpu.memory_space<vmem>>, vector<144x32xbf16>
    %cst_125 = arith.constant dense<0.000000e+00> : vector<35x32xf32>
    %101 = tpu.matmul %99, %100, %cst_125 {dimension_numbers = #tpu.dot_dimension_numbers<[1], [0], [0], [1], [0, 0, 1, 1], [], []>} : vector<35x144xbf16>, vector<144x32xbf16>, vector<35x32xf32> -> vector<35x32xf32>
    %c0_126 = arith.constant 0 : index
    %c0_127 = arith.constant 0 : index
    %102 = vector.load %arg9[%c0_126, %c0_127] : memref<1x32xf32, #tpu.memory_space<vmem>>, vector<1x32xf32>
    %103 = vector.broadcast %102 : vector<1x32xf32> to vector<35x32xf32>
    %104 = arith.addf %101, %103 : vector<35x32xf32>
    %cst_128 = arith.constant 0.000000e+00 : f32
    %105 = vector.broadcast %cst_128 : f32 to vector<35x32xf32>
    %106 = arith.cmpf ogt, %104, %105 : vector<35x32xf32>
    %c0_129 = arith.constant 0 : index
    %c0_130 = arith.constant 0 : index
    %107 = vector.load %arg10[%c0_129, %c0_130] : memref<1x32xf32, #tpu.memory_space<vmem>>, vector<1x32xf32>
    %108 = vector.broadcast %107 : vector<1x32xf32> to vector<35x32xf32>
    %109 = arith.mulf %108, %104 : vector<35x32xf32>
    %110 = arith.select %106, %104, %109 : vector<35x32xi1>, vector<35x32xf32>
    %111 = arith.truncf %110 : vector<35x32xf32> to vector<35x32xbf16>
    %c0_131 = arith.constant 0 : index
    %c0_132 = arith.constant 0 : index
    %112 = vector.load %arg11[%c0_131, %c0_132] : memref<32x5xbf16, #tpu.memory_space<vmem>>, vector<32x5xbf16>
    %cst_133 = arith.constant dense<0.000000e+00> : vector<35x5xf32>
    %113 = tpu.matmul %111, %112, %cst_133 {dimension_numbers = #tpu.dot_dimension_numbers<[1], [0], [0], [1], [0, 0, 1, 1], [], []>} : vector<35x32xbf16>, vector<32x5xbf16>, vector<35x5xf32> -> vector<35x5xf32>
    %c0_134 = arith.constant 0 : index
    %c0_135 = arith.constant 0 : index
    %114 = vector.load %arg12[%c0_134, %c0_135] : memref<1x5xf32, #tpu.memory_space<vmem>>, vector<1x5xf32>
    %115 = vector.broadcast %114 : vector<1x5xf32> to vector<35x5xf32>
    %116 = arith.addf %113, %115 : vector<35x5xf32>
    %117 = tpu.iota {dimensions = array<i32: 1>} : vector<35x5xi32>
    %cst_136 = arith.constant 0.000000e+00 : f32
    %118 = vector.broadcast %cst_136 : f32 to vector<35x5xf32>
    %119 = arith.subf %118, %116 : vector<35x5xf32>
    %120 = math.exp %119 : vector<35x5xf32>
    %cst_137 = arith.constant 1.000000e+00 : f32
    %121 = vector.broadcast %cst_137 : f32 to vector<35x5xf32>
    %122 = arith.addf %121, %120 : vector<35x5xf32>
    %cst_138 = arith.constant 1.000000e+00 : f32
    %123 = vector.broadcast %cst_138 : f32 to vector<35x5xf32>
    %124 = arith.divf %123, %122 : vector<35x5xf32>
    %c0_i32 = arith.constant 0 : i32
    %125 = vector.broadcast %c0_i32 : i32 to vector<35x5xi32>
    %126 = arith.cmpi eq, %117, %125 : vector<35x5xi32>
    %127 = arith.select %126, %124, %116 : vector<35x5xi1>, vector<35x5xf32>
    %c0_139 = arith.constant 0 : index
    %c0_140 = arith.constant 0 : index
    %c0_141 = arith.constant 0 : index
    %128 = vector.load %arg13[%c0_139, %c0_140, %c0_141] : memref<1x35x5xf32, #tpu.memory_space<vmem>>, vector<1x35x5xf32>
    %129 = vector.shape_cast %128 : vector<1x35x5xf32> to vector<35x5xf32>
    %130 = vector.shape_cast %127 : vector<35x5xf32> to vector<1x35x5xf32>
    tpu.vector_store %arg13[%c0_139, %c0_140, %c0_141], %130 {strides = array<i32>} : memref<1x35x5xf32, #tpu.memory_space<vmem>>, vector<1x35x5xf32>,
    return
  }
  func.func @transform_0(%arg0: i32) -> (i32, i32, i32) {
    %c0_i32 = arith.constant 0 : i32
    %c0_i32_0 = arith.constant 0 : i32
    %c0_i32_1 = arith.constant 0 : i32
    return %arg0, %c0_i32, %c0_i32_0 : i32, i32, i32
  }
  func.func @transform_1(%arg0: i32) -> (i32, i32) {
    %c0_i32 = arith.constant 0 : i32
    %c0_i32_0 = arith.constant 0 : i32
    %c0_i32_1 = arith.constant 0 : i32
    return %c0_i32, %c0_i32_0 : i32, i32
  }
  func.func @transform_2(%arg0: i32) -> (i32, i32) {
    %c0_i32 = arith.constant 0 : i32
    %c0_i32_0 = arith.constant 0 : i32
    %c0_i32_1 = arith.constant 0 : i32
    return %c0_i32, %c0_i32_0 : i32, i32
  }
  func.func @transform_3(%arg0: i32) -> (i32, i32) {
    %c0_i32 = arith.constant 0 : i32
    %c0_i32_0 = arith.constant 0 : i32
    %c0_i32_1 = arith.constant 0 : i32
    return %c0_i32, %c0_i32_0 : i32, i32
  }
  func.func @transform_4(%arg0: i32) -> (i32, i32) {
    %c0_i32 = arith.constant 0 : i32
    %c0_i32_0 = arith.constant 0 : i32
    %c0_i32_1 = arith.constant 0 : i32
    return %c0_i32, %c0_i32_0 : i32, i32
  }
  func.func @transform_5(%arg0: i32) -> (i32, i32) {
    %c0_i32 = arith.constant 0 : i32
    %c0_i32_0 = arith.constant 0 : i32
    %c0_i32_1 = arith.constant 0 : i32
    return %c0_i32, %c0_i32_0 : i32, i32
  }
  func.func @transform_6(%arg0: i32) -> (i32, i32) {
    %c0_i32 = arith.constant 0 : i32
    %c0_i32_0 = arith.constant 0 : i32
    %c0_i32_1 = arith.constant 0 : i32
    return %c0_i32, %c0_i32_0 : i32, i32
  }
  func.func @transform_7(%arg0: i32) -> (i32, i32) {
    %c0_i32 = arith.constant 0 : i32
    %c0_i32_0 = arith.constant 0 : i32
    %c0_i32_1 = arith.constant 0 : i32
    return %c0_i32, %c0_i32_0 : i32, i32
  }
  func.func @transform_8(%arg0: i32) -> (i32, i32) {
    %c0_i32 = arith.constant 0 : i32
    %c0_i32_0 = arith.constant 0 : i32
    %c0_i32_1 = arith.constant 0 : i32
    return %c0_i32, %c0_i32_0 : i32, i32
  }
  func.func @transform_9(%arg0: i32) -> (i32, i32) {
    %c0_i32 = arith.constant 0 : i32
    %c0_i32_0 = arith.constant 0 : i32
    %c0_i32_1 = arith.constant 0 : i32
    return %c0_i32, %c0_i32_0 : i32, i32
  }
  func.func @transform_10(%arg0: i32) -> (i32, i32) {
    %c0_i32 = arith.constant 0 : i32
    %c0_i32_0 = arith.constant 0 : i32
    %c0_i32_1 = arith.constant 0 : i32
    return %c0_i32, %c0_i32_0 : i32, i32
  }
  func.func @transform_11(%arg0: i32) -> (i32, i32) {
    %c0_i32 = arith.constant 0 : i32
    %c0_i32_0 = arith.constant 0 : i32
    %c0_i32_1 = arith.constant 0 : i32
    return %c0_i32, %c0_i32_0 : i32, i32
  }
  func.func @transform_12(%arg0: i32) -> (i32, i32, i32) {
    %c0_i32 = arith.constant 0 : i32
    %c0_i32_0 = arith.constant 0 : i32
    %c0_i32_1 = arith.constant 0 : i32
    return %arg0, %c0_i32, %c0_i32_0 : i32, i32, i32
  }
}

</mosaic_0001>

<bundles_post_ra>
// kernel: pnet_forward.1
= control target key start
LH: loop header
LB: loop body
LE: loop exit
PB: predicated region body
PF: predicated region fallthrough
CT: control target
= control target key end

     0   :  { %s5803_s21 = smov 0   ;;  %s8218_s0 = inlined_call_operand.vmem [shape: bf16[2,256,3], index: 0, kind: input, shape index: {}]   ;;  %s8219_s1 = inlined_call_operand.vmem [shape: bf16[27,10], index: 1, kind: input, shape index: {}]   ;;  %s8220_s2 = inlined_call_operand.vmem [shape: f32[1,10], index: 2, kind: input, shape index: {}]   ;;  %s8221_s3 = inlined_call_operand.vmem [shape: f32[1,10], index: 3, kind: input, shape index: {}]   ;;  %s8222_s4 = inlined_call_operand.vmem [shape: bf16[90,16], index: 4, kind: input, shape index: {}]   ;;  %s8223_s5 = inlined_call_operand.vmem [shape: f32[1,16], index: 5, kind: input, shape index: {}]   ;;  %s8224_s6 = inlined_call_operand.vmem [shape: f32[1,16], index: 6, kind: input, shape index: {}]   ;;  %s8225_s7 = inlined_call_operand.vmem [shape: bf16[144,32], index: 7, kind: input, shape index: {}]   ;;  %s8226_s8 = inlined_call_operand.vmem [shape: f32[1,32], index: 8, kind: input, shape index: {}]   ;;  %s8227_s9 = inlined_call_operand.vmem [shape: f32[1,32], index: 9, kind: input, shape index: {}]   ;;  %s8228_s10 = inlined_call_operand.vmem [shape: bf16[32,5], index: 10, kind: input, shape index: {}]   ;;  %s8229_s11 = inlined_call_operand.vmem [shape: f32[1,5], index: 11, kind: input, shape index: {}]   ;;  %s8230_s12 = inlined_call_operand.vmem [shape: f32[2,35,5], index: 12, kind: output, shape index: {}]  }
   0x1 LB: > { %s5352_s22 = sadd.s32 4294967295, %s5710_s21   ;;  %p5356_p0 = scmp.ge.s32.totalorder %s5710_s21, 1  ;;  %s5710_s21 = sphi %s5803_s21, %s22_s21  }
   0x2   : > { %p362_p1 = scmp.lt.s32.totalorder %s5710_s21, 3 }
   0x4   : > { %p363_p2 = pnand %p5356_p0, %p362_p1 }
   0x5   : > { %p404_p3 = scmp.lt.s32.totalorder (!%p363_p2), %s5352_s22, 1  ;;  %vm953_vm0 = vcmask (!%p363_p2), 1042432   ;;  %vm954_vm1 = vcmask (!%p363_p2), 1046532   ;;  %vm8231_vm2 = vsmask.f32 (!%p363_p2), 3328  ;;  %s5712_s27 = smov (!%p363_p2), 9  }
   0x6   : > { %366 = sbr.rel (%p363_p2) target bundleno = 1822 (0x71e), region = 68  ;;  %vm502_vm3 = vsmask.f32 (!%p363_p2), 7440  ;;  %vm5825_vm4 = vmor (!%p363_p2), %vm953_vm0, %vm954_vm1  ;;  %s5713_s28 = smov (!%p363_p2), 6   ;;  %vm443_vm6 = vcmask (!%p363_p2), 19456   ;;  %vm8232_vm7 = vcmask (!%p363_p2), 1044480  }
   0x7   : > { %vm5860_vm5 = vmor (!%p363_p2), %vm8231_vm2, %vm502_vm3  ;;  %s5714_s29 = smov (!%p363_p2), 3   ;;  %s5715_s30 = smov (!%p363_p2), 12   ;;  %vm3005_vm8 = vcmask (!%p363_p2), 1045504   ;;  %vm867_vm9 = vcmask (!%p363_p2), 44056   ;;  %vm1123_vm10 = vcmask (!%p363_p2), 68656   ;;  %vm1293_vm11 = vcmask (!%p363_p2), 93256  }
   0x8   : > { %s5716_s13 = smov (!%p363_p2), 15   ;;  %s5717_s14 = smov (!%p363_p2), 18   ;;  %vm8233_vm12 = vcmask (!%p363_p2), 117856   ;;  %vm1967_vm13 = vcmask (!%p363_p2), 142456   ;;  %vm2137_vm14 = vcmask (!%p363_p2), 167056   ;;  %vm2558_vm15 = vcmask (!%p363_p2), 191656  }
   0x9   : > { %s5718_s15 = smov (!%p363_p2), 21   ;;  %s5719_s18 = smov (!%p363_p2), 24   ;;  %vm2811_vm0 = vcmask (!%p363_p2), 216256   ;;  %vm2961_vm1 = vcmask (!%p363_p2), 220160   ;;  %vm471_vm3 = vcmask (!%p363_p2), 18432   ;;  %v5680_v43 = vld [vmem:[%s8228_s10] sm:$0xff] (!%p363_p2)  }
   0xa   : > { %s5728_s16 = smov (!%p363_p2), 80   ;;  %s5734_s17 = smov (!%p363_p2), 64  }
   0xd   : > { %s8267_s22 = smov (!%p404_p3, %s5352_s22), 1 }
   0xe   : > { %s5469_s23 = sshll.u32 %s8267_s22, 7  ;;  %s5604_s20 = smul.u32 40, %s8267_s22 }
   0xf   : > { %s5817_s26 = scalar_lea.vmem %s8218_s0, %s5469_s23 }
  0x10   : > { %v1153_v0 = vld [vmem:[%s5817_s26 + $0x8] sm:$0xf]  ;;  %v1154_v1 = vld [vmem:[%s5817_s26 + $0xc] sm:$0xf]  ;;  %v897_v2 = vld [vmem:[%s5817_s26] sm:$0xe]  ;;  %s413_s24 = scalar_lea.vmem %s8230_s12, %s5604_s20 }
  0x11   : > { %1209 = vrot.lane.b32.xlu0 %v1153_v0, %s5712_s27  ;;  %1211 = vrot.lane.b32.xlu1 %v1154_v1, %s5712_s27  ;;  %v898_v3 = vld [vmem:[%s5817_s26 + $0x4] sm:$0xf]  ;;  %v5360_v5 = vrot.slane %v897_v2, 9  ;;  %v899_v6 = vld [vmem:[%s5817_s26 + $0x8] sm:$0xf] }
  0x12   : > { %v958_v7 = vrot.slane %v898_v3, 5  ;;  %v961_v8 = vrot.slane %v899_v6, 5  ;;  %v900_v9 = vld [vmem:[%s5817_s26 + $0xc] sm:$0xf]  ;;  %v5832_v10 = vld [vmem:[%s5817_s26 + $0x10] sm:$0xf] }
  0x13   : > { %v964_v11 = vrot.slane %v900_v9, 5  ;;  %v967_v12 = vrot.slane %v5832_v10, 5  ;;  %v473_v13 = vld [vmem:[%s5817_s26] sm:$0xf]  ;;  %v474_v14 = vld [vmem:[%s5817_s26 + $0x4] sm:$0xf] }
  0x14   : > { %v959_v15 = vsel %vm5825_vm4, %v5360_v5, %v958_v7  ;;  %v960_v16 = vrot.slane %v958_v7, 4  ;;  %v963_v17 = vrot.slane %v961_v8, 4  ;;  %v505_v18 = vshrl.u32 %v473_v13, 16  ;;  %v475_v19 = vld [vmem:[%s5817_s26 + $0x8] sm:$0xf] }
  0x15   : > { %1039 = vrot.lane.b32.xlu0 %v959_v15, %s5713_s28  ;;  %v966_v20 = vrot.slane %v964_v11, 4  ;;  %v508_v21 = vshll.u32 %v473_v13, 16  ;;  %v514_v22 = vshll.u32 %v474_v14, 16  ;;  %v518_v23 = vshrl.u32 %v474_v14, 16  ;;  %v476_v24 = vld [vmem:[%s5817_s26 + $0xc] sm:$0xf] }
  0x16   : > { %v962_v25 = vsel %vm5825_vm4, %v960_v16, %v961_v8  ;;  %v965_v26 = vsel %vm5825_vm4, %v963_v17, %v964_v11  ;;  %v507_v27 = vrot.slane %v505_v18, 4  ;;  %v524_v28 = vshll.u32 %v475_v19, 16  ;;  %v5847_v29 = vld [vmem:[%s5817_s26 + $0x10] sm:$0xf]  ;;  %v1324_v38 = vld [vmem:[%s5817_s26 + $0xc] sm:$0xf] }
  0x17   : > { %1041 = vrot.lane.b32.xlu1 %v962_v25, %s5713_s28  ;;  %v968_v30 = vsel %vm5825_vm4, %v966_v20, %v967_v12  ;;  %v510_v31 = vrot.slane %v508_v21, 5  ;;  %v516_v32 = vrot.slane %v514_v22, 5  ;;  %v528_v33 = vshrl.u32 %v475_v19, 16  ;;  %v1325_v42 = vld [vmem:[%s5817_s26 + $0x10] sm:$0xf] }
  0x18   : > { %v526_v34 = vrot.slane %v524_v28, 5  ;;  %v534_v35 = vshll.u32 %v476_v24, 16  ;;  %v538_v36 = vshrl.u32 %v476_v24, 16  ;;  %v520_v37 = vrot.slane %v518_v23, 4  ;;  %v1323_v51 = vld [vmem:[%s5817_s26 + $0x8] sm:$0xf] }
  0x19   : > { %1043 = vrot.lane.b32.xlu0 %v965_v26, %s5713_s28  ;;  %v511_v39 = vor.u32 %v510_v31, %v507_v27  ;;  %v530_v40 = vrot.slane %v528_v33, 4  ;;  %v544_v41 = vshll.u32 %v5847_v29, 16  ;;  %v1361_v47 = vshll.u32 %v1324_v38, 16  ;;  %v1326_v56 = vld [vmem:[%s5817_s26 + $0x14] sm:$0xf] }
  0x1a   : > { %v536_v44 = vrot.slane %v534_v35, 5  ;;  %v521_v45 = vor.u32 %v520_v37, %v516_v32  ;;  %v540_v46 = vrot.slane %v538_v36, 4  ;;  %v1365_v50 = vshrl.u32 %v1324_v38, 16  ;;  %v5882_v14 = vld [vmem:[%s5817_s26 + $0x18] sm:$0xf] }
  0x1b   : > { %1045 = vrot.lane.b32.xlu1 %v968_v30, %s5713_s28  ;;  %v512_v48 = vrot.slane %v511_v39, 4  ;;  %v531_v49 = vor.u32 %v530_v40, %v526_v34  ;;  %v5866_v54 = vrot.slane %v544_v41, 5  ;;  %v1371_v55 = vshll.u32 %v1325_v42, 16  ;;  %v1155_v17 = vld [vmem:[%s5817_s26 + $0x10] sm:$0xf] }
  0x1c   : > { %v522_v52 = vrot.slane %v521_v45, 4  ;;  %v541_v53 = vor.u32 %v540_v46, %v536_v44  ;;  %v1363_v59 = vrot.slane %v1361_v47, 5  ;;  %v1367_v60 = vrot.slane %v1365_v50, 4  ;;  %v1156_v20 = vld [vmem:[%s5817_s26 + $0x14] sm:$0xf] }
  0x1d   : > { %v517_v57 = vsel %vm5860_vm5, %v512_v48, %v516_v32  ;;  %v532_v58 = vrot.slane %v531_v49, 4  ;;  %v1375_v62 = vshrl.u32 %v1325_v42, 16  ;;  %v1352_v63 = vshrl.u32 %v1323_v51, 16  ;;  %v1745_v25 = vld [vmem:[%s5817_s26 + $0xc] sm:$0xf] }
  0x1e   : > { %783 = vrot.lane.b32.xlu0 %v517_v57, %s5714_s29  ;;  %v542_v61 = vrot.slane %v541_v53, 4  ;;  %v527_v1 = vsel %vm5860_vm5, %v522_v52, %v526_v34  ;;  %v1355_v2 = vshll.u32 %v1323_v51, 16  ;;  %v1381_v3 = vshll.u32 %v1326_v56, 16  ;;  %v1746_v28 = vld [vmem:[%s5817_s26 + $0x10] sm:$0xf] }
  0x1f   : > { %v537_v0 = vsel %vm5860_vm5, %v532_v58, %v536_v44  ;;  %v1373_v5 = vrot.slane %v1371_v55, 5  ;;  %v1354_v6 = vrot.slane %v1352_v63, 4  ;;  %v1385_v7 = vshrl.u32 %v1326_v56, 16  ;;  %v1744_v30 = vld [vmem:[%s5817_s26 + $0x8] sm:$0xe] }
  0x20   : > { %787 = vrot.lane.b32.xlu1 %v537_v0, %s5714_s29  ;;  %v547_v8 = vsel %vm5860_vm5, %v542_v61, %v5866_v54  ;;  %v1368_v9 = vor.u32 %v1367_v60, %v1363_v59  ;;  %v1357_v11 = vrot.slane %v1355_v2, 5  ;;  %v1383_v13 = vrot.slane %v1381_v3, 5  ;;  %v1747_v35 = vld [vmem:[%s5817_s26 + $0x14] sm:$0xf]  ;;  %v2167_v40 = vld [vmem:[%s5817_s26 + $0x10] sm:$0xf] }
  0x21   : > { %v1387_v15 = vrot.slane %v1385_v7, 4  ;;  %v1377_v16 = vrot.slane %v1375_v62, 4  ;;  %v1391_v24 = vshll.u32 %v5882_v14, 16  ;;  %v1802_v34 = vrot.slane %v1745_v25, 5  ;;  %v5909_v44 = vld [vmem:[%s5817_s26 + $0x18] sm:$0xf] }
  0x22   : > { %785 = vrot.lane.b32.xlu0 %v527_v1, %s5714_s29  ;;  %v1358_v18 = vor.u32 %v1357_v11, %v1354_v6  ;;  %v1369_v21 = vrot.slane %v1368_v9, 4  ;;  %v5361_v37 = vrot.slane %v1744_v30, 9  ;;  %v1805_v38 = vrot.slane %v1746_v28, 5  ;;  %v2168_v46 = vld [vmem:[%s5817_s26 + $0x14] sm:$0xf] }
  0x23   : > { %v1378_v19 = vor.u32 %v1377_v16, %v1373_v5  ;;  %v1388_v23 = vor.u32 %v1387_v15, %v1383_v13  ;;  %v5897_v33 = vrot.slane %v1391_v24, 5  ;;  %v1808_v39 = vrot.slane %v1747_v35, 5  ;;  %v2169_v52 = vld [vmem:[%s5817_s26 + $0x18] sm:$0xf]  ;;  %v2170_v58 = vld [vmem:[%s5817_s26 + $0x1c] sm:$0xf] }
  0x24   : > { %789 = vrot.lane.b32.xlu1 %v547_v8, %s5714_s29  ;;  %v1359_v22 = vrot.slane %v1358_v18, 4  ;;  %v1374_v31 = vsel %vm5860_vm5, %v1369_v21, %v1373_v5  ;;  %v1804_v42 = vrot.slane %v1802_v34, 4  ;;  %v1807_v45 = vrot.slane %v1805_v38, 4  ;;  %v1997_v5 = vld [vmem:[%s5817_s26 + $0x10] sm:$0xf] }
  0x25   : > { %v1379_v27 = vrot.slane %v1378_v19, 4  ;;  %v1389_v32 = vrot.slane %v1388_v23, 4  ;;  %v1803_v47 = vsel %vm5825_vm4, %v5361_v37, %v1802_v34  ;;  %v2196_v48 = vshrl.u32 %v2167_v40, 16  ;;  %v1998_v9 = vld [vmem:[%s5817_s26 + $0x14] sm:$0xf] }
  0x26   : > { %1213 = vrot.lane.b32.xlu0 %v1155_v17, %s5712_s27  ;;  %v1364_v26 = vsel %vm5860_vm5, %v1359_v22, %v1363_v59  ;;  %v2199_v49 = vshll.u32 %v2167_v40, 16  ;;  %v1810_v50 = vrot.slane %v1808_v39, 4  ;;  %v1811_v51 = vrot.slane %v5909_v44, 5  ;;  %v478_v17 = vld [vmem:[%s5817_s26 + $0x14] sm:$0xf] }
  0x27   : > { %v1384_v36 = vsel %vm5860_vm5, %v1379_v27, %v1383_v13  ;;  %v1394_v41 = vsel %vm5860_vm5, %v1389_v32, %v5897_v33  ;;  %v1806_v53 = vsel %vm5825_vm4, %v1804_v42, %v1805_v38  ;;  %v2205_v55 = vshll.u32 %v2168_v46, 16  ;;  %v5934_v13 = vld [vmem:[%s5817_s26 + $0x20] sm:$0xf]  ;;  %v1999_v19 = vld [vmem:[%s5817_s26 + $0x18] sm:$0xf] }
  0x28   : > { %1215 = vrot.lane.b32.xlu1 %v1156_v20, %s5712_s27  ;;  %v2209_v56 = vshrl.u32 %v2168_v46, 16  ;;  %v1809_v57 = vsel %vm5825_vm4, %v1807_v45, %v1808_v39  ;;  %v2215_v59 = vshll.u32 %v2169_v52, 16  ;;  %v2219_v60 = vshrl.u32 %v2169_v52, 16  ;;  %v2000_v22 = vld [vmem:[%s5817_s26 + $0x1c] sm:$0xf] }
  0x29   : > { %v2198_v61 = vrot.slane %v2196_v48, 4  ;;  %v2201_v62 = vrot.slane %v2199_v49, 5  ;;  %v1812_v63 = vsel %vm5825_vm4, %v1810_v50, %v1811_v51  ;;  %v2207_v0 = vrot.slane %v2205_v55, 5  ;;  %v2590_v34 = vld [vmem:[%s5817_s26 + $0x18] sm:$0xf] }
  0x2a   : > { %1630 = vrot.lane.b32.xlu0 %v1364_v26, %s5715_s30  ;;  %v2211_v1 = vrot.slane %v2209_v56, 4  ;;  %v2225_v2 = vshll.u32 %v2170_v58, 16  ;;  %v2229_v3 = vshrl.u32 %v2170_v58, 16  ;;  %v2217_v6 = vrot.slane %v2215_v59, 5  ;;  %v2589_v26 = vld [vmem:[%s5817_s26 + $0x14] sm:$0xf] }
  0x2b   : > { %v2202_v7 = vor.u32 %v2201_v62, %v2198_v61  ;;  %v2221_v8 = vrot.slane %v2219_v60, 4  ;;  %v548_v18 = vshrl.u32 %v5847_v29, 16  ;;  %v2235_v23 = vshll.u32 %v5934_v13, 16  ;;  %v479_v39 = vld [vmem:[%s5817_s26 + $0x18] sm:$0xf]  ;;  %v5639_v61 = vld [vmem:[%s8219_s1] sm:$0xff]  }
  0x2c   : > { %1632 = vrot.lane.b32.xlu1 %v1374_v31, %s5715_s30  ;;  %v2212_v11 = vor.u32 %v2211_v1, %v2207_v0  ;;  %v2227_v15 = vrot.slane %v2225_v2, 5  ;;  %v2231_v16 = vrot.slane %v2229_v3, 4  ;;  %v554_v27 = vshll.u32 %v478_v17, 16  ;;  %v480_v45 = vld [vmem:[%s5817_s26 + $0x1c] sm:$0xf]  ;;  %5524 = vmatprep.subr.bf16.mxu0 %v5639_v61 }
  0x2d   : > { %v2203_v20 = vrot.slane %v2202_v7, 4  ;;  %v2222_v21 = vor.u32 %v2221_v8, %v2217_v6  ;;  %v558_v28 = vshrl.u32 %v478_v17, 16  ;;  %v550_v31 = vrot.slane %v548_v18, 4  ;;  %v2591_v56 = vld [vmem:[%s5817_s26 + $0x1c] sm:$0xf]  ;;  %5525 = vmatpush3.bf16.msra.mxu0 %v5639_v61 }
  0x2e   : > { %1634 = vrot.lane.b32.xlu0 %v1384_v36, %s5715_s30  ;;  %v2213_v24 = vrot.slane %v2212_v11, 4  ;;  %v2232_v25 = vor.u32 %v2231_v16, %v2227_v15  ;;  %v5948_v32 = vrot.slane %v2235_v23, 5  ;;  %v2646_v35 = vrot.slane %v2589_v26, 5  ;;  %v2588_v36 = vld [vmem:[%s5817_s26 + $0x10] sm:$0xe] }
  0x2f   : > { %v2208_v29 = vsel %vm5860_vm5, %v2203_v20, %v2207_v0  ;;  %v2223_v30 = vrot.slane %v2222_v21, 4  ;;  %v556_v40 = vrot.slane %v554_v27, 5  ;;  %v568_v42 = vshrl.u32 %v479_v39, 16  ;;  %v5975_v2 = vld [vmem:[%s5817_s26 + $0x20] sm:$0xf] }
  0x30   : > { %1636 = vrot.lane.b32.xlu1 %v1394_v41, %s5715_s30  ;;  %v2218_v37 = vsel %vm5860_vm5, %v2213_v24, %v2217_v6  ;;  %v2233_v38 = vrot.slane %v2232_v25, 4  ;;  %v560_v41 = vrot.slane %v558_v28, 4  ;;  %v551_v48 = vor.u32 %v550_v31, %v5866_v54  ;;  %v5979_v6 = vld [vmem:[%s5817_s26 + $0x20] sm:$0xf]  ;;  %v902_v20 = vld [vmem:[%s5817_s26 + $0x14] sm:$0xf] }
  0x31   : > { %v2228_v46 = vsel %vm5860_vm5, %v2223_v30, %v2227_v15  ;;  %v2648_v49 = vrot.slane %v2646_v35, 4  ;;  %v2649_v50 = vrot.slane %v2590_v34, 5  ;;  %v564_v52 = vshll.u32 %v479_v39, 16  ;;  %v415_v21 = vld [vmem:[%s5817_s26] sm:$0xf] }
  0x32   : > { %1883 = vrot.lane.b32.xlu0 %v1803_v47, %s5716_s13  ;;  %v5362_v47 = vrot.slane %v2588_v36, 9  ;;  %v561_v55 = vor.u32 %v560_v41, %v556_v40  ;;  %v578_v58 = vshrl.u32 %v480_v45, 16  ;;  %v570_v59 = vrot.slane %v568_v42, 4  ;;  %v417_v23 = vld [vmem:[%s5817_s26 + $0x8] sm:$0xf] }
  0x33   : > { %v552_v60 = vrot.slane %v551_v48, 4  ;;  %v566_v62 = vrot.slane %v564_v52, 5  ;;  %v2650_v0 = vsel %vm5825_vm4, %v2648_v49, %v2649_v50  ;;  %v2655_v15 = vrot.slane %v5975_v2, 5  ;;  %v416_v24 = vld [vmem:[%s5817_s26 + $0x4] sm:$0xf] }
  0x34   : > { %1885 = vrot.lane.b32.xlu1 %v1806_v53, %s5716_s13  ;;  %v2238_v53 = vsel %vm5860_vm5, %v2233_v38, %v5948_v32  ;;  %v2647_v54 = vsel %vm5825_vm4, %v5362_v47, %v2646_v35  ;;  %v562_v1 = vrot.slane %v561_v55, 4  ;;  %v584_v18 = vshll.u32 %v5979_v6, 16  ;;  %v418_v25 = vld [vmem:[%s5817_s26 + $0xc] sm:$0xf]  ;;  %v904_v30 = vld [vmem:[%s5817_s26 + $0x1c] sm:$0xf] }
  0x35   : > { %v571_v7 = vor.u32 %v570_v59, %v566_v62  ;;  %v557_v8 = vsel %vm5860_vm5, %v552_v60, %v556_v40  ;;  %v903_v31 = vld [vmem:[%s5817_s26 + $0x18] sm:$0xf]  ;;  %444 = vst.msk [vmem:[#allocation2] sm:$0xf] %vm443_vm6, %v415_v21  ;;  %446 = vst.msk [vmem:[#allocation2 + $0x10] sm:$0xf] %vm443_vm6, %v417_v23 }
  0x36   : > { %1887 = vrot.lane.b32.xlu0 %v1809_v57, %s5716_s13  ;;  %v574_v57 = vshll.u32 %v480_v45, 16  ;;  %v567_v16 = vsel %vm5860_vm5, %v562_v1, %v566_v62  ;;  %v6001_v28 = vrot.slane %v584_v18, 5  ;;  %445 = vst.msk [vmem:[#allocation2 + $0x8] sm:$0xf] %vm443_vm6, %v416_v24  ;;  %447 = vst.msk [vmem:[#allocation2 + $0x18] sm:$0xf] %vm443_vm6, %v418_v25 }
  0x37   : > { %v969_v35 = vrot.slane %v967_v12, 4  ;;  %v976_v36 = vrot.slane %v904_v30, 5  ;;  %v973_v39 = vrot.slane %v903_v31, 5  ;;  %v6019_v40 = vld [vmem:[%s5817_s26 + $0x20] sm:$0xf]  ;;  %v1395_v42 = vshrl.u32 %v5882_v14, 16 }
  0x38   : > { %1889 = vrot.lane.b32.xlu1 %v1812_v63, %s5716_s13  ;;  %v2652_v63 = vrot.slane %v2591_v56, 5  ;;  %v576_v3 = vrot.slane %v574_v57, 5  ;;  %v1328_v41 = vld [vmem:[%s5817_s26 + $0x1c] sm:$0xf]  ;;  %v1329_v45 = vld [vmem:[%s5817_s26 + $0x20] sm:$0xf] }
  0x39   : > { %v975_v12 = vrot.slane %v973_v39, 4  ;;  %v979_v47 = vrot.slane %v6019_v40, 5  ;;  %v1401_v49 = vshll.u32 %v1328_v41, 16  ;;  %v1411_v14 = vshll.u32 %v1329_v45, 16  ;;  %v1330_v52 = vld [vmem:[%s5817_s26 + $0x24] sm:$0xf] }
  0x3a   : > { %2053 = vrot.lane.b32.xlu0 %v1997_v5, %s5717_s14  ;;  %v580_v5 = vrot.slane %v578_v58, 4  ;;  %v2654_v11 = vrot.slane %v2652_v63, 4  ;;  %v1415_v55 = vshrl.u32 %v1329_v45, 16  ;;  %v1397_v56 = vrot.slane %v1395_v42, 4  ;;  %v420_v57 = vld [vmem:[%s5817_s26 + $0x14] sm:$0xf] }
  0x3b   : > { %v419_v58 = vld [vmem:[%s5817_s26 + $0x10] sm:$0xf]  ;;  %449 = vst.msk [vmem:[#allocation2 + $0x28] sm:$0xf] %vm443_vm6, %v420_v57  ;;  %v1421_v61 = vshll.u32 %v1330_v52, 16  ;;  %v1425_v62 = vshrl.u32 %v1330_v52, 16 }
  0x3c   : > { %2055 = vrot.lane.b32.xlu1 %v1998_v9, %s5717_s14  ;;  %v2651_v9 = vrot.slane %v2649_v50, 4  ;;  %v581_v17 = vor.u32 %v580_v5, %v576_v3  ;;  %v2656_v26 = vsel %vm5825_vm4, %v2654_v11, %v2655_v15  ;;  %v1405_v50 = vshrl.u32 %v1328_v41, 16  ;;  %448 = vst.msk [vmem:[#allocation2 + $0x20] sm:$0xf] %vm443_vm6, %v419_v58  ;;  %v422_v5 = vld [vmem:[%s5817_s26 + $0x1c] sm:$0xf] }
  0x3d   : > { %v1398_v1 = vor.u32 %v1397_v56, %v5897_v33  ;;  %451 = vst.msk [vmem:[#allocation2 + $0x38] sm:$0xf] %vm443_vm6, %v422_v5  ;;  %v1423_v11 = vrot.slane %v1421_v61, 5  ;;  %v1159_v33 = vld [vmem:[%s5817_s26 + $0x20] sm:$0xf] }
  0x3e   : > { %2057 = vrot.lane.b32.xlu0 %v1999_v19, %s5717_s14  ;;  %v572_v19 = vrot.slane %v571_v7, 4  ;;  %v582_v27 = vrot.slane %v581_v17, 4  ;;  %v1407_v60 = vrot.slane %v1405_v50, 4  ;;  %v421_v7 = vld [vmem:[%s5817_s26 + $0x18] sm:$0xf] }
  0x3f   : > { %450 = vst.msk [vmem:[#allocation2 + $0x30] sm:$0xf] %vm443_vm6, %v421_v7  ;;  %v6055_v17 = vld [vmem:[%s5817_s26 + $0x28] sm:$0xf]  ;;  %v1399_v18 = vrot.slane %v1398_v1, 4 }
  0x40   : > { %2059 = vrot.lane.b32.xlu1 %v2000_v22, %s5717_s14  ;;  %v2653_v22 = vsel %vm5825_vm4, %v2651_v9, %v2652_v63  ;;  %v577_v34 = vsel %vm5860_vm5, %v572_v19, %v576_v3  ;;  %v1157_v63 = vld [vmem:[%s5817_s26 + $0x18] sm:$0xf]  ;;  %v1417_v3 = vrot.slane %v1415_v55, 4  ;;  %v1431_v23 = vshll.u32 %v6055_v17, 16  ;;  %v1749_v24 = vld [vmem:[%s5817_s26 + $0x1c] sm:$0xf] }
  0x41   : > { %v6082_v42 = vld [vmem:[%s5817_s26 + $0x28] sm:$0xf]  ;;  %v2172_v45 = vld [vmem:[%s5817_s26 + $0x24] sm:$0xf]  ;;  %v5720_v55 = vmov 65535  }
  0x42   : > { %2474 = vrot.lane.b32.xlu0 %v2208_v29, %s5718_s15  ;;  %v970_v29 = vrot.slane %v902_v20, 5  ;;  %v1160_v20 = vld [vmem:[%s5817_s26 + $0x24] sm:$0xf]  ;;  %v6068_v31 = vrot.slane %v1431_v23, 5  ;;  %v2249_v52 = vshrl.u32 %v2172_v45, 16  ;;  %v3006_v56 = vsel %vm8232_vm7, 4294967295, %v5720_v55 }
  0x43   : > { %v3007_v58 = vsel %vm3005_vm8, %v3006_v56, 0  ;;  %v2001_v5 = vld [vmem:[%s5817_s26 + $0x20] sm:$0xf]  ;;  %v2595_v2 = vld [vmem:[%s5817_s26 + $0x2c] sm:$0xf] }
  0x44   : > { %2476 = vrot.lane.b32.xlu1 %v2218_v37, %s5718_s15  ;;  %v587_v37 = vsel %vm5860_vm5, %v582_v27, %v6001_v28  ;;  %v972_v38 = vrot.slane %v970_v29, 4  ;;  %v971_v10 = vsel %vm5825_vm4, %v969_v35, %v970_v29  ;;  %v1814_v27 = vrot.slane %v1749_v24, 5  ;;  %v1751_v35 = vld [vmem:[%s5817_s26 + $0x24] sm:$0xf] }
  0x46   : > { %2478 = vrot.lane.b32.xlu0 %v2228_v46, %s5718_s15  ;;  %v978_v46 = vrot.slane %v976_v36, 4  ;;  %v974_v48 = vsel %vm5825_vm4, %v972_v38, %v973_v39  ;;  %v1816_v38 = vrot.slane %v1814_v27, 4 }
  0x48   : > { %2480 = vrot.lane.b32.xlu1 %v2238_v53, %s5718_s15  ;;  %v977_v53 = vsel %vm5825_vm4, %v975_v12, %v976_v36  ;;  %v980_v59 = vsel %vm5825_vm4, %v978_v46, %v979_v47  ;;  %v2239_v12 = vshrl.u32 %v5934_v13, 16  ;;  %v2173_v46 = vld [vmem:[%s5817_s26 + $0x28] sm:$0xf]  ;;  %v1823_v13 = vrot.slane %v6082_v42, 5  ;;  %v2176_v42 = vld [vmem:[%s5817_s26 + $0x34] sm:$0xf] }
  0x49   : > { %v2255_v57 = vshll.u32 %v2173_v46, 16 }
  0x4a   : > { %2727 = vrot.lane.b32.xlu0 %v2647_v54, %s5719_s18  ;;  %v1403_v54 = vrot.slane %v1401_v49, 5 }
  0x4b   : > { %v2257_v7 = vrot.slane %v2255_v57, 5 }
  0x4c   : > { %2729 = vrot.lane.b32.xlu1 %v2650_v0, %s5719_s18  ;;  %v1413_v0 = vrot.slane %v1411_v14, 5  ;;  %v1408_v9 = vor.u32 %v1407_v60, %v1403_v54  ;;  %v1404_v25 = vsel %vm5860_vm5, %v1399_v18, %v1403_v54  ;;  %v2245_v14 = vshll.u32 %v2172_v45, 16 }
  0x4d   : > { %v2259_v54 = vshrl.u32 %v2173_v46, 16  ;;  %v2241_v60 = vrot.slane %v2239_v12, 4  ;;  %v423_v46 = vld [vmem:[%s5817_s26 + $0x20] sm:$0xf] }
  0x4e   : > { %791 = vrot.lane.b32.xlu0 %v557_v8, %s5714_s29  ;;  %v1158_v8 = vld [vmem:[%s5817_s26 + $0x1c] sm:$0xf]  ;;  %v1418_v19 = vor.u32 %v1417_v3, %v1413_v0  ;;  %v1409_v21 = vrot.slane %v1408_v9, 4  ;;  %v2247_v1 = vrot.slane %v2245_v14, 5  ;;  %v2251_v3 = vrot.slane %v2249_v52, 4 }
  0x4f   : > { %v2261_v9 = vrot.slane %v2259_v54, 4  ;;  %452 = vst.msk [vmem:[#allocation2 + $0x40] sm:$0xf] %vm443_vm6, %v423_v46  ;;  %v2657_v52 = vrot.slane %v2655_v15, 4 }
  0x50   : > { %793 = vrot.lane.b32.xlu1 %v567_v16, %s5714_s29  ;;  %v1427_v16 = vrot.slane %v1425_v62, 4  ;;  %v1414_v29 = vsel %vm5860_vm5, %v1409_v21, %v1413_v0  ;;  %v2252_v18 = vor.u32 %v2251_v3, %v2247_v1  ;;  %v588_v21 = vshrl.u32 %v5979_v6, 16  ;;  %v6160_v3 = vld [vmem:[%s5817_s26 + $0x30] sm:$0xf] }
  0x51   : > { %v2262_v24 = vor.u32 %v2261_v9, %v2257_v7 }
  0x52   : > { %2731 = vrot.lane.b32.xlu0 %v2653_v22, %s5719_s18  ;;  %v1428_v22 = vor.u32 %v1427_v16, %v1423_v11 }
  0x54   : > { %2733 = vrot.lane.b32.xlu1 %v2656_v26, %s5719_s18  ;;  %v1419_v26 = vrot.slane %v1418_v19, 4  ;;  %v1429_v30 = vrot.slane %v1428_v22, 4  ;;  %v6113_v19 = vld [vmem:[%s5817_s26 + $0x30] sm:$0xf]  ;;  %v2003_v22 = vld [vmem:[%s5817_s26 + $0x28] sm:$0xf] }
  0x56   : > { %795 = vrot.lane.b32.xlu0 %v577_v34, %s5714_s29  ;;  %v1750_v34 = vld [vmem:[%s5817_s26 + $0x20] sm:$0xf]  ;;  %v1424_v36 = vsel %vm5860_vm5, %v1419_v26, %v1423_v11  ;;  %v1434_v41 = vsel %vm5860_vm5, %v1429_v30, %v6068_v31  ;;  %v2275_v26 = vshll.u32 %v6113_v19, 16 }
  0x57   : > { %v1817_v39 = vrot.slane %v1750_v34, 5 }
  0x58   : > { %797 = vrot.lane.b32.xlu1 %v587_v37, %s5714_s29  ;;  %v1813_v37 = vrot.slane %v1811_v51, 4 }
  0x59   : > { %v1819_v51 = vrot.slane %v1817_v39, 4  ;;  %v1818_v49 = vsel %vm5825_vm4, %v1816_v38, %v1817_v39  ;;  %v6128_v39 = vrot.slane %v2275_v26, 5 }
  0x5a   : > { %1047 = vrot.lane.b32.xlu0 %v971_v10, %s5713_s28  ;;  %v1820_v10 = vrot.slane %v1751_v35, 5  ;;  %v1815_v44 = vsel %vm5825_vm4, %v1813_v37, %v1814_v27  ;;  %v2593_v27 = vld [vmem:[%s5817_s26 + $0x24] sm:$0xf]  ;;  %v2263_v35 = vrot.slane %v2262_v24, 4  ;;  %v590_v37 = vrot.slane %v588_v21, 4 }
  0x5b   : > { %v2667_v24 = vrot.slane %v6160_v3, 5 }
  0x5c   : > { %1049 = vrot.lane.b32.xlu1 %v974_v48, %s5713_s28  ;;  %v5640_v48 = vld [vmem:[%s8219_s1 + $0x8] sm:$0x3f]   ;;  %v1822_v50 = vrot.slane %v1820_v10, 4  ;;  %v591_v55 = vor.u32 %v590_v37, %v6001_v28 }
  0x5d   : > { %v3009_v61 = vand.u32 %v5640_v48, %v3007_v58  ;;  %v484_v48 = vld [vmem:[%s5817_s26 + $0x2c] sm:$0xf] }
  0x5e   : > { %1051 = vrot.lane.b32.xlu0 %v977_v53, %s5713_s28  ;;  %v2174_v53 = vld [vmem:[%s5817_s26 + $0x2c] sm:$0xf]  ;;  %v1824_v0 = vsel %vm5825_vm4, %v1822_v50, %v1823_v13 }
  0x5f   : > { %v2265_v62 = vshll.u32 %v2174_v53, 16  ;;  %5526 = vmatprep.subr.bf16.mxu0 %v3009_v61 }
  0x60   : > { %1053 = vrot.lane.b32.xlu1 %v980_v59, %s5713_s28  ;;  %v1821_v59 = vsel %vm5825_vm4, %v1819_v51, %v1820_v10  ;;  %5527 = vmatpush3.bf16.msra.mxu0 %v3009_v61  ;;  %v483_v10 = vld [vmem:[%s5817_s26 + $0x28] sm:$0xf]  ;;  %v424_v51 = vld [vmem:[%s5817_s26 + $0x24] sm:$0xf]  ;;  %v618_v61 = vshrl.u32 %v484_v48, 16 }
  0x61   : > { %v2267_v11 = vrot.slane %v2265_v62, 5  ;;  %453 = vst.msk [vmem:[#allocation2 + $0x48] sm:$0xf] %vm443_vm6, %v424_v51  ;;  %v604_v58 = vshll.u32 %v483_v10, 16  ;;  %v592_v62 = vrot.slane %v591_v55, 4  ;;  %v981_v51 = vrot.slane %v979_v47, 4 }
  0x62   : > { %1217 = vrot.lane.b32.xlu0 %v1157_v63, %s5712_s27  ;;  %v2269_v63 = vshrl.u32 %v2174_v53, 16  ;;  %v608_v53 = vshrl.u32 %v483_v10, 16  ;;  %v1332_v47 = vld [vmem:[%s5817_s26 + $0x2c] sm:$0xf]  ;;  %v1435_v55 = vshrl.u32 %v6055_v17, 16 }
  0x63   : > { %v2268_v14 = vsel %vm5860_vm5, %v2263_v35, %v2267_v11 }
  0x64   : > { %1219 = vrot.lane.b32.xlu1 %v1158_v8, %s5712_s27  ;;  %v2242_v8 = vor.u32 %v2241_v60, %v5948_v32  ;;  %v2271_v16 = vrot.slane %v2269_v63, 4  ;;  %v2004_v32 = vld [vmem:[%s5817_s26 + $0x2c] sm:$0xf]  ;;  %v614_v60 = vshll.u32 %v484_v48, 16  ;;  %v610_v63 = vrot.slane %v608_v53, 4 }
  0x65   : > { %v6203_v48 = vld [vmem:[%s5817_s26 + $0x30] sm:$0xf] }
  0x66   : > { %1221 = vrot.lane.b32.xlu0 %v1159_v33, %s5712_s27  ;;  %v2002_v33 = vld [vmem:[%s5817_s26 + $0x24] sm:$0xf]  ;;  %v2243_v23 = vrot.slane %v2242_v8, 4  ;;  %v2664_v8 = vrot.slane %v2595_v2, 5  ;;  %v616_v9 = vrot.slane %v614_v60, 5  ;;  %v991_v60 = vrot.slane %v6203_v48, 5 }
  0x67   : > { %v1334_v2 = vld [vmem:[%s5817_s26 + $0x34] sm:$0xf] }
  0x68   : > { %1223 = vrot.lane.b32.xlu1 %v1160_v20, %s5712_s27  ;;  %v482_v20 = vld [vmem:[%s5817_s26 + $0x24] sm:$0xf]  ;;  %v2248_v6 = vsel %vm5860_vm5, %v2243_v23, %v2247_v1  ;;  %v606_v1 = vrot.slane %v604_v58, 5  ;;  %v2666_v26 = vrot.slane %v2664_v8, 4  ;;  %v1333_v58 = vld [vmem:[%s5817_s26 + $0x30] sm:$0xf] }
  0x69   : > { %v594_v30 = vshll.u32 %v482_v20, 16  ;;  %v598_v34 = vshrl.u32 %v482_v20, 16 }
  0x6a   : > { %1638 = vrot.lane.b32.xlu0 %v1404_v25, %s5715_s30  ;;  %v2272_v25 = vor.u32 %v2271_v16, %v2267_v11  ;;  %v620_v11 = vrot.slane %v618_v61, 4  ;;  %v426_v16 = vld [vmem:[%s5817_s26 + $0x2c] sm:$0xf]  ;;  %v611_v23 = vor.u32 %v610_v63, %v606_v1  ;;  %v2668_v37 = vsel %vm5825_vm4, %v2666_v26, %v2667_v24 }
  0x6b   : > { %v596_v45 = vrot.slane %v594_v30, 5  ;;  %455 = vst.msk [vmem:[#allocation2 + $0x58] sm:$0xf] %vm443_vm6, %v426_v16  ;;  %v906_v30 = vld [vmem:[%s5817_s26 + $0x24] sm:$0xf]  ;;  %v1441_v61 = vshll.u32 %v1332_v47, 16 }
  0x6c   : > { %1640 = vrot.lane.b32.xlu1 %v1414_v29, %s5715_s30  ;;  %v2253_v29 = vrot.slane %v2252_v18, 4  ;;  %v2273_v38 = vrot.slane %v2272_v25, 4  ;;  %v425_v18 = vld [vmem:[%s5817_s26 + $0x28] sm:$0xf]  ;;  %v982_v10 = vrot.slane %v906_v30, 5  ;;  %v1455_v63 = vshrl.u32 %v1333_v58, 16 }
  0x6d   : > { %v597_v21 = vsel %vm5860_vm5, %v592_v62, %v596_v45  ;;  %454 = vst.msk [vmem:[#allocation2 + $0x50] sm:$0xf] %vm443_vm6, %v425_v18  ;;  %v1161_v18 = vld [vmem:[%s5817_s26 + $0x28] sm:$0xf]  ;;  %v6245_v30 = vld [vmem:[%s5817_s26 + $0x38] sm:$0xf] }
  0x6e   : > { %1642 = vrot.lane.b32.xlu0 %v1424_v36, %s5715_s30  ;;  %v2594_v36 = vld [vmem:[%s5817_s26 + $0x28] sm:$0xf]  ;;  %v2258_v12 = vsel %vm5860_vm5, %v2253_v29, %v2257_v7  ;;  %v984_v53 = vrot.slane %v982_v10, 4  ;;  %v1475_v48 = vshrl.u32 %v6245_v30, 16 }
  0x6f   : > { %v2661_v57 = vrot.slane %v2594_v36, 5  ;;  %v908_v36 = vld [vmem:[%s5817_s26 + $0x2c] sm:$0xf] }
  0x70   : > { %1644 = vrot.lane.b32.xlu1 %v1434_v41, %s5715_s30  ;;  %v2658_v41 = vrot.slane %v2593_v27, 5  ;;  %v621_v27 = vor.u32 %v620_v11, %v616_v9  ;;  %v1465_v11 = vshrl.u32 %v1334_v2, 16 }
  0x72   : > { %1891 = vrot.lane.b32.xlu0 %v1815_v44, %s5716_s13  ;;  %v600_v44 = vrot.slane %v598_v34, 4  ;;  %v2660_v56 = vrot.slane %v2658_v41, 4  ;;  %v2659_v28 = vsel %vm5825_vm4, %v2657_v52, %v2658_v41 }
  0x74   : > { %1893 = vrot.lane.b32.xlu1 %v1818_v49, %s5716_s13  ;;  %v601_v54 = vor.u32 %v600_v44, %v596_v45  ;;  %v907_v45 = vld [vmem:[%s5817_s26 + $0x28] sm:$0xf] }
  0x76   : > { %1895 = vrot.lane.b32.xlu0 %v1821_v59, %s5716_s13  ;;  %v2278_v59 = vsel %vm5860_vm5, %v2273_v38, %v6128_v39  ;;  %v602_v7 = vrot.slane %v601_v54, 4  ;;  %v622_v38 = vrot.slane %v621_v27, 4  ;;  %v1467_v27 = vrot.slane %v1465_v11, 4 }
  0x78   : > { %1897 = vrot.lane.b32.xlu1 %v1824_v0, %s5716_s13  ;;  %v2662_v0 = vsel %vm5825_vm4, %v2660_v56, %v2661_v57  ;;  %v607_v25 = vsel %vm5860_vm5, %v602_v7, %v606_v1  ;;  %v983_v56 = vsel %vm5825_vm4, %v981_v51, %v982_v10  ;;  %v1443_v7 = vrot.slane %v1441_v61, 5 }
  0x79   : > { %v1471_v10 = vshll.u32 %v6245_v30, 16 }
  0x7a   : > { %2061 = vrot.lane.b32.xlu0 %v2001_v5, %s5717_s14 }
  0x7c   : > { %2063 = vrot.lane.b32.xlu1 %v2002_v33, %s5717_s14  ;;  %v6165_v33 = vld [vmem:[%s5817_s26 + $0x30] sm:$0xf] }
  0x7d   : > { %v624_v29 = vshll.u32 %v6165_v33, 16 }
  0x7e   : > { %2065 = vrot.lane.b32.xlu0 %v2003_v22, %s5717_s14  ;;  %v2663_v22 = vrot.slane %v2661_v57, 4 }
  0x7f   : > { %v6188_v41 = vrot.slane %v624_v29, 5 }
  0x80   : > { %2067 = vrot.lane.b32.xlu1 %v2004_v32, %s5717_s14  ;;  %v2665_v34 = vsel %vm5825_vm4, %v2663_v22, %v2664_v8  ;;  %v1457_v22 = vrot.slane %v1455_v63, 4 }
  0x81   : > { %v627_v52 = vsel %vm5860_vm5, %v622_v38, %v6188_v41 }
  0x82   : > { %2482 = vrot.lane.b32.xlu0 %v2248_v6, %s5718_s15  ;;  %v612_v6 = vrot.slane %v611_v23, 4 }
  0x83   : > { %v6139_v49 = vpop.permute.xlu0 %1209  ;;  %v6141_v50 = vpop.permute.xlu1 %1211 }
  0x84   : > { %2484 = vrot.lane.b32.xlu1 %v2258_v12, %s5718_s15  ;;  %v617_v44 = vsel %vm5860_vm5, %v612_v6, %v616_v9  ;;  %v1461_v9 = vshll.u32 %v1334_v2, 16  ;;  %v6279_v2 = vld [vmem:[%s5817_s26 + $0x38] sm:$0xf] }
  0x86   : > { %2486 = vrot.lane.b32.xlu0 %v2268_v14, %s5718_s15  ;;  %v988_v14 = vrot.slane %v908_v36, 5  ;;  %v1463_v26 = vrot.slane %v1461_v9, 5  ;;  %v1164_v36 = vld [vmem:[%s5817_s26 + $0x34] sm:$0xf] }
  0x87   : > { %v1040_v15 = vpop.permute.xlu0 %1039 }
  0x88   : > { %2488 = vrot.lane.b32.xlu1 %v2278_v59, %s5718_s15  ;;  %v990_v54 = vrot.slane %v988_v14, 4  ;;  %v1468_v38 = vor.u32 %v1467_v27, %v1463_v26 }
  0x89   : > { %v1042_v5 = vpop.permute.xlu1 %1041 }
  0x8a   : > { %2735 = vrot.lane.b32.xlu0 %v2659_v28, %s5719_s18  ;;  %v1451_v28 = vshll.u32 %v1333_v58, 16 }
  0x8b   : > { %v1044_v20 = vpop.permute.xlu0 %1043 }
  0x8c   : > { %2737 = vrot.lane.b32.xlu1 %v2662_v0, %s5719_s18  ;;  %v1437_v0 = vrot.slane %v1435_v55, 4  ;;  %v1755_v55 = vld [vmem:[%s5817_s26 + $0x34] sm:$0xf] }
  0x8d   : > { %v1046_v32 = vpop.permute.xlu1 %1045  ;;  %v1832_v61 = vrot.slane %v1755_v55, 5 }
  0x8e   : > { %799 = vrot.lane.b32.xlu0 %v597_v21, %s5714_s29  ;;  %v1438_v21 = vor.u32 %v1437_v0, %v6068_v31  ;;  %v1163_v31 = vld [vmem:[%s5817_s26 + $0x30] sm:$0xf]  ;;  %v2177_v0 = vld [vmem:[%s5817_s26 + $0x38] sm:$0xf] }
  0x90   : > { %801 = vrot.lane.b32.xlu1 %v607_v25, %s5714_s29  ;;  %v784_v35 = vpop.permute.xlu0 %783 }
  0x91   : > { %868 = vst.msk [vmem:[#allocation2] sm:$0xf] %vm867_vm9, %v784_v35 }
  0x92   : > { %1124 = vst.msk [vmem:[#allocation2] sm:$0xf] %vm1123_vm10, %v1040_v15  ;;  %v788_v12 = vpop.permute.xlu1 %787  ;;  %2739 = vrot.lane.b32.xlu0 %v2665_v34, %s5719_s18  ;;  %v1439_v34 = vrot.slane %v1438_v21, 4 }
  0x93   : > { %870 = vst.msk [vmem:[#allocation2 + $0x10] sm:$0xf] %vm867_vm9, %v788_v12  ;;  %v1753_v12 = vld [vmem:[%s5817_s26 + $0x2c] sm:$0xf] }
  0x94   : > { %1294 = vst.msk [vmem:[#allocation2] sm:$0xf] %vm1293_vm11, %v6139_v49  ;;  %2741 = vrot.lane.b32.xlu1 %v2668_v37, %s5719_s18  ;;  %v786_v46 = vpop.permute.xlu0 %785  ;;  %v985_v49 = vrot.slane %v907_v45, 5 }
  0x95   : > { %1126 = vst.msk [vmem:[#allocation2 + $0x10] sm:$0xf] %vm1123_vm10, %v1044_v20  ;;  %v1453_v20 = vrot.slane %v1451_v28, 5 }
  0x96   : > { %869 = vst.msk [vmem:[#allocation2 + $0x8] sm:$0xf] %vm867_vm9, %v786_v46  ;;  %v790_v40 = vpop.permute.xlu1 %789  ;;  %803 = vrot.lane.b32.xlu0 %v617_v44, %s5714_s29  ;;  %v987_v57 = vrot.slane %v985_v49, 4  ;;  %v986_v17 = vsel %vm5825_vm4, %v984_v53, %v985_v49  ;;  %v1444_v44 = vsel %vm5860_vm5, %v1439_v34, %v1443_v7  ;;  %v1469_v53 = vrot.slane %v1468_v38, 4  ;;  %v2006_v38 = vld [vmem:[%s5817_s26 + $0x34] sm:$0xf] }
  0x97   : > { %1125 = vst.msk [vmem:[#allocation2 + $0x8] sm:$0xf] %vm1123_vm10, %v1042_v5  ;;  %v992_v5 = vsel %vm5825_vm4, %v990_v54, %v991_v60  ;;  %v1458_v6 = vor.u32 %v1457_v22, %v1453_v20  ;;  %v6262_v49 = vrot.slane %v1471_v10, 5 }
  0x98   : > { %871 = vst.msk [vmem:[#allocation2 + $0x18] sm:$0xf] %vm867_vm9, %v790_v40  ;;  %805 = vrot.lane.b32.xlu1 %v627_v52, %s5714_s29  ;;  %v1214_v59 = vpop.permute.xlu0 %1213  ;;  %v989_v62 = vsel %vm5825_vm4, %v987_v57, %v988_v14  ;;  %v1826_v14 = vrot.slane %v1753_v12, 5  ;;  %v1754_v40 = vld [vmem:[%s5817_s26 + $0x30] sm:$0xf]  ;;  %v1825_v57 = vrot.slane %v1823_v13, 4 }
  0x99   : > { %1295 = vst.msk [vmem:[#allocation2 + $0x8] sm:$0xf] %vm1293_vm11, %v6141_v50  ;;  %1296 = vst.msk [vmem:[#allocation2 + $0x10] sm:$0xf] %vm1293_vm11, %v1214_v59  ;;  %v1445_v50 = vshrl.u32 %v1332_v47, 16  ;;  %v1459_v51 = vrot.slane %v1458_v6, 4 }
  0x9a   : > { %1127 = vst.msk [vmem:[#allocation2 + $0x18] sm:$0xf] %vm1123_vm10, %v1046_v32  ;;  %v1216_v15 = vpop.permute.xlu1 %1215  ;;  %1055 = vrot.lane.b32.xlu0 %v983_v56, %s5713_s28  ;;  %v1162_v32 = vld [vmem:[%s5817_s26 + $0x2c] sm:$0xf]  ;;  %v1828_v59 = vrot.slane %v1826_v14, 4  ;;  %v1829_v54 = vrot.slane %v1754_v40, 5 }
  0x9b   : > { %1297 = vst.msk [vmem:[#allocation2 + $0x18] sm:$0xf] %vm1293_vm11, %v1216_v15  ;;  %v1447_v8 = vrot.slane %v1445_v50, 4  ;;  %v1464_v56 = vsel %vm5860_vm5, %v1459_v51, %v1463_v26  ;;  %v2279_v13 = vshrl.u32 %v6113_v19, 16  ;;  %v1827_v15 = vsel %vm5825_vm4, %v1825_v57, %v1826_v14  ;;  %v6313_v12 = vld [vmem:[%s5817_s26 + $0x40] sm:$0xf] }
  0x9c   : > { %1057 = vrot.lane.b32.xlu1 %v986_v17, %s5713_s28  ;;  %v1631_v1 = vpop.permute.xlu0 %1630  ;;  %v1474_v17 = vsel %vm5860_vm5, %v1469_v53, %v6262_v49  ;;  %v1831_v28 = vrot.slane %v1829_v54, 4  ;;  %v1830_v63 = vsel %vm5825_vm4, %v1828_v59, %v1829_v54  ;;  %v2289_v19 = vshrl.u32 %v2176_v42, 16  ;;  %v2007_v51 = vld [vmem:[%s5817_s26 + $0x38] sm:$0xf]  ;;  %v2008_v53 = vld [vmem:[%s5817_s26 + $0x3c] sm:$0xf] }
  0x9d   : > { %1715 = vst.msk [vmem:[#allocation2] sm:$0xf] %vm8233_vm12, %v1631_v1  ;;  %v1448_v25 = vor.u32 %v1447_v8, %v1443_v7  ;;  %v1834_v1 = vrot.slane %v1832_v61, 4  ;;  %v2285_v7 = vshll.u32 %v2176_v42, 16  ;;  %v2178_v8 = vld [vmem:[%s5817_s26 + $0x3c] sm:$0xf] }
  0x9e   : > { %v1633_v16 = vpop.permute.xlu1 %1632  ;;  %1059 = vrot.lane.b32.xlu0 %v989_v62, %s5713_s28  ;;  %v1833_v11 = vsel %vm5825_vm4, %v1831_v28, %v1832_v61  ;;  %v2305_v22 = vshll.u32 %v2178_v8, 16  ;;  %v2291_v26 = vrot.slane %v2289_v19, 4  ;;  %v487_v61 = vld [vmem:[%s5817_s26 + $0x38] sm:$0xf]  ;;  %v427_v19 = vld [vmem:[%s5817_s26 + $0x30] sm:$0xf] }
  0x9f   : > { %1716 = vst.msk [vmem:[#allocation2 + $0x8] sm:$0xf] %vm8233_vm12, %v1633_v16  ;;  %v1449_v37 = vrot.slane %v1448_v25, 4  ;;  %v2295_v16 = vshll.u32 %v2177_v0, 16  ;;  %v2287_v25 = vrot.slane %v2285_v7, 5 }
  0xa0   : > { %1061 = vrot.lane.b32.xlu1 %v992_v5, %s5713_s28  ;;  %v1635_v23 = vpop.permute.xlu0 %1634  ;;  %v1835_v5 = vrot.slane %v6279_v2, 5  ;;  %v428_v7 = vld [vmem:[%s5817_s26 + $0x34] sm:$0xf]  ;;  %456 = vst.msk [vmem:[#allocation2 + $0x60] sm:$0xf] %vm443_vm6, %v427_v19 }
  0xa1   : > { %1717 = vst.msk [vmem:[#allocation2 + $0x10] sm:$0xf] %vm8233_vm12, %v1635_v23  ;;  %v1454_v52 = vsel %vm5860_vm5, %v1449_v37, %v1453_v20  ;;  %v2281_v20 = vrot.slane %v2279_v13, 4  ;;  %v2309_v23 = vshrl.u32 %v2178_v8, 16  ;;  %v2292_v10 = vor.u32 %v2291_v26, %v2287_v25  ;;  %v2180_v2 = vld [vmem:[%s5817_s26 + $0x44] sm:$0xf] }
  0xa2   : > { %v1637_v29 = vpop.permute.xlu1 %1636  ;;  %1225 = vrot.lane.b32.xlu0 %v1161_v18, %s5712_s27  ;;  %v2299_v18 = vshrl.u32 %v2177_v0, 16  ;;  %457 = vst.msk [vmem:[#allocation2 + $0x68] sm:$0xf] %vm443_vm6, %v428_v7 }
  0xa3   : > { %1718 = vst.msk [vmem:[#allocation2 + $0x18] sm:$0xf] %vm8233_vm12, %v1637_v29  ;;  %v2005_v29 = vld [vmem:[%s5817_s26 + $0x30] sm:$0xf]  ;;  %v2282_v34 = vor.u32 %v2281_v20, %v6128_v39  ;;  %v2311_v37 = vrot.slane %v2309_v23, 4  ;;  %v2293_v55 = vrot.slane %v2292_v10, 4 }
  0xa4   : > { %1227 = vrot.lane.b32.xlu1 %v1162_v32, %s5712_s27  ;;  %v1884_v35 = vpop.permute.xlu0 %1883  ;;  %v1836_v32 = vsel %vm5825_vm4, %v1834_v1, %v1835_v5  ;;  %v2301_v6 = vrot.slane %v2299_v18, 4  ;;  %v486_v39 = vld [vmem:[%s5817_s26 + $0x34] sm:$0xf]  ;;  %v644_v23 = vshll.u32 %v487_v61, 16 }
  0xa5   : > { %1968 = vst.msk [vmem:[#allocation2] sm:$0xf] %vm1967_vm13, %v1884_v35  ;;  %v638_v57 = vshrl.u32 %v486_v39, 16 }
  0xa6   : > { %v1886_v45 = vpop.permute.xlu1 %1885  ;;  %1229 = vrot.lane.b32.xlu0 %v1163_v31, %s5712_s27  ;;  %v2297_v31 = vrot.slane %v2295_v16, 5  ;;  %v648_v16 = vshrl.u32 %v487_v61, 16 }
  0xa7   : > { %1969 = vst.msk [vmem:[#allocation2 + $0x8] sm:$0xf] %vm1967_vm13, %v1886_v45  ;;  %v640_v1 = vrot.slane %v638_v57, 4 }
  0xa8   : > { %1231 = vrot.lane.b32.xlu1 %v1164_v36, %s5712_s27  ;;  %v1888_v46 = vpop.permute.xlu0 %1887  ;;  %v6308_v36 = vrot.slane %v2305_v22, 5  ;;  %v2302_v14 = vor.u32 %v2301_v6, %v2297_v31  ;;  %v650_v6 = vrot.slane %v648_v16, 4 }
  0xa9   : > { %1970 = vst.msk [vmem:[#allocation2 + $0x10] sm:$0xf] %vm1967_vm13, %v1888_v46  ;;  %v2283_v46 = vrot.slane %v2282_v34, 4 }
  0xaa   : > { %v1890_v47 = vpop.permute.xlu1 %1889  ;;  %1646 = vrot.lane.b32.xlu0 %v1444_v44, %s5715_s30  ;;  %v628_v44 = vshrl.u32 %v6165_v33, 16  ;;  %v2312_v40 = vor.u32 %v2311_v37, %v6308_v36  ;;  %v634_v33 = vshll.u32 %v486_v39, 16  ;;  %v2303_v54 = vrot.slane %v2302_v14, 4  ;;  %v429_v14 = vld [vmem:[%s5817_s26 + $0x38] sm:$0xf] }
  0xab   : > { %1971 = vst.msk [vmem:[#allocation2 + $0x18] sm:$0xf] %vm1967_vm13, %v1890_v47  ;;  %v2315_v47 = vshll.u32 %v6313_v12, 16  ;;  %v2288_v59 = vsel %vm5860_vm5, %v2283_v46, %v2287_v25  ;;  %v646_v37 = vrot.slane %v644_v23, 5  ;;  %v430_v46 = vld [vmem:[%s5817_s26 + $0x3c] sm:$0xf] }
  0xac   : > { %1648 = vrot.lane.b32.xlu1 %v1454_v52, %s5715_s30  ;;  %v2054_v58 = vpop.permute.xlu0 %2053  ;;  %v2313_v13 = vrot.slane %v2312_v40, 4  ;;  %v6341_v0 = vrot.slane %v634_v33, 5  ;;  %459 = vst.msk [vmem:[#allocation2 + $0x78] sm:$0xf] %vm443_vm6, %v430_v46  ;;  %458 = vst.msk [vmem:[#allocation2 + $0x70] sm:$0xf] %vm443_vm6, %v429_v14 }
  0xad   : > { %2138 = vst.msk [vmem:[#allocation2] sm:$0xf] %vm2137_vm14, %v2054_v58  ;;  %v651_v40 = vor.u32 %v650_v6, %v646_v37 }
  0xae   : > { %v2056_v50 = vpop.permute.xlu1 %2055  ;;  %1650 = vrot.lane.b32.xlu0 %v1464_v56, %s5715_s30  ;;  %v2597_v56 = vld [vmem:[%s5817_s26 + $0x34] sm:$0xf]  ;;  %v641_v3 = vor.u32 %v640_v1, %v6341_v0 }
  0xaf   : > { %2139 = vst.msk [vmem:[#allocation2 + $0x8] sm:$0xf] %vm2137_vm14, %v2056_v50  ;;  %v630_v50 = vrot.slane %v628_v44, 4  ;;  %v2670_v28 = vrot.slane %v2597_v56, 5 }
  0xb0   : > { %1652 = vrot.lane.b32.xlu1 %v1474_v17, %s5715_s30  ;;  %v2058_v62 = vpop.permute.xlu0 %2057  ;;  %v6331_v17 = vld [vmem:[%s5817_s26 + $0x38] sm:$0xf]  ;;  %v642_v44 = vrot.slane %v641_v3, 4  ;;  %v6423_v3 = vld [vmem:[%s5817_s26 + $0x40] sm:$0xf] }
  0xb1   : > { %2140 = vst.msk [vmem:[#allocation2 + $0x10] sm:$0xf] %vm2137_vm14, %v2058_v62  ;;  %v488_v62 = vld [vmem:[%s5817_s26 + $0x3c] sm:$0xf]  ;;  %v631_v18 = vor.u32 %v630_v50, %v6188_v41  ;;  %v2673_v22 = vrot.slane %v6331_v17, 5  ;;  %v2672_v26 = vrot.slane %v2670_v28, 4 }
  0xb2   : > { %v2060_v9 = vpop.permute.xlu1 %2059  ;;  %1899 = vrot.lane.b32.xlu0 %v1827_v15, %s5716_s13  ;;  %v6335_v15 = vrot.slane %v2315_v47, 5  ;;  %v658_v41 = vshrl.u32 %v488_v62, 16  ;;  %v1003_v6 = vrot.slane %v6423_v3, 5  ;;  %v1340_v3 = vld [vmem:[%s5817_s26 + $0x4c] sm:$0xf] }
  0xb3   : > { %2141 = vst.msk [vmem:[#allocation2 + $0x18] sm:$0xf] %vm2137_vm14, %v2060_v9  ;;  %v2308_v9 = vsel %vm5860_vm5, %v2303_v54, %v6308_v36  ;;  %v2674_v39 = vsel %vm5825_vm4, %v2672_v26, %v2673_v22 }
  0xb4   : > { %1901 = vrot.lane.b32.xlu1 %v1830_v63, %s5716_s13  ;;  %v2475_v21 = vpop.permute.xlu0 %2474  ;;  %v2298_v63 = vsel %vm5860_vm5, %v2293_v55, %v2297_v31  ;;  %v2318_v25 = vsel %vm5860_vm5, %v2313_v13, %v6335_v15  ;;  %v2675_v55 = vrot.slane %v2673_v22, 4 }
  0xb5   : > { %2559 = vst.msk [vmem:[#allocation2] sm:$0xf] %vm2558_vm15, %v2475_v21 }
  0xb6   : > { %v2477_v27 = vpop.permute.xlu1 %2476  ;;  %1903 = vrot.lane.b32.xlu0 %v1833_v11, %s5716_s13  ;;  %v2669_v11 = vrot.slane %v2667_v24, 4  ;;  %v2599_v24 = vld [vmem:[%s5817_s26 + $0x3c] sm:$0xf] }
  0xb7   : > { %2560 = vst.msk [vmem:[#allocation2 + $0x8] sm:$0xf] %vm2558_vm15, %v2477_v27  ;;  %v2676_v10 = vrot.slane %v2599_v24, 5 }
  0xb8   : > { %1905 = vrot.lane.b32.xlu1 %v1836_v32, %s5716_s13  ;;  %v2479_v35 = vpop.permute.xlu0 %2478  ;;  %v654_v32 = vshll.u32 %v488_v62, 16  ;;  %v2671_v34 = vsel %vm5825_vm4, %v2669_v11, %v2670_v28  ;;  %v652_v62 = vrot.slane %v651_v40, 4  ;;  %v912_v11 = vld [vmem:[%s5817_s26 + $0x3c] sm:$0xf] }
  0xb9   : > { %2561 = vst.msk [vmem:[#allocation2 + $0x10] sm:$0xf] %vm2558_vm15, %v2479_v35  ;;  %v632_v35 = vrot.slane %v631_v18, 4  ;;  %v2677_v28 = vsel %vm5825_vm4, %v2675_v55, %v2676_v10  ;;  %v993_v18 = vrot.slane %v991_v60, 4 }
  0xba   : > { %v2481_v45 = vpop.permute.xlu1 %2480  ;;  %2069 = vrot.lane.b32.xlu0 %v2005_v29, %s5717_s14 }
  0xbb   : > { %2562 = vst.msk [vmem:[#allocation2 + $0x18] sm:$0xf] %vm2558_vm15, %v2481_v45  ;;  %v656_v45 = vrot.slane %v654_v32, 5  ;;  %v637_v47 = vsel %vm5860_vm5, %v632_v35, %v6341_v0  ;;  %v1000_v32 = vrot.slane %v912_v11, 5  ;;  %v1757_v11 = vld [vmem:[%s5817_s26 + $0x3c] sm:$0xf] }
  0xbc   : > { %2071 = vrot.lane.b32.xlu1 %v2006_v38, %s5717_s14  ;;  %v2728_v52 = vpop.permute.xlu0 %2727  ;;  %v6369_v38 = vld [vmem:[%s5817_s26 + $0x40] sm:$0xf] }
  0xbd   : > { %2812 = vst.msk [vmem:[#allocation2] sm:$0xf] %vm2811_vm0, %v2728_v52  ;;  %v2679_v57 = vrot.slane %v6369_v38, 5  ;;  %v657_v16 = vsel %vm5860_vm5, %v652_v62, %v656_v45 }
  0xbe   : > { %v2730_v58 = vpop.permute.xlu1 %2729  ;;  %2073 = vrot.lane.b32.xlu0 %v2007_v51, %s5717_s14  ;;  %v660_v51 = vrot.slane %v658_v41, 4 }
  0xbf   : > { %2813 = vst.msk [vmem:[#allocation2 + $0x8] sm:$0xf] %vm2811_vm0, %v2730_v58  ;;  %v647_v58 = vsel %vm5860_vm5, %v642_v44, %v646_v37  ;;  %v1477_v37 = vrot.slane %v1475_v48, 4  ;;  %v1758_v48 = vld [vmem:[%s5817_s26 + $0x40] sm:$0xf] }
  0xc0   : > { %2075 = vrot.lane.b32.xlu1 %v2008_v53, %s5717_s14  ;;  %v792_v42 = vpop.permute.xlu0 %791  ;;  %v6379_v53 = vld [vmem:[%s5817_s26 + $0x40] sm:$0xf]  ;;  %v661_v54 = vor.u32 %v660_v51, %v656_v45 }
  0xc1   : > { %872 = vst.msk [vmem:[#allocation2 + $0x20] sm:$0xf] %vm867_vm9, %v792_v42  ;;  %v664_v17 = vshll.u32 %v6379_v53, 16  ;;  %v910_v42 = vld [vmem:[%s5817_s26 + $0x34] sm:$0xf]  ;;  %v1478_v55 = vor.u32 %v1477_v37, %v6262_v49 }
  0xc2   : > { %v794_v8 = vpop.permute.xlu1 %793  ;;  %2490 = vrot.lane.b32.xlu0 %v2288_v59, %s5718_s15  ;;  %v2678_v59 = vrot.slane %v2676_v10, 4  ;;  %v662_v1 = vrot.slane %v661_v54, 4  ;;  %v994_v19 = vrot.slane %v910_v42, 5  ;;  %v1166_v54 = vld [vmem:[%s5817_s26 + $0x3c] sm:$0xf] }
  0xc3   : > { %873 = vst.msk [vmem:[#allocation2 + $0x28] sm:$0xf] %vm867_vm9, %v794_v8  ;;  %v6405_v7 = vrot.slane %v664_v17, 5  ;;  %v6455_v49 = vld [vmem:[%s5817_s26 + $0x48] sm:$0xf] }
  0xc4   : > { %v2841_v20 = vld [vmem:[#allocation2] sm:$0xf]  ;;  %2492 = vrot.lane.b32.xlu1 %v2298_v63, %s5718_s15  ;;  %v2732_v21 = vpop.permute.xlu0 %2731  ;;  %v2680_v0 = vsel %vm5825_vm4, %v2678_v59, %v2679_v57  ;;  %v996_v22 = vrot.slane %v994_v19, 4  ;;  %v995_v60 = vsel %vm5825_vm4, %v993_v18, %v994_v19 }
  0xc5   : > { %2814 = vst.msk [vmem:[#allocation2 + $0x10] sm:$0xf] %vm2811_vm0, %v2732_v21  ;;  %v667_v21 = vsel %vm5860_vm5, %v662_v1, %v6405_v7 }
  0xc6   : > { %v2842_v27 = vld [vmem:[#allocation2 + $0x8] sm:$0xf]  ;;  %v2734_v29 = vpop.permute.xlu1 %2733  ;;  %2494 = vrot.lane.b32.xlu0 %v2308_v9, %s5718_s15  ;;  %v911_v9 = vld [vmem:[%s5817_s26 + $0x38] sm:$0xf] }
  0xc7   : > { %2815 = vst.msk [vmem:[#allocation2 + $0x18] sm:$0xf] %vm2811_vm0, %v2734_v29  ;;  %v5364_v31 = vcombine.low %v2841_v20, %v2842_v27  ;;  %v997_v23 = vrot.slane %v911_v9, 5  ;;  %v1337_v27 = vld [vmem:[%s5817_s26 + $0x40] sm:$0xf] }
  0xc8   : > { %2496 = vrot.lane.b32.xlu1 %v2318_v25, %s5718_s15  ;;  %v796_v36 = vpop.permute.xlu0 %795  ;;  %v1336_v25 = vld [vmem:[%s5817_s26 + $0x3c] sm:$0xf]  ;;  %v1491_v45 = vshll.u32 %v1337_v27, 16 }
  0xc9   : > { %5528 = vmatprep.mubr.msk.bf16.mxu0 %vm2961_vm1, %v5364_v31  ;;  %874 = vst.msk [vmem:[#allocation2 + $0x30] sm:$0xf] %vm867_vm9, %v796_v36  ;;  %v999_v24 = vrot.slane %v997_v23, 4  ;;  %v1481_v29 = vshll.u32 %v1336_v25, 16  ;;  %v998_v31 = vsel %vm5825_vm4, %v996_v22, %v997_v23  ;;  %v1485_v30 = vshrl.u32 %v1336_v25, 16 }
  0xca   : > { %v798_v52 = vpop.permute.xlu1 %797  ;;  %2743 = vrot.lane.b32.xlu0 %v2671_v34, %s5719_s18  ;;  %v1002_v34 = vrot.slane %v1000_v32, 4  ;;  %v1338_v36 = vld [vmem:[%s5817_s26 + $0x44] sm:$0xf] }
  0xcb   : > { %875 = vst.msk [vmem:[#allocation2 + $0x38] sm:$0xf] %vm867_vm9, %v798_v52  ;;  %v1001_v10 = vsel %vm5825_vm4, %v999_v24, %v1000_v32  ;;  %v1483_v51 = vrot.slane %v1481_v29, 5  ;;  %v1487_v14 = vrot.slane %v1485_v30, 4  ;;  %v1501_v52 = vshll.u32 %v1338_v36, 16 }
  0xcc   : > { %v2843_v56 = vld [vmem:[#allocation2 + $0x10] sm:$0xf]  ;;  %2745 = vrot.lane.b32.xlu1 %v2674_v39, %s5719_s18  ;;  %v1048_v33 = vpop.permute.xlu0 %1047  ;;  %v1495_v39 = vshrl.u32 %v1337_v27, 16  ;;  %v1004_v46 = vsel %vm5825_vm4, %v1002_v34, %v1003_v6  ;;  %v1505_v40 = vshrl.u32 %v1338_v36, 16  ;;  %v1838_v32 = vrot.slane %v1757_v11, 5 }
  0xcd   : > { %1128 = vst.msk [vmem:[#allocation2 + $0x20] sm:$0xf] %vm1123_vm10, %v1048_v33  ;;  %v1493_v33 = vrot.slane %v1491_v45, 5  ;;  %v1488_v17 = vor.u32 %v1487_v14, %v1483_v51  ;;  %v1759_v25 = vld [vmem:[%s5817_s26 + $0x44] sm:$0xf]  ;;  %v1837_v24 = vrot.slane %v1835_v5, 4 }
  0xce   : > { %v2844_v61 = vld [vmem:[#allocation2 + $0x18] sm:$0xf]  ;;  %v1050_v50 = vpop.permute.xlu1 %1049  ;;  %807 = vrot.lane.b32.xlu0 %v637_v47, %s5714_s29  ;;  %v1844_v27 = vrot.slane %v1759_v25, 5  ;;  %v1841_v34 = vrot.slane %v1758_v48, 5  ;;  %v6488_v30 = vld [vmem:[%s5817_s26 + $0x48] sm:$0xf] }
  0xcf   : > { %1129 = vst.msk [vmem:[#allocation2 + $0x28] sm:$0xf] %vm1123_vm10, %v1050_v50  ;;  %v5365_v13 = vcombine.low %v2843_v56, %v2844_v61  ;;  %v1165_v56 = vld [vmem:[%s5817_s26 + $0x38] sm:$0xf]  ;;  %v1503_v61 = vrot.slane %v1501_v52, 5  ;;  %v1507_v50 = vrot.slane %v1505_v40, 4  ;;  %v1839_v36 = vsel %vm5825_vm4, %v1837_v24, %v1838_v32 }
  0xd0   : > { %809 = vrot.lane.b32.xlu1 %v647_v58, %s5714_s29  ;;  %v1052_v63 = vpop.permute.xlu0 %1051  ;;  %v1497_v58 = vrot.slane %v1495_v39, 4  ;;  %v1489_v1 = vrot.slane %v1488_v17, 4  ;;  %v2319_v5 = vshrl.u32 %v6313_v12, 16  ;;  %v1843_v37 = vrot.slane %v1841_v34, 4  ;;  %v2182_v52 = vld [vmem:[%s5817_s26 + $0x4c] sm:$0xf] }
  0xd1   : > { %5529 = vmatmul.mubr.msk.bf16.vlgmr.msra.gmra.mrb[0].mxu0 %vm2961_vm1, %v5365_v13  ;;  %1130 = vst.msk [vmem:[#allocation2 + $0x30] sm:$0xf] %vm1123_vm10, %v1052_v63  ;;  %v1167_v13 = vld [vmem:[%s5817_s26 + $0x40] sm:$0xf]  ;;  %v1508_v19 = vor.u32 %v1507_v50, %v1503_v61  ;;  %v1846_v45 = vrot.slane %v1844_v27, 4  ;;  %v1847_v39 = vrot.slane %v6488_v30, 5 }
  0xd2   : > { %v1054_v8 = vpop.permute.xlu1 %1053  ;;  %2747 = vrot.lane.b32.xlu0 %v2677_v28, %s5719_s18  ;;  %v1479_v28 = vrot.slane %v1478_v55, 4  ;;  %v1498_v62 = vor.u32 %v1497_v58, %v1493_v33  ;;  %v2329_v12 = vshrl.u32 %v2180_v2, 16  ;;  %v2321_v40 = vrot.slane %v2319_v5, 4  ;;  %v2601_v24 = vld [vmem:[%s5817_s26 + $0x44] sm:$0xf] }
  0xd3   : > { %1131 = vst.msk [vmem:[#allocation2 + $0x38] sm:$0xf] %vm1123_vm10, %v1054_v8  ;;  %v1511_v8 = vshll.u32 %v6455_v49, 16  ;;  %v1509_v22 = vrot.slane %v1508_v19, 4  ;;  %v1848_v58 = vsel %vm5825_vm4, %v1846_v45, %v1847_v39  ;;  %v2345_v17 = vshll.u32 %v2182_v52, 16 }
  0xd4   : > { %2749 = vrot.lane.b32.xlu1 %v2680_v0, %s5719_s18  ;;  %v1218_v20 = vpop.permute.xlu0 %1217  ;;  %v1168_v0 = vld [vmem:[%s5817_s26 + $0x44] sm:$0xf]  ;;  %v1499_v18 = vrot.slane %v1498_v62, 4  ;;  %v491_v5 = vld [vmem:[%s5817_s26 + $0x48] sm:$0xf] }
  0xd5   : > { %1298 = vst.msk [vmem:[#allocation2 + $0x20] sm:$0xf] %vm1293_vm11, %v1218_v20  ;;  %v6472_v23 = vrot.slane %v1511_v8, 5  ;;  %v6520_v19 = vrot.slane %v2345_v17, 5  ;;  %v2184_v30 = vld [vmem:[%s5817_s26 + $0x54] sm:$0xf] }
  0xd6   : > { %v1220_v26 = vpop.permute.xlu1 %1219  ;;  %811 = vrot.lane.b32.xlu0 %v657_v16, %s5714_s29  ;;  %v1484_v16 = vsel %vm5860_vm5, %v1479_v28, %v1483_v51 }
  0xd7   : > { %1299 = vst.msk [vmem:[#allocation2 + $0x28] sm:$0xf] %vm1293_vm11, %v1220_v26  ;;  %v1514_v29 = vsel %vm5860_vm5, %v1509_v22, %v6472_v23 }
  0xd8   : > { %813 = vrot.lane.b32.xlu1 %v667_v21, %s5714_s29  ;;  %v1222_v41 = vpop.permute.xlu0 %1221  ;;  %v1494_v21 = vsel %vm5860_vm5, %v1489_v1, %v1493_v33 }
  0xd9   : > { %1300 = vst.msk [vmem:[#allocation2 + $0x30] sm:$0xf] %vm1293_vm11, %v1222_v41 }
  0xda   : > { %v1224_v35 = vpop.permute.xlu1 %1223  ;;  %1063 = vrot.lane.b32.xlu0 %v995_v60, %s5713_s28  ;;  %v1504_v60 = vsel %vm5860_vm5, %v1499_v18, %v1503_v61  ;;  %v2349_v61 = vshrl.u32 %v2182_v52, 16  ;;  %v2011_v18 = vld [vmem:[%s5817_s26 + $0x48] sm:$0xf] }
  0xdb   : > { %1301 = vst.msk [vmem:[#allocation2 + $0x38] sm:$0xf] %vm1293_vm11, %v1224_v35 }
  0xdc   : > { %1065 = vrot.lane.b32.xlu1 %v998_v31, %s5713_s28  ;;  %v1639_v44 = vpop.permute.xlu0 %1638  ;;  %v1840_v31 = vrot.slane %v1838_v32, 4  ;;  %v2351_v8 = vrot.slane %v2349_v61, 4 }
  0xdd   : > { %1719 = vst.msk [vmem:[#allocation2 + $0x20] sm:$0xf] %vm8233_vm12, %v1639_v44  ;;  %v2181_v44 = vld [vmem:[%s5817_s26 + $0x48] sm:$0xf] }
  0xde   : > { %v1641_v47 = vpop.permute.xlu1 %1640  ;;  %1067 = vrot.lane.b32.xlu0 %v1001_v10, %s5713_s28  ;;  %v1842_v51 = vsel %vm5825_vm4, %v1840_v31, %v1841_v34  ;;  %v2335_v55 = vshll.u32 %v2181_v44, 16  ;;  %v6541_v31 = vld [vmem:[%s5817_s26 + $0x48] sm:$0xf] }
  0xdf   : > { %1720 = vst.msk [vmem:[#allocation2 + $0x28] sm:$0xf] %vm8233_vm12, %v1641_v47  ;;  %v1845_v47 = vsel %vm5825_vm4, %v1843_v37, %v1844_v27 }
  0xe0   : > { %1069 = vrot.lane.b32.xlu1 %v1004_v46, %s5713_s28  ;;  %v1643_v59 = vpop.permute.xlu0 %1642  ;;  %v2325_v46 = vshll.u32 %v2180_v2, 16  ;;  %v2337_v28 = vrot.slane %v2335_v55, 5  ;;  %v2682_v2 = vrot.slane %v2601_v24, 5 }
  0xe1   : > { %1721 = vst.msk [vmem:[#allocation2 + $0x30] sm:$0xf] %vm8233_vm12, %v1643_v59 }
  0xe2   : > { %v1645_v42 = vpop.permute.xlu1 %1644  ;;  %1233 = vrot.lane.b32.xlu0 %v1165_v56, %s5712_s27  ;;  %v2339_v56 = vshrl.u32 %v2181_v44, 16  ;;  %v2327_v59 = vrot.slane %v2325_v46, 5  ;;  %v431_v46 = vld [vmem:[%s5817_s26 + $0x40] sm:$0xf]  ;;  %v2684_v38 = vrot.slane %v2682_v2, 4 }
  0xe3   : > { %1722 = vst.msk [vmem:[#allocation2 + $0x38] sm:$0xf] %vm8233_vm12, %v1645_v42  ;;  %v2322_v42 = vor.u32 %v2321_v40, %v6335_v15  ;;  %v6525_v15 = vld [vmem:[%s5817_s26 + $0x50] sm:$0xf]  ;;  %v2681_v40 = vrot.slane %v2679_v57, 4 }
  0xe4   : > { %1235 = vrot.lane.b32.xlu1 %v1166_v54, %s5712_s27  ;;  %v1892_v63 = vpop.permute.xlu0 %1891  ;;  %v2331_v54 = vrot.slane %v2329_v12, 4  ;;  %v2341_v62 = vrot.slane %v2339_v56, 4  ;;  %460 = vst.msk [vmem:[#allocation2 + $0x80] sm:$0xf] %vm443_vm6, %v431_v46  ;;  %v2603_v57 = vld [vmem:[%s5817_s26 + $0x4c] sm:$0xf] }
  0xe5   : > { %1972 = vst.msk [vmem:[#allocation2 + $0x20] sm:$0xf] %vm1967_vm13, %v1892_v63  ;;  %v916_v46 = vld [vmem:[%s5817_s26 + $0x4c] sm:$0xf] }
  0xe6   : > { %v1894_v9 = vpop.permute.xlu1 %1893  ;;  %1237 = vrot.lane.b32.xlu0 %v1167_v13, %s5712_s27  ;;  %v2009_v13 = vld [vmem:[%s5817_s26 + $0x40] sm:$0xf]  ;;  %v2332_v1 = vor.u32 %v2331_v54, %v2327_v59  ;;  %v684_v54 = vshll.u32 %v491_v5, 16 }
  0xe7   : > { %1973 = vst.msk [vmem:[#allocation2 + $0x28] sm:$0xf] %vm1967_vm13, %v1894_v9  ;;  %v490_v9 = vld [vmem:[%s5817_s26 + $0x44] sm:$0xf] }
  0xe8   : > { %1239 = vrot.lane.b32.xlu1 %v1168_v0, %s5712_s27  ;;  %v1896_v20 = vpop.permute.xlu0 %1895  ;;  %v2010_v0 = vld [vmem:[%s5817_s26 + $0x44] sm:$0xf]  ;;  %v674_v32 = vshll.u32 %v490_v9, 16  ;;  %v678_v25 = vshrl.u32 %v490_v9, 16  ;;  %v2333_v48 = vrot.slane %v2332_v1, 4  ;;  %v2688_v9 = vrot.slane %v2603_v57, 5 }
  0xe9   : > { %1974 = vst.msk [vmem:[#allocation2 + $0x30] sm:$0xf] %vm1967_vm13, %v1896_v20  ;;  %v2323_v20 = vrot.slane %v2322_v42, 4 }
  0xea   : > { %v1898_v26 = vpop.permute.xlu1 %1897  ;;  %1654 = vrot.lane.b32.xlu0 %v1484_v16, %s5715_s30  ;;  %v668_v16 = vshrl.u32 %v6379_v53, 16  ;;  %v2355_v53 = vshll.u32 %v6525_v15, 16  ;;  %v680_v37 = vrot.slane %v678_v25, 4 }
  0xeb   : > { %1975 = vst.msk [vmem:[#allocation2 + $0x38] sm:$0xf] %vm1967_vm13, %v1898_v26  ;;  %v2012_v26 = vld [vmem:[%s5817_s26 + $0x4c] sm:$0xf]  ;;  %v2328_v27 = vsel %vm5860_vm5, %v2323_v20, %v2327_v59 }
  0xec   : > { %1656 = vrot.lane.b32.xlu1 %v1494_v21, %s5715_s30  ;;  %v2062_v41 = vpop.permute.xlu0 %2061  ;;  %v2342_v21 = vor.u32 %v2341_v62, %v2337_v28  ;;  %v670_v34 = vrot.slane %v668_v16, 4  ;;  %v6550_v44 = vrot.slane %v2355_v53, 5  ;;  %v434_v20 = vld [vmem:[%s5817_s26 + $0x4c] sm:$0xf] }
  0xed   : > { %2142 = vst.msk [vmem:[#allocation2 + $0x20] sm:$0xf] %vm2137_vm14, %v2062_v41 }
  0xee   : > { %v2064_v35 = vpop.permute.xlu1 %2063  ;;  %1658 = vrot.lane.b32.xlu0 %v1504_v60, %s5715_s30  ;;  %v2352_v60 = vor.u32 %v2351_v8, %v6520_v19  ;;  %v671_v55 = vor.u32 %v670_v34, %v6405_v7  ;;  %v6579_v8 = vld [vmem:[%s5817_s26 + $0x50] sm:$0xf]  ;;  %463 = vst.msk [vmem:[#allocation2 + $0x98] sm:$0xf] %vm443_vm6, %v434_v20 }
  0xef   : > { %2143 = vst.msk [vmem:[#allocation2 + $0x28] sm:$0xf] %vm2137_vm14, %v2064_v35  ;;  %v2691_v53 = vrot.slane %v6579_v8, 5 }
  0xf0   : > { %1660 = vrot.lane.b32.xlu1 %v1514_v29, %s5715_s30  ;;  %v2066_v10 = vpop.permute.xlu0 %2065  ;;  %v2343_v29 = vrot.slane %v2342_v21, 4  ;;  %v2353_v45 = vrot.slane %v2352_v60, 4  ;;  %v672_v62 = vrot.slane %v671_v55, 4  ;;  %v433_v21 = vld [vmem:[%s5817_s26 + $0x48] sm:$0xf]  ;;  %v1012_v55 = vrot.slane %v916_v46, 5 }
  0xf1   : > { %2144 = vst.msk [vmem:[#allocation2 + $0x30] sm:$0xf] %vm2137_vm14, %v2066_v10  ;;  %v2338_v10 = vsel %vm5860_vm5, %v2333_v48, %v2337_v28  ;;  %v2683_v28 = vsel %vm5825_vm4, %v2681_v40, %v2682_v2  ;;  %v1005_v40 = vrot.slane %v1003_v6, 4  ;;  %v1515_v6 = vshrl.u32 %v6455_v49, 16 }
  0xf2   : > { %v2068_v14 = vpop.permute.xlu1 %2067  ;;  %1907 = vrot.lane.b32.xlu0 %v1839_v36, %s5716_s13  ;;  %v6545_v36 = vrot.slane %v674_v32, 5  ;;  %v2348_v52 = vsel %vm5860_vm5, %v2343_v29, %v6520_v19  ;;  %v2358_v17 = vsel %vm5860_vm5, %v2353_v45, %v6550_v44  ;;  %v686_v19 = vrot.slane %v684_v54, 5  ;;  %v6589_v32 = vld [vmem:[%s5817_s26 + $0x50] sm:$0xf]  ;;  %462 = vst.msk [vmem:[#allocation2 + $0x90] sm:$0xf] %vm443_vm6, %v433_v21 }
  0xf3   : > { %2145 = vst.msk [vmem:[#allocation2 + $0x38] sm:$0xf] %vm2137_vm14, %v2068_v14  ;;  %v492_v14 = vld [vmem:[%s5817_s26 + $0x4c] sm:$0xf]  ;;  %v704_v29 = vshll.u32 %v6589_v32, 16  ;;  %v1525_v49 = vshrl.u32 %v1340_v3, 16 }
  0xf4   : > { %1909 = vrot.lane.b32.xlu1 %v1842_v51, %s5716_s13  ;;  %v2483_v33 = vpop.permute.xlu0 %2482  ;;  %v432_v51 = vld [vmem:[%s5817_s26 + $0x44] sm:$0xf]  ;;  %v681_v59 = vor.u32 %v680_v37, %v6545_v36  ;;  %v694_v61 = vshll.u32 %v492_v14, 16  ;;  %v698_v7 = vshrl.u32 %v492_v14, 16  ;;  %v677_v25 = vsel %vm5860_vm5, %v672_v62, %v6545_v36  ;;  %v915_v14 = vld [vmem:[%s5817_s26 + $0x48] sm:$0xf] }
  0xf5   : > { %2563 = vst.msk [vmem:[#allocation2 + $0x20] sm:$0xf] %vm2558_vm15, %v2483_v33  ;;  %v6615_v45 = vrot.slane %v704_v29, 5  ;;  %v1342_v62 = vld [vmem:[%s5817_s26 + $0x54] sm:$0xf] }
  0xf6   : > { %v2485_v50 = vpop.permute.xlu1 %2484  ;;  %1911 = vrot.lane.b32.xlu0 %v1845_v47, %s5716_s13  ;;  %461 = vst.msk [vmem:[#allocation2 + $0x88] sm:$0xf] %vm443_vm6, %v432_v51  ;;  %v688_v47 = vshrl.u32 %v491_v5, 16  ;;  %v682_v1 = vrot.slane %v681_v59, 4  ;;  %v696_v16 = vrot.slane %v694_v61, 5  ;;  %v1014_v61 = vrot.slane %v1012_v55, 4 }
  0xf7   : > { %2564 = vst.msk [vmem:[#allocation2 + $0x28] sm:$0xf] %vm2558_vm15, %v2485_v50  ;;  %v6631_v59 = vld [vmem:[%s5817_s26 + $0x50] sm:$0xf]  ;;  %v1541_v20 = vshll.u32 %v1342_v62, 16  ;;  %v1545_v21 = vshrl.u32 %v1342_v62, 16 }
  0xf8   : > { %1913 = vrot.lane.b32.xlu1 %v1848_v58, %s5716_s13  ;;  %v2487_v63 = vpop.permute.xlu0 %2486  ;;  %v2685_v58 = vrot.slane %v6541_v31, 5  ;;  %v687_v24 = vsel %vm5860_vm5, %v682_v1, %v686_v19 }
  0xf9   : > { %2565 = vst.msk [vmem:[#allocation2 + $0x30] sm:$0xf] %vm2558_vm15, %v2487_v63  ;;  %v690_v63 = vrot.slane %v688_v47, 4  ;;  %v1543_v29 = vrot.slane %v1541_v20, 5 }
  0xfa   : > { %v2489_v11 = vpop.permute.xlu1 %2488  ;;  %2077 = vrot.lane.b32.xlu0 %v2009_v13, %s5717_s14 }
  0xfb   : > { %2566 = vst.msk [vmem:[#allocation2 + $0x38] sm:$0xf] %vm2558_vm15, %v2489_v11  ;;  %v2686_v11 = vsel %vm5825_vm4, %v2684_v38, %v2685_v58  ;;  %v691_v48 = vor.u32 %v690_v63, %v686_v19  ;;  %v1517_v19 = vrot.slane %v1515_v6, 4  ;;  %v1762_v6 = vld [vmem:[%s5817_s26 + $0x50] sm:$0xf] }
  0xfc   : > { %2079 = vrot.lane.b32.xlu1 %v2010_v0, %s5717_s14  ;;  %v2736_v22 = vpop.permute.xlu0 %2735 }
  0xfd   : > { %2816 = vst.msk [vmem:[#allocation2 + $0x20] sm:$0xf] %vm2811_vm0, %v2736_v22  ;;  %v692_v5 = vrot.slane %v691_v48, 4  ;;  %v1518_v48 = vor.u32 %v1517_v19, %v6472_v23  ;;  %v1171_v23 = vld [vmem:[%s5817_s26 + $0x50] sm:$0xf] }
  0xfe   : > { %v2738_v41 = vpop.permute.xlu1 %2737  ;;  %2081 = vrot.lane.b32.xlu0 %v2011_v18, %s5717_s14  ;;  %v700_v18 = vrot.slane %v698_v7, 4  ;;  %v1015_v7 = vrot.slane %v6631_v59, 5  ;;  %v1344_v59 = vld [vmem:[%s5817_s26 + $0x5c] sm:$0xf] }
  0xff   : > { %2817 = vst.msk [vmem:[#allocation2 + $0x28] sm:$0xf] %vm2811_vm0, %v2738_v41  ;;  %v2690_v41 = vrot.slane %v2688_v9, 4 }
 0x100   : > { %2083 = vrot.lane.b32.xlu1 %v2012_v26, %s5717_s14  ;;  %v800_v35 = vpop.permute.xlu0 %799  ;;  %v2687_v26 = vrot.slane %v2685_v58, 4  ;;  %v1009_v58 = vrot.slane %v915_v14, 5  ;;  %v1761_v14 = vld [vmem:[%s5817_s26 + $0x4c] sm:$0xf] }
 0x101   : > { %876 = vst.msk [vmem:[#allocation2 + $0x40] sm:$0xf] %vm867_vm9, %v800_v35  ;;  %v914_v35 = vld [vmem:[%s5817_s26 + $0x44] sm:$0xf]  ;;  %v2692_v37 = vsel %vm5825_vm4, %v2690_v41, %v2691_v53  ;;  %v1170_v41 = vld [vmem:[%s5817_s26 + $0x4c] sm:$0xf] }
 0x102   : > { %v802_v12 = vpop.permute.xlu1 %801  ;;  %2498 = vrot.lane.b32.xlu0 %v2328_v27, %s5718_s15  ;;  %v701_v27 = vor.u32 %v700_v18, %v696_v16  ;;  %v2689_v2 = vsel %vm5825_vm4, %v2687_v26, %v2688_v9  ;;  %v1006_v51 = vrot.slane %v914_v35, 5  ;;  %v1011_v38 = vrot.slane %v1009_v58, 4  ;;  %v6665_v35 = vld [vmem:[%s5817_s26 + $0x58] sm:$0xf] }
 0x103   : > { %877 = vst.msk [vmem:[#allocation2 + $0x48] sm:$0xf] %vm867_vm9, %v802_v12  ;;  %v1527_v18 = vrot.slane %v1525_v49, 4  ;;  %v1551_v46 = vshll.u32 %v6665_v35, 16  ;;  %v6698_v49 = vld [vmem:[%s5817_s26 + $0x58] sm:$0xf] }
 0x104   : > { %v2845_v56 = vld [vmem:[#allocation2 + $0x20] sm:$0xf]  ;;  %2500 = vrot.lane.b32.xlu1 %v2338_v10, %s5718_s15  ;;  %v2740_v33 = vpop.permute.xlu0 %2739  ;;  %v702_v10 = vrot.slane %v701_v27, 4  ;;  %v1013_v63 = vsel %vm5825_vm4, %v1011_v38, %v1012_v55  ;;  %v1849_v38 = vrot.slane %v1847_v39, 4  ;;  %v2359_v39 = vshrl.u32 %v6525_v15, 16 }
 0x105   : > { %2818 = vst.msk [vmem:[#allocation2 + $0x30] sm:$0xf] %vm2811_vm0, %v2740_v33  ;;  %v1008_v33 = vrot.slane %v1006_v51, 4  ;;  %v2365_v15 = vshll.u32 %v2184_v30, 16 }
 0x106   : > { %v2742_v50 = vpop.permute.xlu1 %2741  ;;  %2502 = vrot.lane.b32.xlu0 %v2348_v52, %s5718_s15  ;;  %v2846_v42 = vld [vmem:[#allocation2 + $0x28] sm:$0xf]  ;;  %v697_v52 = vsel %vm5860_vm5, %v692_v5, %v696_v16 }
 0x107   : > { %2819 = vst.msk [vmem:[#allocation2 + $0x38] sm:$0xf] %vm2811_vm0, %v2742_v50  ;;  %v5366_v13 = vcombine.low %v2845_v56, %v2846_v42  ;;  %v707_v56 = vsel %vm5860_vm5, %v702_v10, %v6615_v45  ;;  %v1341_v50 = vld [vmem:[%s5817_s26 + $0x50] sm:$0xf]  ;;  %v1010_v42 = vsel %vm5825_vm4, %v1008_v33, %v1009_v58  ;;  %v6682_v33 = vrot.slane %v1551_v46, 5 }
 0x108   : > { %2504 = vrot.lane.b32.xlu1 %v2358_v17, %s5718_s15  ;;  %v804_v0 = vpop.permute.xlu0 %803  ;;  %v1007_v17 = vsel %vm5825_vm4, %v1005_v40, %v1006_v51  ;;  %v1535_v1 = vshrl.u32 %v1341_v50, 16  ;;  %v1850_v58 = vrot.slane %v1761_v14, 5  ;;  %v6732_v14 = vld [vmem:[%s5817_s26 + $0x60] sm:$0xf] }
 0x109   : > { %5532 = vmatprep.mubr.msk.bf16.mxu0 %vm2961_vm1, %v5366_v13  ;;  %878 = vst.msk [vmem:[#allocation2 + $0x50] sm:$0xf] %vm867_vm9, %v804_v0  ;;  %v1521_v13 = vshll.u32 %v1340_v3, 16  ;;  %v1531_v0 = vshll.u32 %v1341_v50, 16 }
 0x10a   : > { %v806_v22 = vpop.permute.xlu1 %805  ;;  %2751 = vrot.lane.b32.xlu0 %v2683_v28, %s5719_s18  ;;  %v1851_v62 = vsel %vm5825_vm4, %v1849_v38, %v1850_v58 }
 0x10b   : > { %879 = vst.msk [vmem:[#allocation2 + $0x58] sm:$0xf] %vm867_vm9, %v806_v22  ;;  %v1523_v16 = vrot.slane %v1521_v13, 5  ;;  %v1533_v26 = vrot.slane %v1531_v0, 5  ;;  %v1853_v13 = vrot.slane %v1762_v6, 5 }
 0x10c   : > { %2753 = vrot.lane.b32.xlu1 %v2686_v11, %s5719_s18  ;;  %v1056_v60 = vpop.permute.xlu0 %1055  ;;  %v1016_v11 = vsel %vm5825_vm4, %v1014_v61, %v1015_v7  ;;  %v2185_v0 = vld [vmem:[%s5817_s26 + $0x58] sm:$0xf]  ;;  %v494_v6 = vld [vmem:[%s5817_s26 + $0x54] sm:$0xf] }
 0x10d   : > { %1132 = vst.msk [vmem:[#allocation2 + $0x40] sm:$0xf] %vm1123_vm10, %v1056_v60  ;;  %v1537_v60 = vrot.slane %v1535_v1, 4  ;;  %v1528_v27 = vor.u32 %v1527_v18, %v1523_v16  ;;  %v2375_v20 = vshll.u32 %v2185_v0, 16 }
 0x10e   : > { %v1058_v31 = vpop.permute.xlu1 %1057  ;;  %815 = vrot.lane.b32.xlu0 %v677_v25, %s5714_s29  ;;  %v5641_v34 = vld [vmem:[#allocation2 + $0x30] ss:$8 sps:$4 sm:$0xff]   ;;  %v1169_v25 = vld [vmem:[%s5817_s26 + $0x48] sm:$0xf] }
 0x10f   : > { %1133 = vst.msk [vmem:[#allocation2 + $0x48] sm:$0xf] %vm1123_vm10, %v1058_v31  ;;  %5533 = vmatmul.mubr.msk.bf16.gmra.mrb[4].mxu0 %vm2961_vm1, %v5641_v34  ;;  %v1547_v31 = vrot.slane %v1545_v21, 4  ;;  %v1538_v5 = vor.u32 %v1537_v60, %v1533_v26  ;;  %v1529_v10 = vrot.slane %v1528_v27, 4  ;;  %v2379_v21 = vshrl.u32 %v2185_v0, 16 }
 0x110   : > { %817 = vrot.lane.b32.xlu1 %v687_v24, %s5714_s29  ;;  %v1060_v36 = vpop.permute.xlu0 %1059 }
 0x111   : > { %1134 = vst.msk [vmem:[#allocation2 + $0x50] sm:$0xf] %vm1123_vm10, %v1060_v36  ;;  %v1548_v51 = vor.u32 %v1547_v31, %v1543_v29  ;;  %v1539_v40 = vrot.slane %v1538_v5, 4  ;;  %v1534_v55 = vsel %vm5860_vm5, %v1529_v10, %v1533_v26  ;;  %v2361_v26 = vrot.slane %v2359_v39, 4 }
 0x112   : > { %v1062_v12 = vpop.permute.xlu1 %1061  ;;  %2755 = vrot.lane.b32.xlu0 %v2689_v2, %s5719_s18  ;;  %v1519_v2 = vrot.slane %v1518_v48, 4  ;;  %v714_v39 = vshll.u32 %v494_v6, 16 }
 0x113   : > { %1135 = vst.msk [vmem:[#allocation2 + $0x58] sm:$0xf] %vm1123_vm10, %v1062_v12  ;;  %v2362_v5 = vor.u32 %v2361_v26, %v6550_v44  ;;  %v2015_v44 = vld [vmem:[%s5817_s26 + $0x58] sm:$0xf] }
 0x114   : > { %2757 = vrot.lane.b32.xlu1 %v2692_v37, %s5719_s18  ;;  %v1226_v47 = vpop.permute.xlu0 %1225  ;;  %v1172_v37 = vld [vmem:[%s5817_s26 + $0x54] sm:$0xf] }
 0x115   : > { %1302 = vst.msk [vmem:[#allocation2 + $0x40] sm:$0xf] %vm1293_vm11, %v1226_v47 }
 0x116   : > { %v1228_v54 = vpop.permute.xlu1 %1227  ;;  %819 = vrot.lane.b32.xlu0 %v697_v52, %s5714_s29  ;;  %v1524_v52 = vsel %vm5860_vm5, %v1519_v2, %v1523_v16  ;;  %v2369_v16 = vshrl.u32 %v2184_v30, 16  ;;  %v2013_v2 = vld [vmem:[%s5817_s26 + $0x50] sm:$0xf]  ;;  %v495_v30 = vld [vmem:[%s5817_s26 + $0x58] sm:$0xf] }
 0x117   : > { %1303 = vst.msk [vmem:[#allocation2 + $0x48] sm:$0xf] %vm1293_vm11, %v1228_v54  ;;  %v1763_v54 = vld [vmem:[%s5817_s26 + $0x54] sm:$0xf] }
 0x118   : > { %821 = vrot.lane.b32.xlu1 %v707_v56, %s5714_s29  ;;  %v1230_v57 = vpop.permute.xlu0 %1229  ;;  %v1549_v56 = vrot.slane %v1548_v51, 4  ;;  %v1856_v61 = vrot.slane %v1763_v54, 5 }
 0x119   : > { %1304 = vst.msk [vmem:[#allocation2 + $0x50] sm:$0xf] %vm1293_vm11, %v1230_v57 }
 0x11a   : > { %v1232_v28 = vpop.permute.xlu1 %1231  ;;  %1071 = vrot.lane.b32.xlu0 %v1007_v17, %s5713_s28  ;;  %v1544_v17 = vsel %vm5860_vm5, %v1539_v40, %v1543_v29  ;;  %v1554_v50 = vsel %vm5860_vm5, %v1549_v56, %v6682_v33  ;;  %v1858_v19 = vrot.slane %v1856_v61, 4  ;;  %v2363_v40 = vrot.slane %v2362_v5, 4  ;;  %v2016_v56 = vld [vmem:[%s5817_s26 + $0x5c] sm:$0xf] }
 0x11b   : > { %1305 = vst.msk [vmem:[#allocation2 + $0x58] sm:$0xf] %vm1293_vm11, %v1232_v28 }
 0x11c   : > { %1073 = vrot.lane.b32.xlu1 %v1010_v42, %s5713_s28  ;;  %v1647_v9 = vpop.permute.xlu0 %1646  ;;  %v1852_v42 = vrot.slane %v1850_v58, 4 }
 0x11d   : > { %1723 = vst.msk [vmem:[#allocation2 + $0x40] sm:$0xf] %vm8233_vm12, %v1647_v9  ;;  %v1859_v9 = vrot.slane %v6698_v49, 5  ;;  %v2188_v49 = vld [vmem:[%s5817_s26 + $0x64] sm:$0xf] }
 0x11e   : > { %v1649_v22 = vpop.permute.xlu1 %1648  ;;  %1075 = vrot.lane.b32.xlu0 %v1013_v63, %s5713_s28  ;;  %v1855_v63 = vrot.slane %v1853_v13, 4 }
 0x11f   : > { %1724 = vst.msk [vmem:[#allocation2 + $0x48] sm:$0xf] %vm8233_vm12, %v1649_v22  ;;  %v2186_v22 = vld [vmem:[%s5817_s26 + $0x5c] sm:$0xf]  ;;  %v1860_v60 = vsel %vm5825_vm4, %v1858_v19, %v1859_v9 }
 0x120   : > { %1077 = vrot.lane.b32.xlu1 %v1016_v11, %s5713_s28  ;;  %v1651_v24 = vpop.permute.xlu0 %1650  ;;  %v1854_v11 = vsel %vm5825_vm4, %v1852_v42, %v1853_v13  ;;  %v2385_v27 = vshll.u32 %v2186_v22, 16  ;;  %v2389_v29 = vshrl.u32 %v2186_v22, 16  ;;  %v2606_v42 = vld [vmem:[%s5817_s26 + $0x58] sm:$0xf]  ;;  %v728_v22 = vshrl.u32 %v495_v30, 16 }
 0x121   : > { %1725 = vst.msk [vmem:[#allocation2 + $0x50] sm:$0xf] %vm8233_vm12, %v1651_v24  ;;  %v2367_v24 = vrot.slane %v2365_v15, 5  ;;  %v2697_v15 = vrot.slane %v2606_v42, 5 }
 0x122   : > { %v1653_v34 = vpop.permute.xlu1 %1652  ;;  %1241 = vrot.lane.b32.xlu0 %v1169_v25, %s5712_s27  ;;  %v1857_v25 = vsel %vm5825_vm4, %v1855_v63, %v1856_v61  ;;  %v2387_v51 = vrot.slane %v2385_v27, 5  ;;  %v2391_v46 = vrot.slane %v2389_v29, 4  ;;  %v708_v61 = vshrl.u32 %v6589_v32, 16  ;;  %v436_v27 = vld [vmem:[%s5817_s26 + $0x54] sm:$0xf] }
 0x123   : > { %1726 = vst.msk [vmem:[#allocation2 + $0x58] sm:$0xf] %vm8233_vm12, %v1653_v34  ;;  %v2377_v34 = vrot.slane %v2375_v20, 5  ;;  %v435_v29 = vld [vmem:[%s5817_s26 + $0x50] sm:$0xf] }
 0x124   : > { %1243 = vrot.lane.b32.xlu1 %v1170_v41, %s5712_s27  ;;  %v1900_v36 = vpop.permute.xlu0 %1899  ;;  %v2371_v41 = vrot.slane %v2369_v16, 4  ;;  %v2392_v54 = vor.u32 %v2391_v46, %v2387_v51  ;;  %v2693_v16 = vrot.slane %v2691_v53, 4  ;;  %465 = vst.msk [vmem:[#allocation2 + $0xa8] sm:$0xf] %vm443_vm6, %v436_v27  ;;  %464 = vst.msk [vmem:[#allocation2 + $0xa0] sm:$0xf] %vm443_vm6, %v435_v29 }
 0x125   : > { %1976 = vst.msk [vmem:[#allocation2 + $0x40] sm:$0xf] %vm1967_vm13, %v1900_v36 }
 0x126   : > { %v1902_v12 = vpop.permute.xlu1 %1901  ;;  %1245 = vrot.lane.b32.xlu0 %v1171_v23, %s5712_s27  ;;  %v2381_v23 = vrot.slane %v2379_v21, 4  ;;  %v2372_v10 = vor.u32 %v2371_v41, %v2367_v24  ;;  %v2393_v32 = vrot.slane %v2392_v54, 4  ;;  %v724_v21 = vshll.u32 %v495_v30, 16 }
 0x127   : > { %1977 = vst.msk [vmem:[#allocation2 + $0x48] sm:$0xf] %vm1967_vm13, %v1902_v12 }
 0x128   : > { %1247 = vrot.lane.b32.xlu1 %v1172_v37, %s5712_s27  ;;  %v1904_v47 = vpop.permute.xlu0 %1903  ;;  %v2014_v37 = vld [vmem:[%s5817_s26 + $0x54] sm:$0xf]  ;;  %v2373_v58 = vrot.slane %v2372_v10, 4  ;;  %v726_v5 = vrot.slane %v724_v21, 5 }
 0x129   : > { %1978 = vst.msk [vmem:[#allocation2 + $0x50] sm:$0xf] %vm1967_vm13, %v1904_v47  ;;  %v2605_v47 = vld [vmem:[%s5817_s26 + $0x54] sm:$0xf] }
 0x12a   : > { %v1906_v3 = vpop.permute.xlu1 %1905  ;;  %1662 = vrot.lane.b32.xlu0 %v1524_v52, %s5715_s30  ;;  %v2382_v52 = vor.u32 %v2381_v23, %v2377_v34  ;;  %v2378_v63 = vsel %vm5860_vm5, %v2373_v58, %v2377_v34 }
 0x12b   : > { %1979 = vst.msk [vmem:[#allocation2 + $0x58] sm:$0xf] %vm1967_vm13, %v1906_v3  ;;  %v2395_v3 = vshll.u32 %v6732_v14, 16 }
 0x12c   : > { %1664 = vrot.lane.b32.xlu1 %v1534_v55, %s5715_s30  ;;  %v2070_v57 = vpop.permute.xlu0 %2069  ;;  %v2383_v38 = vrot.slane %v2382_v52, 4 }
 0x12d   : > { %2146 = vst.msk [vmem:[#allocation2 + $0x40] sm:$0xf] %vm2137_vm14, %v2070_v57  ;;  %v2694_v57 = vrot.slane %v2605_v47, 5  ;;  %v6754_v0 = vrot.slane %v2395_v3, 5  ;;  %v437_v47 = vld [vmem:[%s5817_s26 + $0x58] sm:$0xf] }
 0x12e   : > { %v2072_v28 = vpop.permute.xlu1 %2071  ;;  %1666 = vrot.lane.b32.xlu0 %v1544_v17, %s5715_s30  ;;  %v2388_v19 = vsel %vm5860_vm5, %v2383_v38, %v2387_v51  ;;  %466 = vst.msk [vmem:[#allocation2 + $0xb0] sm:$0xf] %vm443_vm6, %v437_v47 }
 0x12f   : > { %2147 = vst.msk [vmem:[#allocation2 + $0x48] sm:$0xf] %vm2137_vm14, %v2072_v28  ;;  %v2607_v28 = vld [vmem:[%s5817_s26 + $0x5c] sm:$0xf]  ;;  %v2398_v8 = vsel %vm5860_vm5, %v2393_v32, %v6754_v0  ;;  %v2695_v23 = vsel %vm5825_vm4, %v2693_v16, %v2694_v57 }
 0x130   : > { %1668 = vrot.lane.b32.xlu1 %v1554_v50, %s5715_s30  ;;  %v2074_v1 = vpop.permute.xlu0 %2073  ;;  %v2368_v50 = vsel %vm5860_vm5, %v2363_v40, %v2367_v24  ;;  %v2700_v20 = vrot.slane %v2607_v28, 5 }
 0x131   : > { %2148 = vst.msk [vmem:[#allocation2 + $0x50] sm:$0xf] %vm2137_vm14, %v2074_v1 }
 0x132   : > { %v2076_v18 = vpop.permute.xlu1 %2075  ;;  %1915 = vrot.lane.b32.xlu0 %v1851_v62, %s5716_s13  ;;  %v718_v62 = vshrl.u32 %v494_v6, 16  ;;  %v2702_v51 = vrot.slane %v2700_v20, 4 }
 0x133   : > { %2149 = vst.msk [vmem:[#allocation2 + $0x58] sm:$0xf] %vm2137_vm14, %v2076_v18  ;;  %v496_v18 = vld [vmem:[%s5817_s26 + $0x5c] sm:$0xf] }
 0x134   : > { %1917 = vrot.lane.b32.xlu1 %v1854_v11, %s5716_s13  ;;  %v2491_v48 = vpop.permute.xlu0 %2490  ;;  %v2696_v11 = vrot.slane %v2694_v57, 4  ;;  %v720_v24 = vrot.slane %v718_v62, 4  ;;  %v734_v53 = vshll.u32 %v496_v18, 16  ;;  %v738_v41 = vshrl.u32 %v496_v18, 16 }
 0x135   : > { %2567 = vst.msk [vmem:[#allocation2 + $0x40] sm:$0xf] %vm2558_vm15, %v2491_v48  ;;  %v6765_v48 = vld [vmem:[%s5817_s26 + $0x60] sm:$0xf]  ;;  %v1017_v18 = vrot.slane %v1015_v7, 4  ;;  %v1555_v7 = vshrl.u32 %v6665_v35, 16 }
 0x136   : > { %v2493_v31 = vpop.permute.xlu1 %2492  ;;  %1919 = vrot.lane.b32.xlu0 %v1857_v25, %s5716_s13  ;;  %v710_v25 = vrot.slane %v708_v61, 4  ;;  %v2703_v46 = vrot.slane %v6765_v48, 5  ;;  %v740_v40 = vrot.slane %v738_v41, 4  ;;  %v1565_v35 = vshrl.u32 %v1344_v59, 16 }
 0x137   : > { %2568 = vst.msk [vmem:[#allocation2 + $0x48] sm:$0xf] %vm2558_vm15, %v2493_v31 }
 0x138   : > { %1921 = vrot.lane.b32.xlu1 %v1860_v60, %s5716_s13  ;;  %v2495_v36 = vpop.permute.xlu0 %2494  ;;  %v6767_v60 = vrot.slane %v714_v39, 5 }
 0x139   : > { %2569 = vst.msk [vmem:[#allocation2 + $0x50] sm:$0xf] %vm2558_vm15, %v2495_v36  ;;  %v711_v36 = vor.u32 %v710_v25, %v6615_v45  ;;  %v438_v45 = vld [vmem:[%s5817_s26 + $0x5c] sm:$0xf] }
 0x13a   : > { %v2497_v12 = vpop.permute.xlu1 %2496  ;;  %2085 = vrot.lane.b32.xlu0 %v2013_v2, %s5717_s14  ;;  %v2699_v2 = vrot.slane %v2697_v15, 4  ;;  %v721_v52 = vor.u32 %v720_v24, %v6767_v60  ;;  %467 = vst.msk [vmem:[#allocation2 + $0xb8] sm:$0xf] %vm443_vm6, %v438_v45 }
 0x13b   : > { %2570 = vst.msk [vmem:[#allocation2 + $0x58] sm:$0xf] %vm2558_vm15, %v2497_v12  ;;  %v2698_v12 = vsel %vm5825_vm4, %v2696_v11, %v2697_v15  ;;  %v712_v54 = vrot.slane %v711_v36, 4  ;;  %v919_v15 = vld [vmem:[%s5817_s26 + $0x58] sm:$0xf] }
 0x13c   : > { %2087 = vrot.lane.b32.xlu1 %v2014_v37, %s5717_s14  ;;  %v2744_v55 = vpop.permute.xlu0 %2743  ;;  %v730_v37 = vrot.slane %v728_v22, 4  ;;  %v2701_v58 = vsel %vm5825_vm4, %v2699_v2, %v2700_v20  ;;  %v722_v38 = vrot.slane %v721_v52, 4 }
 0x13d   : > { %2820 = vst.msk [vmem:[#allocation2 + $0x40] sm:$0xf] %vm2811_vm0, %v2744_v55  ;;  %v717_v28 = vsel %vm5860_vm5, %v712_v54, %v6767_v60  ;;  %v6834_v60 = vld [vmem:[%s5817_s26 + $0x60] sm:$0xf] }
 0x13e   : > { %v2746_v17 = vpop.permute.xlu1 %2745  ;;  %2089 = vrot.lane.b32.xlu0 %v2015_v44, %s5717_s14  ;;  %v736_v44 = vrot.slane %v734_v53, 5  ;;  %v731_v3 = vor.u32 %v730_v37, %v726_v5  ;;  %v727_v62 = vsel %vm5860_vm5, %v722_v38, %v726_v5  ;;  %v1027_v29 = vrot.slane %v6834_v60, 5  ;;  %v1346_v5 = vld [vmem:[%s5817_s26 + $0x64] sm:$0xf]  ;;  %v1174_v38 = vld [vmem:[%s5817_s26 + $0x5c] sm:$0xf] }
 0x13f   : > { %2821 = vst.msk [vmem:[#allocation2 + $0x48] sm:$0xf] %vm2811_vm0, %v2746_v17  ;;  %v2704_v17 = vsel %vm5825_vm4, %v2702_v51, %v2703_v46  ;;  %v1557_v51 = vrot.slane %v1555_v7, 4  ;;  %v1581_v45 = vshll.u32 %v1346_v5, 16  ;;  %v1585_v47 = vshrl.u32 %v1346_v5, 16 }
 0x140   : > { %2091 = vrot.lane.b32.xlu1 %v2016_v56, %s5717_s14  ;;  %v808_v13 = vpop.permute.xlu0 %807  ;;  %v6793_v56 = vld [vmem:[%s5817_s26 + $0x60] sm:$0xf]  ;;  %v741_v57 = vor.u32 %v740_v40, %v736_v44  ;;  %v732_v30 = vrot.slane %v731_v3, 4  ;;  %v1567_v40 = vrot.slane %v1565_v35, 4  ;;  %v6901_v35 = vld [vmem:[%s5817_s26 + $0x68] sm:$0xf] }
 0x141   : > { %880 = vst.msk [vmem:[#allocation2 + $0x60] sm:$0xf] %vm867_vm9, %v808_v13  ;;  %v744_v61 = vshll.u32 %v6793_v56, 16  ;;  %v918_v13 = vld [vmem:[%s5817_s26 + $0x54] sm:$0xf]  ;;  %v1558_v3 = vor.u32 %v1557_v51, %v6682_v33 }
 0x142   : > { %v810_v1 = vpop.permute.xlu1 %809  ;;  %2506 = vrot.lane.b32.xlu0 %v2368_v50, %s5718_s15  ;;  %v737_v16 = vsel %vm5860_vm5, %v732_v30, %v736_v44  ;;  %v1175_v33 = vld [vmem:[%s5817_s26 + $0x60] sm:$0xf] }
 0x143   : > { %881 = vst.msk [vmem:[#allocation2 + $0x68] sm:$0xf] %vm867_vm9, %v810_v1  ;;  %v6818_v32 = vrot.slane %v744_v61, 5  ;;  %v1018_v1 = vrot.slane %v918_v13, 5  ;;  %v1583_v61 = vrot.slane %v1581_v45, 5 }
 0x144   : > { %2508 = vrot.lane.b32.xlu1 %v2378_v63, %s5718_s15  ;;  %v2748_v26 = vpop.permute.xlu0 %2747  ;;  %v742_v63 = vrot.slane %v741_v57, 4  ;;  %v6868_v13 = vld [vmem:[%s5817_s26 + $0x68] sm:$0xf]  ;;  %v1766_v7 = vld [vmem:[%s5817_s26 + $0x60] sm:$0xf] }
 0x145   : > { %2822 = vst.msk [vmem:[#allocation2 + $0x50] sm:$0xf] %vm2811_vm0, %v2748_v26  ;;  %v1020_v25 = vrot.slane %v1018_v1, 4  ;;  %v1021_v26 = vrot.slane %v919_v15, 5  ;;  %v1765_v15 = vld [vmem:[%s5817_s26 + $0x5c] sm:$0xf] }
 0x146   : > { %v2750_v31 = vpop.permute.xlu1 %2749  ;;  %2510 = vrot.lane.b32.xlu0 %v2388_v19, %s5718_s15  ;;  %v5642_v34 = vld [vmem:[#allocation2 + $0x40] ss:$8 sps:$4 sm:$0xff]   ;;  %v920_v19 = vld [vmem:[%s5817_s26 + $0x5c] sm:$0xf]  ;;  %v747_v22 = vsel %vm5860_vm5, %v742_v63, %v6818_v32 }
 0x147   : > { %2823 = vst.msk [vmem:[#allocation2 + $0x58] sm:$0xf] %vm2811_vm0, %v2750_v31  ;;  %5536 = vmatprep.mubr.msk.bf16.mxu0 %vm2961_vm1, %v5642_v34  ;;  %v1024_v21 = vrot.slane %v920_v19, 5  ;;  %v1023_v53 = vrot.slane %v1021_v26, 4  ;;  %v1345_v31 = vld [vmem:[%s5817_s26 + $0x60] sm:$0xf]  ;;  %v1022_v34 = vsel %vm5825_vm4, %v1020_v25, %v1021_v26 }
 0x148   : > { %2512 = vrot.lane.b32.xlu1 %v2398_v8, %s5718_s15  ;;  %v812_v10 = vpop.permute.xlu0 %811  ;;  %v1019_v8 = vsel %vm5825_vm4, %v1017_v18, %v1018_v1  ;;  %v1571_v37 = vshll.u32 %v1345_v31, 16  ;;  %v1591_v19 = vshll.u32 %v6868_v13, 16  ;;  %v1862_v26 = vrot.slane %v1765_v15, 5  ;;  %v6935_v15 = vld [vmem:[%s5817_s26 + $0x70] sm:$0xf] }
 0x149   : > { %882 = vst.msk [vmem:[#allocation2 + $0x70] sm:$0xf] %vm867_vm9, %v812_v10  ;;  %v1026_v27 = vrot.slane %v1024_v21, 4  ;;  %v1025_v36 = vsel %vm5825_vm4, %v1023_v53, %v1024_v21  ;;  %v1575_v10 = vshrl.u32 %v1345_v31, 16  ;;  %v1861_v53 = vrot.slane %v1859_v9, 4 }
 0x14a   : > { %v814_v55 = vpop.permute.xlu1 %813  ;;  %2759 = vrot.lane.b32.xlu0 %v2695_v23, %s5719_s18  ;;  %v1561_v23 = vshll.u32 %v1344_v59, 16  ;;  %v1573_v54 = vrot.slane %v1571_v37, 5  ;;  %v6885_v25 = vrot.slane %v1591_v19, 5  ;;  %v2399_v9 = vshrl.u32 %v6732_v14, 16  ;;  %v2189_v37 = vld [vmem:[%s5817_s26 + $0x68] sm:$0xf] }
 0x14b   : > { %883 = vst.msk [vmem:[#allocation2 + $0x78] sm:$0xf] %vm867_vm9, %v814_v55  ;;  %v1028_v52 = vsel %vm5825_vm4, %v1026_v27, %v1027_v29  ;;  %v1863_v5 = vsel %vm5825_vm4, %v1861_v53, %v1862_v26  ;;  %v2405_v14 = vshll.u32 %v2188_v49, 16  ;;  %v2415_v45 = vshll.u32 %v2189_v37, 16 }
 0x14c   : > { %2761 = vrot.lane.b32.xlu1 %v2698_v12, %s5719_s18  ;;  %v1064_v6 = vpop.permute.xlu0 %1063  ;;  %v1563_v44 = vrot.slane %v1561_v23, 5  ;;  %v1865_v23 = vrot.slane %v1766_v7, 5  ;;  %v498_v7 = vld [vmem:[%s5817_s26 + $0x64] sm:$0xf] }
 0x14d   : > { %1136 = vst.msk [vmem:[#allocation2 + $0x60] sm:$0xf] %vm1123_vm10, %v1064_v6  ;;  %v1577_v6 = vrot.slane %v1575_v10, 4 }
 0x14e   : > { %v1066_v50 = vpop.permute.xlu1 %1065  ;;  %2763 = vrot.lane.b32.xlu0 %v2701_v58, %s5719_s18  ;;  %v5643_v42 = vld [vmem:[#allocation2 + $0x50] ss:$8 sps:$4 sm:$0xff]   ;;  %v1568_v57 = vor.u32 %v1567_v40, %v1563_v44 }
 0x14f   : > { %1137 = vst.msk [vmem:[#allocation2 + $0x68] sm:$0xf] %vm1123_vm10, %v1066_v50  ;;  %5537 = vmatmul.mubr.msk.bf16.gmra.mrb[8].mxu0 %vm2961_vm1, %v5643_v42  ;;  %v1173_v58 = vld [vmem:[%s5817_s26 + $0x58] sm:$0xf]  ;;  %v1587_v50 = vrot.slane %v1585_v47, 4  ;;  %v1578_v30 = vor.u32 %v1577_v6, %v1573_v54  ;;  %v2419_v47 = vshrl.u32 %v2189_v37, 16 }
 0x150   : > { %2765 = vrot.lane.b32.xlu1 %v2704_v17, %s5719_s18  ;;  %v1068_v39 = vpop.permute.xlu0 %1067  ;;  %v1569_v63 = vrot.slane %v1568_v57, 4  ;;  %v2611_v37 = vld [vmem:[%s5817_s26 + $0x6c] sm:$0xf] }
 0x151   : > { %1138 = vst.msk [vmem:[#allocation2 + $0x70] sm:$0xf] %vm1123_vm10, %v1068_v39  ;;  %v1588_v1 = vor.u32 %v1587_v50, %v1583_v61  ;;  %v1579_v18 = vrot.slane %v1578_v30, 4 }
 0x152   : > { %v1070_v11 = vpop.permute.xlu1 %1069  ;;  %823 = vrot.lane.b32.xlu0 %v717_v28, %s5714_s29  ;;  %v1559_v28 = vrot.slane %v1558_v3, 4  ;;  %v1574_v21 = vsel %vm5860_vm5, %v1569_v63, %v1573_v54  ;;  %v2401_v54 = vrot.slane %v2399_v9, 4 }
 0x153   : > { %1139 = vst.msk [vmem:[#allocation2 + $0x78] sm:$0xf] %vm1123_vm10, %v1070_v11 }
 0x154   : > { %825 = vrot.lane.b32.xlu1 %v727_v62, %s5714_s29  ;;  %v1234_v20 = vpop.permute.xlu0 %1233  ;;  %v1176_v62 = vld [vmem:[%s5817_s26 + $0x64] sm:$0xf]  ;;  %v2402_v30 = vor.u32 %v2401_v54, %v6754_v0  ;;  %v2019_v0 = vld [vmem:[%s5817_s26 + $0x68] sm:$0xf] }
 0x155   : > { %1306 = vst.msk [vmem:[#allocation2 + $0x60] sm:$0xf] %vm1293_vm11, %v1234_v20 }
 0x156   : > { %v1236_v24 = vpop.permute.xlu1 %1235  ;;  %827 = vrot.lane.b32.xlu0 %v737_v16, %s5714_s29  ;;  %v1564_v16 = vsel %vm5860_vm5, %v1559_v28, %v1563_v44  ;;  %v2409_v44 = vshrl.u32 %v2188_v49, 16  ;;  %v2017_v28 = vld [vmem:[%s5817_s26 + $0x60] sm:$0xf]  ;;  %v758_v49 = vshrl.u32 %v498_v7, 16 }
 0x157   : > { %1307 = vst.msk [vmem:[#allocation2 + $0x68] sm:$0xf] %vm1293_vm11, %v1236_v24  ;;  %v1767_v24 = vld [vmem:[%s5817_s26 + $0x64] sm:$0xf] }
 0x158   : > { %829 = vrot.lane.b32.xlu1 %v747_v22, %s5714_s29  ;;  %v1238_v41 = vpop.permute.xlu0 %1237  ;;  %v1589_v22 = vrot.slane %v1588_v1, 4  ;;  %v1868_v27 = vrot.slane %v1767_v24, 5 }
 0x159   : > { %1308 = vst.msk [vmem:[#allocation2 + $0x70] sm:$0xf] %vm1293_vm11, %v1238_v41 }
 0x15a   : > { %v1240_v2 = vpop.permute.xlu1 %1239  ;;  %1079 = vrot.lane.b32.xlu0 %v1019_v8, %s5713_s28  ;;  %v1584_v8 = vsel %vm5860_vm5, %v1579_v18, %v1583_v61  ;;  %v1594_v31 = vsel %vm5860_vm5, %v1589_v22, %v6885_v25  ;;  %v1870_v51 = vrot.slane %v1868_v27, 4  ;;  %v2403_v18 = vrot.slane %v2402_v30, 4  ;;  %v2020_v22 = vld [vmem:[%s5817_s26 + $0x6c] sm:$0xf] }
 0x15b   : > { %1309 = vst.msk [vmem:[#allocation2 + $0x78] sm:$0xf] %vm1293_vm11, %v1240_v2 }
 0x15c   : > { %1081 = vrot.lane.b32.xlu1 %v1022_v34, %s5713_s28  ;;  %v1655_v12 = vpop.permute.xlu0 %1654  ;;  %v1864_v34 = vrot.slane %v1862_v26, 4 }
 0x15d   : > { %1727 = vst.msk [vmem:[#allocation2 + $0x60] sm:$0xf] %vm8233_vm12, %v1655_v12  ;;  %v1871_v12 = vrot.slane %v6901_v35, 5  ;;  %v2192_v35 = vld [vmem:[%s5817_s26 + $0x74] sm:$0xf] }
 0x15e   : > { %v1657_v55 = vpop.permute.xlu1 %1656  ;;  %1083 = vrot.lane.b32.xlu0 %v1025_v36, %s5713_s28  ;;  %v1867_v36 = vrot.slane %v1865_v23, 4 }
 0x15f   : > { %1728 = vst.msk [vmem:[#allocation2 + $0x68] sm:$0xf] %vm8233_vm12, %v1657_v55  ;;  %v2190_v55 = vld [vmem:[%s5817_s26 + $0x6c] sm:$0xf]  ;;  %v1872_v6 = vsel %vm5825_vm4, %v1870_v51, %v1871_v12 }
 0x160   : > { %1085 = vrot.lane.b32.xlu1 %v1028_v52, %s5713_s28  ;;  %v1659_v17 = vpop.permute.xlu0 %1658  ;;  %v1866_v52 = vsel %vm5825_vm4, %v1864_v34, %v1865_v23  ;;  %v2425_v57 = vshll.u32 %v2190_v55, 16  ;;  %v2429_v61 = vshrl.u32 %v2190_v55, 16  ;;  %v499_v23 = vld [vmem:[%s5817_s26 + $0x68] sm:$0xf] }
 0x161   : > { %1729 = vst.msk [vmem:[#allocation2 + $0x70] sm:$0xf] %vm8233_vm12, %v1659_v17  ;;  %v2407_v17 = vrot.slane %v2405_v14, 5 }
 0x162   : > { %v1661_v42 = vpop.permute.xlu1 %1660  ;;  %1249 = vrot.lane.b32.xlu0 %v1173_v58, %s5712_s27  ;;  %v1869_v58 = vsel %vm5825_vm4, %v1867_v36, %v1868_v27  ;;  %v2427_v1 = vrot.slane %v2425_v57, 5  ;;  %v2431_v19 = vrot.slane %v2429_v61, 4 }
 0x163   : > { %1730 = vst.msk [vmem:[#allocation2 + $0x78] sm:$0xf] %vm8233_vm12, %v1661_v42  ;;  %v2417_v42 = vrot.slane %v2415_v45, 5  ;;  %v2408_v27 = vsel %vm5860_vm5, %v2403_v18, %v2407_v17 }
 0x164   : > { %1251 = vrot.lane.b32.xlu1 %v1174_v38, %s5712_s27  ;;  %v1908_v39 = vpop.permute.xlu0 %1907  ;;  %v2411_v38 = vrot.slane %v2409_v44, 4  ;;  %v2432_v24 = vor.u32 %v2431_v19, %v2427_v1  ;;  %v764_v44 = vshll.u32 %v499_v23, 16 }
 0x165   : > { %1980 = vst.msk [vmem:[#allocation2 + $0x60] sm:$0xf] %vm1967_vm13, %v1908_v39 }
 0x166   : > { %v1910_v11 = vpop.permute.xlu1 %1909  ;;  %1253 = vrot.lane.b32.xlu0 %v1175_v33, %s5712_s27  ;;  %v2421_v33 = vrot.slane %v2419_v47, 4  ;;  %v2412_v63 = vor.u32 %v2411_v38, %v2407_v17  ;;  %v439_v17 = vld [vmem:[%s5817_s26 + $0x60] sm:$0xf] }
 0x167   : > { %1981 = vst.msk [vmem:[#allocation2 + $0x68] sm:$0xf] %vm1967_vm13, %v1910_v11 }
 0x168   : > { %1255 = vrot.lane.b32.xlu1 %v1176_v62, %s5712_s27  ;;  %v1912_v20 = vpop.permute.xlu0 %1911  ;;  %v2018_v62 = vld [vmem:[%s5817_s26 + $0x64] sm:$0xf]  ;;  %v2413_v26 = vrot.slane %v2412_v63, 4  ;;  %468 = vst.msk [vmem:[#allocation2 + $0xc0] sm:$0xf] %vm443_vm6, %v439_v17 }
 0x169   : > { %1982 = vst.msk [vmem:[#allocation2 + $0x70] sm:$0xf] %vm1967_vm13, %v1912_v20 }
 0x16a   : > { %v1914_v59 = vpop.permute.xlu1 %1913  ;;  %1670 = vrot.lane.b32.xlu0 %v1564_v16, %s5715_s30  ;;  %v2422_v16 = vor.u32 %v2421_v33, %v2417_v42  ;;  %v2418_v9 = vsel %vm5860_vm5, %v2413_v26, %v2417_v42  ;;  %v766_v33 = vrot.slane %v764_v44, 5  ;;  %v924_v44 = vld [vmem:[%s5817_s26 + $0x6c] sm:$0xf] }
 0x16b   : > { %1983 = vst.msk [vmem:[#allocation2 + $0x78] sm:$0xf] %vm1967_vm13, %v1914_v59  ;;  %v2435_v59 = vshll.u32 %v6935_v15, 16 }
 0x16c   : > { %1672 = vrot.lane.b32.xlu1 %v1574_v21, %s5715_s30  ;;  %v2078_v41 = vpop.permute.xlu0 %2077  ;;  %v2609_v21 = vld [vmem:[%s5817_s26 + $0x64] sm:$0xf]  ;;  %v2423_v53 = vrot.slane %v2422_v16, 4 }
 0x16d   : > { %2150 = vst.msk [vmem:[#allocation2 + $0x60] sm:$0xf] %vm2137_vm14, %v2078_v41  ;;  %v748_v41 = vshrl.u32 %v6793_v56, 16  ;;  %v6955_v36 = vrot.slane %v2435_v59, 5  ;;  %v2610_v56 = vld [vmem:[%s5817_s26 + $0x68] sm:$0xf] }
 0x16e   : > { %v2080_v2 = vpop.permute.xlu1 %2079  ;;  %1674 = vrot.lane.b32.xlu0 %v1584_v8, %s5715_s30  ;;  %v2428_v51 = vsel %vm5860_vm5, %v2423_v53, %v2427_v1  ;;  %v2709_v55 = vrot.slane %v2610_v56, 5  ;;  %v923_v56 = vld [vmem:[%s5817_s26 + $0x68] sm:$0xf] }
 0x16f   : > { %2151 = vst.msk [vmem:[#allocation2 + $0x68] sm:$0xf] %vm2137_vm14, %v2080_v2  ;;  %v754_v2 = vshll.u32 %v498_v7, 16  ;;  %v750_v45 = vrot.slane %v748_v41, 4 }
 0x170   : > { %1676 = vrot.lane.b32.xlu1 %v1594_v31, %s5715_s30  ;;  %v2082_v10 = vpop.permute.xlu0 %2081  ;;  %v2706_v31 = vrot.slane %v2609_v21, 5  ;;  %v2711_v42 = vrot.slane %v2709_v55, 4 }
 0x171   : > { %2152 = vst.msk [vmem:[#allocation2 + $0x70] sm:$0xf] %vm2137_vm14, %v2082_v10  ;;  %v756_v54 = vrot.slane %v754_v2, 5 }
 0x172   : > { %v2084_v40 = vpop.permute.xlu1 %2083  ;;  %1923 = vrot.lane.b32.xlu0 %v1863_v5, %s5716_s13  ;;  %v2433_v5 = vrot.slane %v2432_v24, 4  ;;  %v2708_v14 = vrot.slane %v2706_v31, 4 }
 0x173   : > { %2153 = vst.msk [vmem:[#allocation2 + $0x78] sm:$0xf] %vm2137_vm14, %v2084_v40  ;;  %v768_v40 = vshrl.u32 %v499_v23, 16 }
 0x174   : > { %1925 = vrot.lane.b32.xlu1 %v1866_v52, %s5716_s13  ;;  %v2499_v3 = vpop.permute.xlu0 %2498  ;;  %v2705_v52 = vrot.slane %v2703_v46, 4  ;;  %v2438_v48 = vsel %vm5860_vm5, %v2433_v5, %v6955_v36  ;;  %v500_v46 = vld [vmem:[%s5817_s26 + $0x6c] sm:$0xf]  ;;  %v2710_v1 = vsel %vm5825_vm4, %v2708_v14, %v2709_v55 }
 0x175   : > { %2571 = vst.msk [vmem:[#allocation2 + $0x60] sm:$0xf] %vm2558_vm15, %v2499_v3  ;;  %v760_v3 = vrot.slane %v758_v49, 4  ;;  %v770_v30 = vrot.slane %v768_v40, 4  ;;  %v778_v63 = vshrl.u32 %v500_v46, 16 }
 0x176   : > { %v2501_v50 = vpop.permute.xlu1 %2500  ;;  %1927 = vrot.lane.b32.xlu0 %v1869_v58, %s5716_s13  ;;  %v2712_v58 = vrot.slane %v2611_v37, 5  ;;  %v2707_v61 = vsel %vm5825_vm4, %v2705_v52, %v2706_v31 }
 0x177   : > { %2572 = vst.msk [vmem:[#allocation2 + $0x68] sm:$0xf] %vm2558_vm15, %v2501_v50  ;;  %v6977_v50 = vld [vmem:[%s5817_s26 + $0x70] sm:$0xf]  ;;  %v761_v16 = vor.u32 %v760_v3, %v756_v54  ;;  %v780_v59 = vrot.slane %v778_v63, 4 }
 0x178   : > { %1929 = vrot.lane.b32.xlu1 %v1872_v6, %s5716_s13  ;;  %v2503_v39 = vpop.permute.xlu0 %2502  ;;  %v440_v6 = vld [vmem:[%s5817_s26 + $0x64] sm:$0xf]  ;;  %v2714_v19 = vrot.slane %v2712_v58, 4 }
 0x179   : > { %2573 = vst.msk [vmem:[#allocation2 + $0x70] sm:$0xf] %vm2558_vm15, %v2503_v39 }
 0x17a   : > { %v2505_v11 = vpop.permute.xlu1 %2504  ;;  %2093 = vrot.lane.b32.xlu0 %v2017_v28, %s5717_s14  ;;  %469 = vst.msk [vmem:[#allocation2 + $0xc8] sm:$0xf] %vm443_vm6, %v440_v6  ;;  %v751_v28 = vor.u32 %v750_v45, %v6818_v32  ;;  %v441_v32 = vld [vmem:[%s5817_s26 + $0x68] sm:$0xf]  ;;  %v1033_v45 = vrot.slane %v923_v56, 5 }
 0x17b   : > { %2574 = vst.msk [vmem:[#allocation2 + $0x78] sm:$0xf] %vm2558_vm15, %v2505_v11  ;;  %v2715_v11 = vrot.slane %v6977_v50, 5 }
 0x17c   : > { %2095 = vrot.lane.b32.xlu1 %v2018_v62, %s5717_s14  ;;  %v2752_v20 = vpop.permute.xlu0 %2751  ;;  %v774_v62 = vshll.u32 %v500_v46, 16  ;;  %470 = vst.msk [vmem:[#allocation2 + $0xd0] sm:$0xf] %vm443_vm6, %v441_v32  ;;  %v752_v21 = vrot.slane %v751_v28, 4  ;;  %v1035_v3 = vrot.slane %v1033_v45, 4  ;;  %vm3247_vm6 = vcmask 80896  }
 0x17d   : > { %2824 = vst.msk [vmem:[#allocation2 + $0x60] sm:$0xf] %vm2811_vm0, %v2752_v20  ;;  %v2713_v20 = vsel %vm5825_vm4, %v2711_v42, %v2712_v58  ;;  %v2716_v7 = vsel %vm5825_vm4, %v2714_v19, %v2715_v11  ;;  %v1349_v46 = vld [vmem:[%s5817_s26 + $0x70] sm:$0xf]  ;;  %v1177_v19 = vld [vmem:[%s5817_s26 + $0x68] sm:$0xf] }
 0x17e   : > { %v2754_v8 = vpop.permute.xlu1 %2753  ;;  %2097 = vrot.lane.b32.xlu0 %v2019_v0, %s5717_s14  ;;  %v442_v0 = vld [vmem:[%s5817_s26 + $0x6c] sm:$0x7]  ;;  %v776_v24 = vrot.slane %v774_v62, 5  ;;  %v757_v31 = vsel %vm5860_vm5, %v752_v21, %v756_v54  ;;  %v1611_v42 = vshll.u32 %v1349_v46, 16 }
 0x17f   : > { %2825 = vst.msk [vmem:[#allocation2 + $0x68] sm:$0xf] %vm2811_vm0, %v2754_v8  ;;  %v762_v8 = vrot.slane %v761_v16, 4  ;;  %v1178_v21 = vld [vmem:[%s5817_s26 + $0x6c] sm:$0xf] }
 0x180   : > { %2099 = vrot.lane.b32.xlu1 %v2020_v22, %s5717_s14  ;;  %v816_v34 = vpop.permute.xlu0 %815  ;;  %472 = vst.msk [vmem:[#allocation2 + $0xd8] sm:$0x7] %vm471_vm3, %v442_v0  ;;  %v771_v22 = vor.u32 %v770_v30, %v766_v33  ;;  %v781_v2 = vor.u32 %v780_v59, %v776_v24  ;;  %v7047_v16 = vrot.slane %v1611_v42, 5  ;;  %v1179_v59 = vld [vmem:[%s5817_s26 + $0x70] sm:$0xf] }
 0x181   : > { %884 = vst.msk [vmem:[#allocation2 + $0x80] sm:$0xf] %vm867_vm9, %v816_v34  ;;  %v767_v49 = vsel %vm5860_vm5, %v762_v8, %v766_v33  ;;  %v1615_v33 = vshrl.u32 %v1349_v46, 16  ;;  %v1770_v46 = vld [vmem:[%s5817_s26 + $0x70] sm:$0xf] }
 0x182   : > { %v818_v10 = vpop.permute.xlu1 %817  ;;  %2514 = vrot.lane.b32.xlu0 %v2408_v27, %s5718_s15  ;;  %v922_v27 = vld [vmem:[%s5817_s26 + $0x64] sm:$0xf]  ;;  %v772_v34 = vrot.slane %v771_v22, 4  ;;  %v782_v14 = vrot.slane %v781_v2, 4  ;;  %v1180_v2 = vld [vmem:[%s5817_s26 + $0x74] sm:$0x7] }
 0x183   : > { %885 = vst.msk [vmem:[#allocation2 + $0x88] sm:$0xf] %vm867_vm9, %v818_v10  ;;  %v1029_v10 = vrot.slane %v1027_v29, 4  ;;  %v1036_v29 = vrot.slane %v924_v44, 5  ;;  %v1617_v0 = vrot.slane %v1615_v33, 4 }
 0x184   : > { %2516 = vrot.lane.b32.xlu1 %v2418_v9, %s5718_s15  ;;  %v2756_v47 = vpop.permute.xlu0 %2755  ;;  %v1030_v9 = vrot.slane %v922_v27, 5  ;;  %v777_v37 = vsel %vm5860_vm5, %v772_v34, %v776_v24  ;;  %v1771_v42 = vld [vmem:[%s5817_s26 + $0x74] sm:$0xf] }
 0x185   : > { %2826 = vst.msk [vmem:[#allocation2 + $0x70] sm:$0xf] %vm2811_vm0, %v2756_v47  ;;  %v1595_v47 = vshrl.u32 %v6868_v13, 16  ;;  %v1038_v30 = vrot.slane %v1036_v29, 4 }
 0x186   : > { %v2758_v38 = vpop.permute.xlu1 %2757  ;;  %2518 = vrot.lane.b32.xlu0 %v2428_v51, %s5718_s15  ;;  %v5644_v57 = vld [vmem:[#allocation2 + $0x60] ss:$8 sps:$4 sm:$0xff]   ;;  %v1348_v51 = vld [vmem:[%s5817_s26 + $0x6c] sm:$0xf]  ;;  %v1032_v40 = vrot.slane %v1030_v9, 4  ;;  %v1031_v60 = vsel %vm5825_vm4, %v1029_v10, %v1030_v9 }
 0x187   : > { %2827 = vst.msk [vmem:[#allocation2 + $0x78] sm:$0xf] %vm2811_vm0, %v2758_v38  ;;  %5540 = vmatprep.mubr.msk.bf16.mxu0 %vm2961_vm1, %v5644_v57  ;;  %v1601_v58 = vshll.u32 %v1348_v51, 16  ;;  %v1605_v54 = vshrl.u32 %v1348_v51, 16  ;;  %v1597_v57 = vrot.slane %v1595_v47, 4 }
 0x188   : > { %2520 = vrot.lane.b32.xlu1 %v2438_v48, %s5718_s15  ;;  %v820_v39 = vpop.permute.xlu0 %819  ;;  %v1034_v13 = vsel %vm5825_vm4, %v1032_v40, %v1033_v45  ;;  %v1769_v10 = vld [vmem:[%s5817_s26 + $0x6c] sm:$0xf] }
 0x189   : > { %886 = vst.msk [vmem:[#allocation2 + $0x90] sm:$0xf] %vm867_vm9, %v820_v39  ;;  %v7034_v17 = vrot.slane %v1601_v58, 5  ;;  %v1607_v38 = vrot.slane %v1605_v54, 4  ;;  %v1350_v39 = vld [vmem:[%s5817_s26 + $0x74] sm:$0xf] }
 0x18a   : > { %v822_v18 = vpop.permute.xlu1 %821  ;;  %2767 = vrot.lane.b32.xlu0 %v2707_v61, %s5719_s18  ;;  %v1037_v61 = vsel %vm5825_vm4, %v1035_v3, %v1036_v29 }
 0x18b   : > { %887 = vst.msk [vmem:[#allocation2 + $0x98] sm:$0xf] %vm867_vm9, %v822_v18  ;;  %v1608_v63 = vor.u32 %v1607_v38, %v7034_v17  ;;  %v1621_v18 = vshll.u32 %v1350_v39, 16 }
 0x18c   : > { %2769 = vrot.lane.b32.xlu1 %v2710_v1, %s5719_s18  ;;  %v1072_v26 = vpop.permute.xlu0 %1071  ;;  %v1598_v1 = vor.u32 %v1597_v57, %v6885_v25  ;;  %v7056_v25 = vld [vmem:[%s8220_s2] ss:$0 sm:$0xff] }
 0x18d   : > { %1140 = vst.msk [vmem:[#allocation2 + $0x80] sm:$0xf] %vm1123_vm10, %v1072_v26  ;;  %v1609_v26 = vrot.slane %v1608_v63, 4  ;;  %v1623_v27 = vrot.slane %v1621_v18, 5 }
 0x18e   : > { %v1074_v53 = vpop.permute.xlu1 %1073  ;;  %2771 = vrot.lane.b32.xlu0 %v2713_v20, %s5719_s18  ;;  %v5645_v41 = vld [vmem:[#allocation2 + $0x70] ss:$8 sps:$4 sm:$0xff]   ;;  %v1625_v20 = vshrl.u32 %v1350_v39, 16  ;;  %v1599_v24 = vrot.slane %v1598_v1, 4 }
 0x18f   : > { %1141 = vst.msk [vmem:[#allocation2 + $0x88] sm:$0xf] %vm1123_vm10, %v1074_v53  ;;  %5541 = vmatmul.mubr.msk.bf16.gmra.mrb[12].mxu0 %vm2961_vm1, %v5645_v41  ;;  %v7065_v53 = vld [vmem:[%s8221_s3] ss:$0 sm:$0xff]  ;;  %v1614_v56 = vsel %vm5860_vm5, %v1609_v26, %v7047_v16 }
 0x190   : > { %2773 = vrot.lane.b32.xlu1 %v2716_v7, %s5719_s18  ;;  %v1076_v23 = vpop.permute.xlu0 %1075  ;;  %v1618_v7 = vor.u32 %v1617_v0, %v7047_v16  ;;  %v2445_v16 = vshll.u32 %v2192_v35, 16  ;;  %v2449_v0 = vshrl.u32 %v2192_v35, 16  ;;  %v2717_v35 = vrot.slane %v2715_v11, 4 }
 0x191   : > { %1142 = vst.msk [vmem:[#allocation2 + $0x90] sm:$0xf] %vm1123_vm10, %v1076_v23 }
 0x192   : > { %v1078_v5 = vpop.permute.xlu1 %1077  ;;  %831 = vrot.lane.b32.xlu0 %v757_v31, %s5714_s29  ;;  %v1627_v31 = vrot.slane %v1625_v20, 4  ;;  %v1619_v44 = vrot.slane %v1618_v7, 4 }
 0x193   : > { %1143 = vst.msk [vmem:[#allocation2 + $0x98] sm:$0xf] %vm1123_vm10, %v1078_v5 }
 0x194   : > { %833 = vrot.lane.b32.xlu1 %v767_v49, %s5714_s29  ;;  %v1242_v52 = vpop.permute.xlu0 %1241 }
 0x195   : > { %1310 = vst.msk [vmem:[#allocation2 + $0x80] sm:$0xf] %vm1293_vm11, %v1242_v52 }
 0x196   : > { %v1244_v55 = vpop.permute.xlu1 %1243  ;;  %835 = vrot.lane.b32.xlu0 %v777_v37, %s5714_s29  ;;  %v1604_v37 = vsel %vm5860_vm5, %v1599_v24, %v7034_v17  ;;  %v1873_v17 = vrot.slane %v1871_v12, 4 }
 0x197   : > { %1311 = vst.msk [vmem:[#allocation2 + $0x88] sm:$0xf] %vm1293_vm11, %v1244_v55  ;;  %v1628_v55 = vor.u32 %v1627_v31, %v1623_v27 }
 0x198   : > { %837 = vrot.lane.b32.xlu1 %v782_v14, %s5714_s29  ;;  %v1246_v48 = vpop.permute.xlu0 %1245  ;;  %s5723_s29 = smov 30  }
 0x199   : > { %1312 = vst.msk [vmem:[#allocation2 + $0x90] sm:$0xf] %vm1293_vm11, %v1246_v48 }
 0x19a   : > { %v1248_v6 = vpop.permute.xlu1 %1247  ;;  %1087 = vrot.lane.b32.xlu0 %v1031_v60, %s5713_s28  ;;  %v1874_v60 = vrot.slane %v1769_v10, 5 }
 0x19b   : > { %1313 = vst.msk [vmem:[#allocation2 + $0x98] sm:$0xf] %vm1293_vm11, %v1248_v6  ;;  %v1624_v6 = vsel %vm5860_vm5, %v1619_v44, %v1623_v27 }
 0x19c   : > { %1089 = vrot.lane.b32.xlu1 %v1034_v13, %s5713_s28  ;;  %v1663_v28 = vpop.permute.xlu0 %1662  ;;  %v1876_v33 = vrot.slane %v1874_v60, 4  ;;  %v1875_v12 = vsel %vm5825_vm4, %v1873_v17, %v1874_v60 }
 0x19d   : > { %1731 = vst.msk [vmem:[#allocation2 + $0x80] sm:$0xf] %vm8233_vm12, %v1663_v28  ;;  %v1877_v28 = vrot.slane %v1770_v46, 5 }
 0x19e   : > { %v1665_v62 = vpop.permute.xlu1 %1664  ;;  %1091 = vrot.lane.b32.xlu0 %v1037_v61, %s5713_s28  ;;  %v1629_v61 = vrot.slane %v1628_v55, 4 }
 0x19f   : > { %1732 = vst.msk [vmem:[#allocation2 + $0x88] sm:$0xf] %vm8233_vm12, %v1665_v62  ;;  %v1880_v62 = vrot.slane %v1771_v42, 5  ;;  %v1879_v63 = vrot.slane %v1877_v28, 4 }
 0x1a0   : > { %1093 = vrot.lane.b32.xlu1 %v1038_v30, %s5713_s28  ;;  %v1667_v32 = vpop.permute.xlu0 %1666  ;;  %v2439_v30 = vshrl.u32 %v6935_v15, 16  ;;  %v1878_v15 = vsel %vm5825_vm4, %v1876_v33, %v1877_v28  ;;  %v2614_v28 = vld [vmem:[%s5817_s26 + $0x78] sm:$0xf] }
 0x1a1   : > { %1733 = vst.msk [vmem:[#allocation2 + $0x90] sm:$0xf] %vm8233_vm12, %v1667_v32  ;;  %v1882_v27 = vrot.slane %v1880_v62, 4 }
 0x1a2   : > { %v1669_v22 = vpop.permute.xlu1 %1668  ;;  %1257 = vrot.lane.b32.xlu0 %v1177_v19, %s5712_s27  ;;  %v2193_v19 = vld [vmem:[%s5817_s26 + $0x78] sm:$0xf]  ;;  %v2441_v18 = vrot.slane %v2439_v30, 4 }
 0x1a3   : > { %1734 = vst.msk [vmem:[#allocation2 + $0x98] sm:$0xf] %vm8233_vm12, %v1669_v22  ;;  %v1881_v22 = vsel %vm5825_vm4, %v1879_v63, %v1880_v62  ;;  %v2455_v26 = vshll.u32 %v2193_v19, 16  ;;  %v2459_v24 = vshrl.u32 %v2193_v19, 16  ;;  %v2615_v63 = vld [vmem:[%s5817_s26 + $0x7c] sm:$0xf] }
 0x1a4   : > { %1259 = vrot.lane.b32.xlu1 %v1178_v21, %s5712_s27  ;;  %v5530_v8 = vpop.f32.mrb[0].mxu0  ;;  %v1916_v41 = vpop.permute.xlu0 %1915  ;;  %v2721_v19 = vrot.slane %v2614_v28, 5  ;;  %v2724_v11 = vrot.slane %v2615_v63, 5 }
 0x1a5   : > { %v3054_v34 = vadd.f32 %v5530_v8, %v7056_v25  ;;  %v3045_v23 = vpop.f32.mrb[1].mxu0  ;;  %1984 = vst.msk [vmem:[#allocation2 + $0x80] sm:$0xf] %vm1967_vm13, %v1916_v41  ;;  %v2461_v10 = vrot.slane %v2459_v24, 4 }
 0x1a6   : > { %v3046_v49 = vadd.f32 %v7056_v25, %v3045_v23  ;;  %v1918_v9 = vpop.permute.xlu1 %1917  ;;  %v5531_v5 = vpop.f32.mrb[2].mxu0  ;;  %1261 = vrot.lane.b32.xlu0 %v1179_v59, %s5712_s27  ;;  %v2451_v23 = vrot.slane %v2449_v0, 4  ;;  %v2723_v0 = vrot.slane %v2721_v19, 4  ;;  %v2726_v24 = vrot.slane %v2724_v11, 4 }
 0x1a7   : > { %vm3158_vm8 = vcmp.gt.f32.partialorder %v3054_v34, 0.0  ;;  %v3193_v51 = vmul.f32 %v7065_v53, %v3054_v34  ;;  %1985 = vst.msk [vmem:[#allocation2 + $0x88] sm:$0xf] %vm1967_vm13, %v1918_v9  ;;  %v3057_v52 = vadd.f32 %v5531_v5, %v7056_v25  ;;  %v3048_v14 = vpop.f32.mrb[3].mxu0  ;;  %v2021_v5 = vld [vmem:[%s5817_s26 + $0x70] sm:$0xf] }
 0x1a8   : > { %vm3156_vm3 = vcmp.gt.f32.partialorder %v3046_v49, 0.0  ;;  %v3191_v40 = vmul.f32 %v7065_v53, %v3046_v49  ;;  %v3049_v45 = vadd.f32 %v7056_v25, %v3048_v14  ;;  %1263 = vrot.lane.b32.xlu1 %v1180_v2, %s5712_s27  ;;  %v1920_v47 = vpop.permute.xlu0 %1919  ;;  %v2194_v2 = vld [vmem:[%s5817_s26 + $0x7c] sm:$0xf]  ;;  %s5722_s27 = smov 20  }
 0x1a9   : > { %v3221_v58 = vsel %vm3158_vm8, %v3054_v34, %v3193_v51  ;;  %vm3159_vm2 = vcmp.gt.f32.partialorder %v3057_v52, 0.0  ;;  %v3194_v54 = vmul.f32 %v7065_v53, %v3057_v52  ;;  %1986 = vst.msk [vmem:[#allocation2 + $0x90] sm:$0xf] %vm1967_vm13, %v1920_v47  ;;  %v2447_v34 = vrot.slane %v2445_v16, 5 }
 0x1aa   : > { %3250 = vst.msk [vmem:[#allocation3 + $0x10] sm:$0xff] %vm3247_vm6, %v3221_v58  ;;  %v3219_v29 = vsel %vm3156_vm3, %v3046_v49, %v3191_v40  ;;  %vm3157_vm7 = vcmp.gt.f32.partialorder %v3049_v45, 0.0  ;;  %v3192_v3 = vmul.f32 %v7065_v53, %v3049_v45  ;;  %v1922_v48 = vpop.permute.xlu1 %1921  ;;  %1678 = vrot.lane.b32.xlu0 %v1604_v37, %s5715_s30  ;;  %v2442_v37 = vor.u32 %v2441_v18, %v6955_v36  ;;  %v2022_v40 = vld [vmem:[%s5817_s26 + $0x74] sm:$0xf]  ;;  %v2023_v36 = vld [vmem:[%s5817_s26 + $0x78] sm:$0xf] }
 0x1ab   : > { %3248 = vst.msk [vmem:[#allocation3] sm:$0xff] %vm3247_vm6, %v3219_v29  ;;  %v3222_v13 = vsel %vm3159_vm2, %v3057_v52, %v3194_v54  ;;  %vm3415_vm2 = vcmask 76800   ;;  %v2465_v52 = vshll.u32 %v2194_v2, 16  ;;  %v2469_v14 = vshrl.u32 %v2194_v2, 16 }
 0x1ac   : > { %1987 = vst.msk [vmem:[#allocation2 + $0x98] sm:$0xf] %vm1967_vm13, %v1922_v48  ;;  %v3220_v38 = vsel %vm3157_vm7, %v3049_v45, %v3192_v3  ;;  %1680 = vrot.lane.b32.xlu1 %v1614_v56, %s5715_s30  ;;  %v2086_v57 = vpop.permute.xlu0 %2085  ;;  %v2457_v56 = vrot.slane %v2455_v26, 5  ;;  %v2452_v45 = vor.u32 %v2451_v23, %v2447_v34  ;;  %v2443_v55 = vrot.slane %v2442_v37, 4  ;;  %v2024_v3 = vld [vmem:[%s5817_s26 + $0x7c] sm:$0x7] }
 0x1ad   : > { %3251 = vst.msk [vmem:[#allocation3 + $0x18] sm:$0xff] %vm3247_vm6, %v3222_v13  ;;  %3249 = vst.msk [vmem:[#allocation3 + $0x8] sm:$0xff] %vm3247_vm6, %v3220_v38  ;;  %v2467_v60 = vrot.slane %v2465_v52, 5  ;;  %v2471_v29 = vrot.slane %v2469_v14, 4  ;;  %v2613_v13 = vld [vmem:[%s5817_s26 + $0x74] sm:$0xf] }
 0x1ae   : > { %2154 = vst.msk [vmem:[#allocation2 + $0x80] sm:$0xf] %vm2137_vm14, %v2086_v57  ;;  %v2088_v39 = vpop.permute.xlu1 %2087  ;;  %1682 = vrot.lane.b32.xlu0 %v1624_v6, %s5715_s30  ;;  %v2462_v58 = vor.u32 %v2461_v10, %v2457_v56  ;;  %v2453_v48 = vrot.slane %v2452_v45, 4  ;;  %v2448_v6 = vsel %vm5860_vm5, %v2443_v55, %v2447_v34  ;;  %v2718_v42 = vrot.slane %v2613_v13, 5  ;;  %s5721_s26 = smov 10  }
 0x1af   : > { %2155 = vst.msk [vmem:[#allocation2 + $0x88] sm:$0xf] %vm2137_vm14, %v2088_v39  ;;  %v2472_v57 = vor.u32 %v2471_v29, %v2467_v60 }
 0x1b0   : > { %1684 = vrot.lane.b32.xlu1 %v1629_v61, %s5715_s30  ;;  %v2090_v1 = vpop.permute.xlu0 %2089  ;;  %v2463_v17 = vrot.slane %v2462_v58, 4  ;;  %v2458_v61 = vsel %vm5860_vm5, %v2453_v48, %v2457_v56  ;;  %v2719_v50 = vsel %vm5825_vm4, %v2717_v35, %v2718_v42  ;;  %s5724_s30 = smov 40  }
 0x1b1   : > { %2156 = vst.msk [vmem:[#allocation2 + $0x90] sm:$0xf] %vm2137_vm14, %v2090_v1  ;;  %v2473_v62 = vrot.slane %v2472_v57, 4  ;;  %v2720_v1 = vrot.slane %v2718_v42, 4 }
 0x1b2   : > { %v2092_v32 = vpop.permute.xlu1 %2091  ;;  %1931 = vrot.lane.b32.xlu0 %v1875_v12, %s5716_s13  ;;  %v2468_v39 = vsel %vm5860_vm5, %v2463_v17, %v2467_v60 }
 0x1b3   : > { %2157 = vst.msk [vmem:[#allocation2 + $0x98] sm:$0xf] %vm2137_vm14, %v2092_v32  ;;  %v2722_v18 = vsel %vm5825_vm4, %v2720_v1, %v2721_v19 }
 0x1b4   : > { %v3279_v20 = vld [vmem:[#allocation3 + $0x10] ss:$2 sm:$0xff]  ;;  %v3305_v21 = vld [vmem:[#allocation3 + $0x11] ss:$2 sm:$0xff]  ;;  %v3277_v7 = vld [vmem:[#allocation3] ss:$2 sm:$0xff]  ;;  %1933 = vrot.lane.b32.xlu1 %v1878_v15, %s5716_s13  ;;  %v2507_v41 = vpop.permute.xlu0 %2506 }
 0x1b5   : > { %v7117_v59 = vmax.f32 %v3279_v20, %v3305_v21  ;;  %v3303_v8 = vld [vmem:[#allocation3 + $0x1] ss:$2 sm:$0xff]  ;;  %2575 = vst.msk [vmem:[#allocation2 + $0x80] sm:$0xf] %vm2558_vm15, %v2507_v41 }
 0x1b6   : > { %v3328_v31 = vmax.f32 %v3277_v7, %v3303_v8  ;;  %v2509_v49 = vpop.permute.xlu1 %2508  ;;  %1935 = vrot.lane.b32.xlu0 %v1881_v22, %s5716_s13  ;;  %v2725_v22 = vsel %vm5825_vm4, %v2723_v0, %v2724_v11 }
 0x1b7   : > { %2576 = vst.msk [vmem:[#allocation2 + $0x88] sm:$0xf] %vm2558_vm15, %v2509_v49 }
 0x1b8   : > { %v3349_v9 = vmax.f32 %v3328_v31, %v7117_v59  ;;  %1937 = vrot.lane.b32.xlu1 %v1882_v27, %s5716_s13  ;;  %v2511_v51 = vpop.permute.xlu0 %2510  ;;  %s5725_s13 = smov 50  }
 0x1b9   : > { %2577 = vst.msk [vmem:[#allocation2 + $0x90] sm:$0xf] %vm2558_vm15, %v2511_v51 }
 0x1ba   : > { %v5470_v44 = vpack.c.bf16 %v3349_v9, %v3349_v9  ;;  %v2513_v47 = vpop.permute.xlu1 %2512  ;;  %2101 = vrot.lane.b32.xlu0 %v2021_v5, %s5717_s14 }
 0x1bb   : > { %2578 = vst.msk [vmem:[#allocation2 + $0x98] sm:$0xf] %vm2558_vm15, %v2513_v47 }
 0x1bc   : > { %3416 = vst.msk [vmem:[#allocation4] sm:$0xf] %vm3415_vm2, %v5470_v44  ;;  %2103 = vrot.lane.b32.xlu1 %v2022_v40, %s5717_s14  ;;  %v2760_v54 = vpop.permute.xlu0 %2759 }
 0x1bd   : > { %2828 = vst.msk [vmem:[#allocation2 + $0x80] sm:$0xf] %vm2811_vm0, %v2760_v54 }
 0x1be   : > { %v2762_v46 = vpop.permute.xlu1 %2761  ;;  %2105 = vrot.lane.b32.xlu0 %v2023_v36, %s5717_s14 }
 0x1bf   : > { %2829 = vst.msk [vmem:[#allocation2 + $0x88] sm:$0xf] %vm2811_vm0, %v2762_v46 }
 0x1c0   : > { %2107 = vrot.lane.b32.xlu1 %v2024_v3, %s5717_s14  ;;  %v2764_v38 = vpop.permute.xlu0 %2763  ;;  %s5726_s14 = smov 60  }
 0x1c1   : > { %2830 = vst.msk [vmem:[#allocation2 + $0x90] sm:$0xf] %vm2811_vm0, %v2764_v38 }
 0x1c2   : > { %v2766_v33 = vpop.permute.xlu1 %2765  ;;  %2522 = vrot.lane.b32.xlu0 %v2448_v6, %s5718_s15 }
 0x1c3   : > { %v3433_v30 = vld [vmem:[#allocation4] sm:$0xf]  ;;  %2831 = vst.msk [vmem:[#allocation2 + $0x98] sm:$0xf] %vm2811_vm0, %v2766_v33 }
 0x1c4   : > { %3442 = vst.msk [vmem:[#allocation2] sm:$0xf] %vm3415_vm2, %v3433_v30  ;;  %2524 = vrot.lane.b32.xlu1 %v2458_v61, %s5718_s15  ;;  %v824_v12 = vpop.permute.xlu0 %823 }
 0x1c5   : > { %888 = vst.msk [vmem:[#allocation2 + $0xa0] sm:$0xf] %vm867_vm9, %v824_v12  ;;  %v3456_v12 = vld [vmem:[#allocation4] sm:$0xf] }
 0x1c6   : > { %v826_v15 = vpop.permute.xlu1 %825  ;;  %2526 = vrot.lane.b32.xlu0 %v2468_v39, %s5718_s15  ;;  %v5646_v16 = vld [vmem:[#allocation2 + $0x80] ss:$8 sps:$4 sm:$0xff]   ;;  %v3469_v11 = vshll.u32 %v3456_v12, 16 }
 0x1c7   : > { %889 = vst.msk [vmem:[#allocation2 + $0xa8] sm:$0xf] %vm867_vm9, %v826_v15  ;;  %5544 = vmatprep.mubr.msk.bf16.mxu0 %vm2961_vm1, %v5646_v16 }
 0x1c8   : > { %2528 = vrot.lane.b32.xlu1 %v2473_v62, %s5718_s15  ;;  %v828_v32 = vpop.permute.xlu0 %827  ;;  %s5727_s15 = smov 70  }
 0x1c9   : > { %890 = vst.msk [vmem:[#allocation2 + $0xb0] sm:$0xf] %vm867_vm9, %v828_v32 }
 0x1ca   : > { %v830_v20 = vpop.permute.xlu1 %829  ;;  %2775 = vrot.lane.b32.xlu0 %v2719_v50, %s5719_s18  ;;  %v5647_v21 = vld [vmem:[#allocation2 + $0x90] ss:$8 sps:$4 sm:$0xff]   ;;  %v3466_v50 = vshrl.u32 %v3456_v12, 16 }
 0x1cb   : > { %891 = vst.msk [vmem:[#allocation2 + $0xb8] sm:$0xf] %vm867_vm9, %v830_v20  ;;  %5545 = vmatmul.mubr.msk.bf16.gmra.mrb[16].mxu0 %vm2961_vm1, %v5647_v21 }
 0x1cc   : > { %2777 = vrot.lane.b32.xlu1 %v2722_v18, %s5719_s18  ;;  %v1080_v26 = vpop.permute.xlu0 %1079  ;;  %v3468_v32 = vrot.slane %v3466_v50, 4  ;;  %v3471_v18 = vrot.slane %v3469_v11, 5 }
 0x1cd   : > { %1144 = vst.msk [vmem:[#allocation2 + $0xa0] sm:$0xf] %vm1123_vm10, %v1080_v26 }
 0x1ce   : > { %v1082_v7 = vpop.permute.xlu1 %1081  ;;  %2779 = vrot.lane.b32.xlu0 %v2725_v22, %s5719_s18  ;;  %v3472_v22 = vor.u32 %v3471_v18, %v3468_v32 }
 0x1cf   : > { %1145 = vst.msk [vmem:[#allocation2 + $0xa8] sm:$0xf] %vm1123_vm10, %v1082_v7 }
 0x1d0   : > { %2781 = vrot.lane.b32.xlu1 %v2726_v24, %s5719_s18  ;;  %v1084_v8 = vpop.permute.xlu0 %1083  ;;  %s5735_s18 = smov 96  }
 0x1d1   : > { %1146 = vst.msk [vmem:[#allocation2 + $0xb0] sm:$0xf] %vm1123_vm10, %v1084_v8 }
 0x1d2   : > { %v1086_v41 = vpop.permute.xlu1 %1085 }
 0x1d3   : > { %1147 = vst.msk [vmem:[#allocation2 + $0xb8] sm:$0xf] %vm1123_vm10, %v1086_v41 }
 0x1d4   : > { %v1250_v27 = vpop.permute.xlu0 %1249 }
 0x1d5   : > { %1314 = vst.msk [vmem:[#allocation2 + $0xa0] sm:$0xf] %vm1293_vm11, %v1250_v27 }
 0x1d6   : > { %v1252_v31 = vpop.permute.xlu1 %1251 }
 0x1d7   : > { %1315 = vst.msk [vmem:[#allocation2 + $0xa8] sm:$0xf] %vm1293_vm11, %v1252_v31 }
 0x1d8   : > { %v1254_v34 = vpop.permute.xlu0 %1253 }
 0x1d9   : > { %1316 = vst.msk [vmem:[#allocation2 + $0xb0] sm:$0xf] %vm1293_vm11, %v1254_v34 }
 0x1da   : > { %v1256_v23 = vpop.permute.xlu1 %1255 }
 0x1db   : > { %1317 = vst.msk [vmem:[#allocation2 + $0xb8] sm:$0xf] %vm1293_vm11, %v1256_v23 }
 0x1dc   : > { %v1671_v2 = vpop.permute.xlu0 %1670 }
 0x1dd   : > { %1735 = vst.msk [vmem:[#allocation2 + $0xa0] sm:$0xf] %vm8233_vm12, %v1671_v2  ;;  %v3473_v2 = vrot.slane %v3472_v22, 4 }
 0x1de   : > { %v1673_v49 = vpop.permute.xlu1 %1672 }
 0x1df   : > { %1736 = vst.msk [vmem:[#allocation2 + $0xa8] sm:$0xf] %vm8233_vm12, %v1673_v49 }
 0x1e0   : > { %v1675_v9 = vpop.permute.xlu0 %1674 }
 0x1e1   : > { %1737 = vst.msk [vmem:[#allocation2 + $0xb0] sm:$0xf] %vm8233_vm12, %v1675_v9 }
 0x1e2   : > { %v1677_v5 = vpop.permute.xlu1 %1676  ;;  %v5534_v56 = vpop.f32.mrb[4].mxu0 }
 0x1e3   : > { %1738 = vst.msk [vmem:[#allocation2 + $0xb8] sm:$0xf] %vm8233_vm12, %v1677_v5  ;;  %v3070_v37 = vadd.f32 %v5534_v56, %v7056_v25  ;;  %v3061_v10 = vpop.f32.mrb[5].mxu0  ;;  %v3595_v56 = vld [vmem:[#allocation4] sm:$0xe] }
 0x1e4   : > { %v1924_v51 = vpop.permute.xlu0 %1923  ;;  %v3062_v52 = vadd.f32 %v7056_v25, %v3061_v10  ;;  %v5535_v14 = vpop.f32.mrb[6].mxu0 }
 0x1e5   : > { %1988 = vst.msk [vmem:[#allocation2 + $0xa0] sm:$0xf] %vm1967_vm13, %v1924_v51  ;;  %vm3162_vm7 = vcmp.gt.f32.partialorder %v3070_v37, 0.0  ;;  %v3197_v44 = vmul.f32 %v7065_v53, %v3070_v37  ;;  %v3073_v45 = vadd.f32 %v5535_v14, %v7056_v25  ;;  %v3064_v47 = vpop.f32.mrb[7].mxu0 }
 0x1e6   : > { %v1926_v40 = vpop.permute.xlu1 %1925  ;;  %vm3160_vm8 = vcmp.gt.f32.partialorder %v3062_v52, 0.0  ;;  %v3195_v36 = vmul.f32 %v7065_v53, %v3062_v52  ;;  %v3065_v55 = vadd.f32 %v7056_v25, %v3064_v47 }
 0x1e7   : > { %1989 = vst.msk [vmem:[#allocation2 + $0xa8] sm:$0xf] %vm1967_vm13, %v1926_v40  ;;  %v3225_v58 = vsel %vm3162_vm7, %v3070_v37, %v3197_v44  ;;  %vm3163_vm3 = vcmp.gt.f32.partialorder %v3073_v45, 0.0  ;;  %v3198_v54 = vmul.f32 %v7065_v53, %v3073_v45  ;;  %vm1321_vm7 = vcmask 92232  }
 0x1e8   : > { %v1928_v60 = vpop.permute.xlu0 %1927  ;;  %3254 = vst.msk [vmem:[#allocation3 + $0x30] sm:$0xff] %vm3247_vm6, %v3225_v58  ;;  %v3223_v29 = vsel %vm3160_vm8, %v3062_v52, %v3195_v36  ;;  %vm3161_vm12 = vcmp.gt.f32.partialorder %v3065_v55, 0.0  ;;  %v3196_v3 = vmul.f32 %v7065_v53, %v3065_v55  ;;  %v5408_v36 = vrot.slane %v3595_v56, 9 }
 0x1e9   : > { %1990 = vst.msk [vmem:[#allocation2 + $0xb0] sm:$0xf] %vm1967_vm13, %v1928_v60  ;;  %v3226_v48 = vsel %vm3163_vm3, %v3073_v45, %v3198_v54  ;;  %vm8241_vm8 = vcmask 117856  }
 0x1ea   : > { %3252 = vst.msk [vmem:[#allocation3 + $0x20] sm:$0xff] %vm3247_vm6, %v3223_v29  ;;  %v1930_v46 = vpop.permute.xlu1 %1929  ;;  %3255 = vst.msk [vmem:[#allocation3 + $0x38] sm:$0xff] %vm3247_vm6, %v3226_v48  ;;  %v3224_v13 = vsel %vm3161_vm12, %v3065_v55, %v3196_v3  ;;  %vm895_vm12 = vcmask 43032  }
 0x1eb   : > { %1991 = vst.msk [vmem:[#allocation2 + $0xb8] sm:$0xf] %vm1967_vm13, %v1930_v46  ;;  %vm8242_vm3 = vmmov %vm8241_vm8 }
 0x1ec   : > { %3253 = vst.msk [vmem:[#allocation3 + $0x28] sm:$0xff] %vm3247_vm6, %v3224_v13  ;;  %v2094_v6 = vpop.permute.xlu0 %2093 }
 0x1ed   : > { %2158 = vst.msk [vmem:[#allocation2 + $0xa0] sm:$0xf] %vm2137_vm14, %v2094_v6 }
 0x1ee   : > { %v2096_v17 = vpop.permute.xlu1 %2095 }
 0x1ef   : > { %2159 = vst.msk [vmem:[#allocation2 + $0xa8] sm:$0xf] %vm2137_vm14, %v2096_v17 }
 0x1f0   : > { %v2098_v38 = vpop.permute.xlu0 %2097 }
 0x1f1   : > { %2160 = vst.msk [vmem:[#allocation2 + $0xb0] sm:$0xf] %vm2137_vm14, %v2098_v38  ;;  %v3283_v57 = vld [vmem:[#allocation3 + $0x30] ss:$2 sm:$0xff]  ;;  %v3309_v61 = vld [vmem:[#allocation3 + $0x31] ss:$2 sm:$0xff] }
 0x1f2   : > { %v2100_v42 = vpop.permute.xlu1 %2099  ;;  %v7205_v33 = vmax.f32 %v3283_v57, %v3309_v61 }
 0x1f3   : > { %v3281_v28 = vld [vmem:[#allocation3 + $0x20] ss:$2 sm:$0xff]  ;;  %v3307_v30 = vld [vmem:[#allocation3 + $0x21] ss:$2 sm:$0xff]  ;;  %2161 = vst.msk [vmem:[#allocation2 + $0xb8] sm:$0xf] %vm2137_vm14, %v2100_v42 }
 0x1f4   : > { %v3330_v39 = vmax.f32 %v3281_v28, %v3307_v30  ;;  %v2515_v35 = vpop.permute.xlu0 %2514 }
 0x1f5   : > { %2579 = vst.msk [vmem:[#allocation2 + $0xa0] sm:$0xf] %vm2558_vm15, %v2515_v35 }
 0x1f6   : > { %v3350_v62 = vmax.f32 %v7117_v59, %v3330_v39  ;;  %v3351_v63 = vmax.f32 %v3330_v39, %v7205_v33  ;;  %v2517_v1 = vpop.permute.xlu1 %2516 }
 0x1f7   : > { %2580 = vst.msk [vmem:[#allocation2 + $0xa8] sm:$0xf] %vm2558_vm15, %v2517_v1 }
 0x1f8   : > { %v5471_v19 = vpack.c.bf16 %v3350_v62, %v3350_v62  ;;  %v5472_v15 = vpack.c.bf16 %v3351_v63, %v3351_v63  ;;  %v2519_v16 = vpop.permute.xlu0 %2518 }
 0x1f9   : > { %2581 = vst.msk [vmem:[#allocation2 + $0xb0] sm:$0xf] %vm2558_vm15, %v2519_v16 }
 0x1fa   : > { %3417 = vst.msk [vmem:[#allocation4 + $0x4] sm:$0xf] %vm3415_vm2, %v5471_v19  ;;  %3418 = vst.msk [vmem:[#allocation4 + $0x8] sm:$0xf] %vm3415_vm2, %v5472_v15  ;;  %v2521_v0 = vpop.permute.xlu1 %2520 }
 0x1fb   : > { %2582 = vst.msk [vmem:[#allocation2 + $0xb8] sm:$0xf] %vm2558_vm15, %v2521_v0 }
 0x1fc   : > { %v2768_v59 = vpop.permute.xlu0 %2767 }
 0x1fd   : > { %2832 = vst.msk [vmem:[#allocation2 + $0xa0] sm:$0xf] %vm2811_vm0, %v2768_v59 }
 0x1fe   : > { %v2770_v20 = vpop.permute.xlu1 %2769 }
 0x1ff   : > { %2833 = vst.msk [vmem:[#allocation2 + $0xa8] sm:$0xf] %vm2811_vm0, %v2770_v20 }
 0x200   : > { %v2772_v21 = vpop.permute.xlu0 %2771 }
 0x201   : > { %2834 = vst.msk [vmem:[#allocation2 + $0xb0] sm:$0xf] %vm2811_vm0, %v2772_v21  ;;  %v3457_v26 = vld [vmem:[#allocation4 + $0x4] sm:$0xf]  ;;  %v3458_v24 = vld [vmem:[#allocation4 + $0x8] sm:$0xf] }
 0x202   : > { %v2774_v7 = vpop.permute.xlu1 %2773  ;;  %v3475_v8 = vshll.u32 %v3457_v26, 16  ;;  %v3479_v41 = vshrl.u32 %v3457_v26, 16  ;;  %v3485_v27 = vshll.u32 %v3458_v24, 16  ;;  %v3489_v31 = vshrl.u32 %v3458_v24, 16  ;;  %v3596_v34 = vld [vmem:[#allocation4 + $0x4] sm:$0xf] }
 0x203   : > { %2835 = vst.msk [vmem:[#allocation2 + $0xb8] sm:$0xf] %vm2811_vm0, %v2774_v7  ;;  %v3434_v37 = vld [vmem:[#allocation4 + $0x4] sm:$0xf]  ;;  %v3615_v44 = vrot.slane %v3596_v34, 5 }
 0x204   : > { %v832_v23 = vpop.permute.xlu0 %831  ;;  %v3477_v49 = vrot.slane %v3475_v8, 5  ;;  %v3481_v9 = vrot.slane %v3479_v41, 4  ;;  %v7221_v5 = vrot.slane %v3485_v27, 5  ;;  %3443 = vst.msk [vmem:[#allocation2 + $0x8] sm:$0xf] %vm3415_vm2, %v3434_v37  ;;  %v7228_v40 = vrot.slane %v3489_v31, 4 }
 0x205   : > { %892 = vst.msk [vmem:[#allocation2 + $0xc0] sm:$0xf] %vm867_vm9, %v832_v23  ;;  %v3435_v55 = vld [vmem:[#allocation4 + $0x8] sm:$0xf]  ;;  %v3616_v3 = vsel %vm5825_vm4, %v5408_v36, %v3615_v44  ;;  %v3617_v46 = vrot.slane %v3615_v44, 4 }
 0x206   : > { %v834_v10 = vpop.permute.xlu1 %833  ;;  %v3478_v51 = vsel %vm5860_vm5, %v3473_v2, %v3477_v49  ;;  %v5648_v52 = vld [vmem:[#allocation2 + $0xa0] ss:$8 sps:$4 sm:$0xff]   ;;  %v3482_v14 = vor.u32 %v3481_v9, %v3477_v49  ;;  %v3492_v54 = vor.u32 %v7228_v40, %v7221_v5  ;;  %3444 = vst.msk [vmem:[#allocation2 + $0x10] sm:$0xf] %vm3415_vm2, %v3435_v55 }
 0x207   : > { %893 = vst.msk [vmem:[#allocation2 + $0xc8] sm:$0xf] %vm867_vm9, %v834_v10  ;;  %3554 = vrot.lane.b32.xlu0 %v3478_v51, %s5721_s26  ;;  %5548 = vmatprep.mubr.msk.bf16.mxu0 %vm2961_vm1, %v5648_v52  ;;  %v7232_v58 = vld [vmem:[#allocation4 + $0x8] sm:$0xf] }
 0x208   : > { %v836_v45 = vpop.permute.xlu0 %835  ;;  %v3483_v47 = vrot.slane %v3482_v14, 4  ;;  %v3618_v6 = vrot.slane %v7232_v58, 5  ;;  %v3680_v57 = vld [vmem:[#allocation4 + $0x8] sm:$0xf] }
 0x209   : > { %894 = vst.msk [vmem:[#allocation2 + $0xd0] sm:$0xf] %vm867_vm9, %v836_v45  ;;  %vm1151_vm9 = vcmask 67632   ;;  %v3739_v45 = vld [vmem:[#allocation4 + $0x8] sm:$0xf] }
 0x20a   : > { %v838_v60 = vpop.permute.xlu1 %837  ;;  %v3488_v29 = vsel %vm5860_vm5, %v3483_v47, %v7221_v5  ;;  %v5649_v48 = vld [vmem:[#allocation2 + $0xb0] ss:$8 sps:$4 sm:$0xff]   ;;  %v3619_v38 = vsel %vm5825_vm4, %v3617_v46, %v3618_v6  ;;  %v3752_v46 = vshll.u32 %v3739_v45, 16  ;;  %v3620_v40 = vrot.slane %v3618_v6, 4 }
 0x20b   : > { %896 = vst.msk [vmem:[#allocation2 + $0xd8] sm:$0x7] %vm895_vm12, %v838_v60  ;;  %3556 = vrot.lane.b32.xlu1 %v3488_v29, %s5721_s26  ;;  %3639 = vrot.lane.b32.xlu0 %v3616_v3, %s5722_s27  ;;  %vm8243_vm12 = vmmov %vm8242_vm3 }
 0x20c   : > { %5549 = vmatmul.mubr.msk.bf16.gmra.mrb[20].mxu0 %vm2961_vm1, %v5649_v48  ;;  %v1088_v13 = vpop.permute.xlu0 %1087  ;;  %v3749_v48 = vshrl.u32 %v3739_v45, 16 }
 0x20d   : > { %1148 = vst.msk [vmem:[#allocation2 + $0xc0] sm:$0xf] %vm1123_vm10, %v1088_v13 }
 0x20e   : > { %v1090_v17 = vpop.permute.xlu1 %1089 }
 0x20f   : > { %1149 = vst.msk [vmem:[#allocation2 + $0xc8] sm:$0xf] %vm1123_vm10, %v1090_v17  ;;  %3641 = vrot.lane.b32.xlu1 %v3619_v38, %s5722_s27  ;;  %3698 = vrot.lane.b32.xlu0 %v3680_v57, %s5723_s29  ;;  %v3751_v38 = vrot.slane %v3749_v48, 4  ;;  %v3754_v57 = vrot.slane %v3752_v46, 5 }
 0x210   : > { %v1092_v61 = vpop.permute.xlu0 %1091 }
 0x211   : > { %1150 = vst.msk [vmem:[#allocation2 + $0xd0] sm:$0xf] %vm1123_vm10, %v1092_v61  ;;  %vm1742_vm10 = vcmask 116832  }
 0x212   : > { %v1094_v42 = vpop.permute.xlu1 %1093 }
 0x213   : > { %1152 = vst.msk [vmem:[#allocation2 + $0xd8] sm:$0x7] %vm1151_vm9, %v1094_v42  ;;  %v3755_v42 = vor.u32 %v3754_v57, %v3751_v38 }
 0x214   : > { %v1258_v28 = vpop.permute.xlu0 %1257 }
 0x215   : > { %1318 = vst.msk [vmem:[#allocation2 + $0xc0] sm:$0xf] %vm1293_vm11, %v1258_v28 }
 0x216   : > { %v1260_v30 = vpop.permute.xlu1 %1259 }
 0x217   : > { %1319 = vst.msk [vmem:[#allocation2 + $0xc8] sm:$0xf] %vm1293_vm11, %v1260_v30 }
 0x218   : > { %v1262_v39 = vpop.permute.xlu0 %1261 }
 0x219   : > { %1320 = vst.msk [vmem:[#allocation2 + $0xd0] sm:$0xf] %vm1293_vm11, %v1262_v39 }
 0x21a   : > { %v1264_v35 = vpop.permute.xlu1 %1263 }
 0x21b   : > { %1322 = vst.msk [vmem:[#allocation2 + $0xd8] sm:$0x7] %vm1321_vm7, %v1264_v35 }
 0x21c   : > { %v1679_v12 = vpop.permute.xlu0 %1678 }
 0x21d   : > { %1739 = vst.msk [vmem:[#allocation2 + $0xc0] sm:$0xf] %vm8241_vm8, %v1679_v12  ;;  %vm1995_vm8 = vcmask 141432  }
 0x21e   : > { %v1681_v62 = vpop.permute.xlu1 %1680 }
 0x21f   : > { %1740 = vst.msk [vmem:[#allocation2 + $0xc8] sm:$0xf] %vm8242_vm3, %v1681_v62 }
 0x220   : > { %v1683_v63 = vpop.permute.xlu0 %1682 }
 0x221   : > { %1741 = vst.msk [vmem:[#allocation2 + $0xd0] sm:$0xf] %vm8243_vm12, %v1683_v63 }
 0x222   : > { %v1685_v1 = vpop.permute.xlu1 %1684  ;;  %v5538_v19 = vpop.f32.mrb[8].mxu0 }
 0x223   : > { %1743 = vst.msk [vmem:[#allocation2 + $0xd8] sm:$0x7] %vm1742_vm10, %v1685_v1  ;;  %v3086_v15 = vadd.f32 %v5538_v19, %v7056_v25  ;;  %v3077_v16 = vpop.f32.mrb[9].mxu0  ;;  %vm2165_vm10 = vcmask 166032  }
 0x224   : > { %v1932_v50 = vpop.permute.xlu0 %1931  ;;  %v3078_v11 = vadd.f32 %v7056_v25, %v3077_v16  ;;  %v5539_v0 = vpop.f32.mrb[10].mxu0 }
 0x225   : > { %1992 = vst.msk [vmem:[#allocation2 + $0xc0] sm:$0xf] %vm1967_vm13, %v1932_v50  ;;  %vm3166_vm11 = vcmp.gt.f32.partialorder %v3086_v15, 0.0  ;;  %v3201_v59 = vmul.f32 %v7065_v53, %v3086_v15  ;;  %v3089_v18 = vadd.f32 %v5539_v0, %v7056_v25  ;;  %v3080_v20 = vpop.f32.mrb[11].mxu0  ;;  %v3878_v0 = vld [vmem:[#allocation4 + $0x8] sm:$0xe] }
 0x226   : > { %v1934_v32 = vpop.permute.xlu1 %1933  ;;  %vm3164_vm9 = vcmp.gt.f32.partialorder %v3078_v11, 0.0  ;;  %v3199_v21 = vmul.f32 %v7065_v53, %v3078_v11  ;;  %v3081_v22 = vadd.f32 %v7056_v25, %v3080_v20 }
 0x227   : > { %1993 = vst.msk [vmem:[#allocation2 + $0xc8] sm:$0xf] %vm1967_vm13, %v1934_v32  ;;  %v3229_v26 = vsel %vm3166_vm11, %v3086_v15, %v3201_v59  ;;  %vm3167_vm7 = vcmp.gt.f32.partialorder %v3089_v18, 0.0  ;;  %v3202_v24 = vmul.f32 %v7065_v53, %v3089_v18  ;;  %v3756_v15 = vrot.slane %v3755_v42, 4 }
 0x228   : > { %v1936_v7 = vpop.permute.xlu0 %1935  ;;  %3258 = vst.msk [vmem:[#allocation3 + $0x50] sm:$0xff] %vm3247_vm6, %v3229_v26  ;;  %v3227_v8 = vsel %vm3164_vm9, %v3078_v11, %v3199_v21  ;;  %vm3165_vm3 = vcmp.gt.f32.partialorder %v3081_v22, 0.0  ;;  %v3200_v41 = vmul.f32 %v7065_v53, %v3081_v22  ;;  %vm3581_vm11 = vcmask 158800  }
 0x229   : > { %1994 = vst.msk [vmem:[#allocation2 + $0xd0] sm:$0xf] %vm1967_vm13, %v1936_v7  ;;  %v3230_v27 = vsel %vm3167_vm7, %v3089_v18, %v3202_v24  ;;  %vm2586_vm13 = vcmask 190632   ;;  %v5409_v24 = vrot.slane %v3878_v0, 9  ;;  %vm3666_vm9 = vcmask 240800  }
 0x22a   : > { %3256 = vst.msk [vmem:[#allocation3 + $0x40] sm:$0xff] %vm3247_vm6, %v3227_v8  ;;  %v1938_v31 = vpop.permute.xlu1 %1937  ;;  %3259 = vst.msk [vmem:[#allocation3 + $0x58] sm:$0xff] %vm3247_vm6, %v3230_v27  ;;  %v3228_v34 = vsel %vm3165_vm3, %v3081_v22, %v3200_v41  ;;  %vm3725_vm7 = vcmask 322800  }
 0x22b   : > { %1996 = vst.msk [vmem:[#allocation2 + $0xd8] sm:$0x7] %vm1995_vm8, %v1938_v31 }
 0x22c   : > { %3257 = vst.msk [vmem:[#allocation3 + $0x48] sm:$0xff] %vm3247_vm6, %v3228_v34  ;;  %v2102_v23 = vpop.permute.xlu0 %2101 }
 0x22d   : > { %2162 = vst.msk [vmem:[#allocation2 + $0xc0] sm:$0xf] %vm2137_vm14, %v2102_v23 }
 0x22e   : > { %v2104_v2 = vpop.permute.xlu1 %2103 }
 0x22f   : > { %2163 = vst.msk [vmem:[#allocation2 + $0xc8] sm:$0xf] %vm2137_vm14, %v2104_v2 }
 0x230   : > { %v2106_v49 = vpop.permute.xlu0 %2105 }
 0x231   : > { %2164 = vst.msk [vmem:[#allocation2 + $0xd0] sm:$0xf] %vm2137_vm14, %v2106_v49  ;;  %v3287_v9 = vld [vmem:[#allocation3 + $0x50] ss:$2 sm:$0xff]  ;;  %v3313_v56 = vld [vmem:[#allocation3 + $0x51] ss:$2 sm:$0xff] }
 0x232   : > { %v2108_v37 = vpop.permute.xlu1 %2107  ;;  %v7280_v10 = vmax.f32 %v3287_v9, %v3313_v56  ;;  %vm2839_vm14 = vcmask 215232  }
 0x233   : > { %v3285_v51 = vld [vmem:[#allocation3 + $0x40] ss:$2 sm:$0xff]  ;;  %v3311_v52 = vld [vmem:[#allocation3 + $0x41] ss:$2 sm:$0xff]  ;;  %2166 = vst.msk [vmem:[#allocation2 + $0xd8] sm:$0x7] %vm2165_vm10, %v2108_v37 }
 0x234   : > { %v3332_v14 = vmax.f32 %v3285_v51, %v3311_v52  ;;  %v2523_v44 = vpop.permute.xlu0 %2522 }
 0x235   : > { %2583 = vst.msk [vmem:[#allocation2 + $0xc0] sm:$0xf] %vm2558_vm15, %v2523_v44 }
 0x236   : > { %v3353_v47 = vmax.f32 %v3332_v14, %v7280_v10  ;;  %v2525_v36 = vpop.permute.xlu1 %2524  ;;  %v3352_v55 = vmax.f32 %v7205_v33, %v3332_v14 }
 0x237   : > { %2584 = vst.msk [vmem:[#allocation2 + $0xc8] sm:$0xf] %vm2558_vm15, %v2525_v36 }
 0x238   : > { %v5474_v60 = vpack.c.bf16 %v3353_v47, %v3353_v47  ;;  %v2527_v29 = vpop.permute.xlu0 %2526  ;;  %v5473_v3 = vpack.c.bf16 %v3352_v55, %v3352_v55 }
 0x239   : > { %2585 = vst.msk [vmem:[#allocation2 + $0xd0] sm:$0xf] %vm2558_vm15, %v2527_v29 }
 0x23a   : > { %3420 = vst.msk [vmem:[#allocation4 + $0x10] sm:$0xf] %vm3415_vm2, %v5474_v60  ;;  %v2529_v13 = vpop.permute.xlu1 %2528  ;;  %3419 = vst.msk [vmem:[#allocation4 + $0xc] sm:$0xf] %vm3415_vm2, %v5473_v3 }
 0x23b   : > { %2587 = vst.msk [vmem:[#allocation2 + $0xd8] sm:$0x7] %vm2586_vm13, %v2529_v13 }
 0x23c   : > { %v2776_v17 = vpop.permute.xlu0 %2775 }
 0x23d   : > { %2836 = vst.msk [vmem:[#allocation2 + $0xc0] sm:$0xf] %vm2811_vm0, %v2776_v17 }
 0x23e   : > { %v2778_v33 = vpop.permute.xlu1 %2777 }
 0x23f   : > { %2837 = vst.msk [vmem:[#allocation2 + $0xc8] sm:$0xf] %vm2811_vm0, %v2778_v33 }
 0x240   : > { %v2780_v61 = vpop.permute.xlu0 %2779 }
 0x241   : > { %2838 = vst.msk [vmem:[#allocation2 + $0xd0] sm:$0xf] %vm2811_vm0, %v2780_v61  ;;  %v3681_v28 = vld [vmem:[#allocation4 + $0xc] sm:$0xf]  ;;  %v3741_v39 = vld [vmem:[#allocation4 + $0x10] sm:$0xf] }
 0x242   : > { %v3740_v30 = vld [vmem:[#allocation4 + $0xc] sm:$0xf]  ;;  %v2782_v35 = vpop.permute.xlu1 %2781  ;;  %3700 = vrot.lane.b32.xlu1 %v3681_v28, %s5723_s29  ;;  %v3768_v63 = vshll.u32 %v3741_v39, 16  ;;  %v3772_v1 = vshrl.u32 %v3741_v39, 16  ;;  %v7303_v7 = vld [vmem:[#allocation4 + $0x10] sm:$0xf] }
 0x243   : > { %v3758_v12 = vshll.u32 %v3740_v30, 16  ;;  %v3762_v62 = vshrl.u32 %v3740_v30, 16  ;;  %2840 = vst.msk [vmem:[#allocation2 + $0xd8] sm:$0x7] %vm2839_vm14, %v2782_v35  ;;  %v3879_v19 = vld [vmem:[#allocation4 + $0xc] sm:$0xf] }
 0x244   : > { %v7293_v11 = vrot.slane %v3768_v63, 5  ;;  %v7295_v59 = vrot.slane %v3772_v1, 4  ;;  %v3898_v21 = vrot.slane %v3879_v19, 5  ;;  %v3901_v34 = vrot.slane %v7303_v7, 5  ;;  %v3436_v23 = vld [vmem:[#allocation4 + $0xc] sm:$0xf] }
 0x245   : > { %v3760_v16 = vrot.slane %v3758_v12, 5  ;;  %v3764_v50 = vrot.slane %v3762_v62, 4  ;;  %3445 = vst.msk [vmem:[#allocation2 + $0x18] sm:$0xf] %vm3415_vm2, %v3436_v23  ;;  %v3437_v2 = vld [vmem:[#allocation4 + $0x10] sm:$0xf] }
 0x246   : > { %v5650_v18 = vld [vmem:[#allocation2 + $0xc0] ss:$8 sps:$4 sm:$0xff]   ;;  %v3775_v22 = vor.u32 %v7295_v59, %v7293_v11  ;;  %v3899_v41 = vsel %vm5825_vm4, %v5409_v24, %v3898_v21  ;;  %v3900_v31 = vrot.slane %v3898_v21, 4  ;;  %v3963_v9 = vld [vmem:[#allocation4 + $0x10] sm:$0xf]  ;;  %vm8236_vm14 = vcmask 404800  }
 0x247   : > { %v3761_v32 = vsel %vm5860_vm5, %v3756_v15, %v3760_v16  ;;  %v3765_v20 = vor.u32 %v3764_v50, %v3760_v16  ;;  %5552 = vmatprep.mubr.msk.bf16.mxu0 %vm2961_vm1, %v5650_v18  ;;  %3446 = vst.msk [vmem:[#allocation2 + $0x20] sm:$0xf] %vm3415_vm2, %v3437_v2  ;;  %v4022_v42 = vld [vmem:[#allocation4 + $0x10] sm:$0xf]  ;;  %v7351_v21 = vld [vmem:[#allocation4 + $0xc] sm:$0xf] }
 0x248   : > { %3837 = vrot.lane.b32.xlu0 %v3761_v32, %s5724_s30  ;;  %v3902_v49 = vsel %vm5825_vm4, %v3900_v31, %v3901_v34  ;;  %v4032_v39 = vshrl.u32 %v4022_v42, 16  ;;  %v4035_v35 = vshll.u32 %v4022_v42, 16  ;;  %v3495_v31 = vshll.u32 %v7351_v21, 16 }
 0x249   : > { %v3766_v26 = vrot.slane %v3765_v20, 4  ;;  %v3776_v58 = vrot.slane %v3775_v22, 4 }
 0x24a   : > { %v5651_v27 = vld [vmem:[#allocation2 + $0xd0] ss:$8 sps:$4 sm:$0x7f]   ;;  %v4034_v63 = vrot.slane %v4032_v39, 4  ;;  %v4037_v1 = vrot.slane %v4035_v35, 5 }
 0x24b   : > { %v3771_v8 = vsel %vm5860_vm5, %v3766_v26, %v7293_v11  ;;  %5553 = vmatmul.mubr.msk.bf16.gmra.mrb[24].mxu0 %vm2961_vm1, %v5651_v27  ;;  %v7419_v11 = vld [vmem:[%s8220_s2] ss:$0 sm:$0xff] }
 0x24c   : > { %3839 = vrot.lane.b32.xlu1 %v3771_v8, %s5724_s30  ;;  %3922 = vrot.lane.b32.xlu0 %v3899_v41, %s5725_s13  ;;  %v4161_v8 = vld [vmem:[#allocation4 + $0x10] sm:$0xe] }
 0x24d   : > { %v5410_v2 = vrot.slane %v4161_v8, 9 }
 0x250   : > { %3924 = vrot.lane.b32.xlu1 %v3902_v49, %s5725_s13  ;;  %3981 = vrot.lane.b32.xlu0 %v3963_v9, %s5726_s14 }
 0x262   : > { %v5542_v56 = vpop.f32.mrb[12].mxu0 }
 0x263   : > { %v3102_v37 = vadd.f32 %v5542_v56, %v7056_v25  ;;  %v3093_v51 = vpop.f32.mrb[13].mxu0  ;;  %v7365_v56 = vrot.slane %v3495_v31, 5 }
 0x264   : > { %v3094_v52 = vadd.f32 %v7056_v25, %v3093_v51  ;;  %v5543_v14 = vpop.f32.mrb[14].mxu0 }
 0x265   : > { %vm3170_vm15 = vcmp.gt.f32.partialorder %v3102_v37, 0.0  ;;  %v3205_v44 = vmul.f32 %v7065_v53, %v3102_v37  ;;  %v3105_v45 = vadd.f32 %v5543_v14, %v7056_v25  ;;  %v3096_v47 = vpop.f32.mrb[15].mxu0 }
 0x266   : > { %vm3168_vm0 = vcmp.gt.f32.partialorder %v3094_v52, 0.0  ;;  %v3203_v36 = vmul.f32 %v7065_v53, %v3094_v52  ;;  %v3097_v55 = vadd.f32 %v7056_v25, %v3096_v47 }
 0x267   : > { %v3233_v60 = vsel %vm3170_vm15, %v3102_v37, %v3205_v44  ;;  %vm3171_vm1 = vcmp.gt.f32.partialorder %v3105_v45, 0.0  ;;  %v3206_v29 = vmul.f32 %v7065_v53, %v3105_v45  ;;  %v7368_v37 = vld [vmem:[#allocation4 + $0xc] sm:$0xf]  ;;  %vm8235_vm15 = vcmask 486800  }
 0x268   : > { %3262 = vst.msk [vmem:[#allocation3 + $0x70] sm:$0xff] %vm3247_vm6, %v3233_v60  ;;  %v3231_v3 = vsel %vm3168_vm0, %v3094_v52, %v3203_v36  ;;  %vm3169_vm12 = vcmp.gt.f32.partialorder %v3097_v55, 0.0  ;;  %v3204_v48 = vmul.f32 %v7065_v53, %v3097_v55  ;;  %v3493_v52 = vrot.slane %v3492_v54, 4 }
 0x269   : > { %3260 = vst.msk [vmem:[#allocation3 + $0x60] sm:$0xff] %vm3247_vm6, %v3231_v3  ;;  %v3234_v46 = vsel %vm3171_vm1, %v3105_v45, %v3206_v29  ;;  %v3621_v36 = vrot.slane %v7368_v37, 5  ;;  %v3682_v3 = vld [vmem:[#allocation4 + $0x10] sm:$0xf]  ;;  %vm8234_vm0 = vcmask 568800   ;;  %vm3450_vm1 = vcmask 75776  }
 0x26a   : > { %3263 = vst.msk [vmem:[#allocation3 + $0x78] sm:$0xff] %vm3247_vm6, %v3234_v46  ;;  %v3232_v13 = vsel %vm3169_vm12, %v3097_v55, %v3204_v48  ;;  %v3498_v47 = vsel %vm5860_vm5, %v3493_v52, %v7365_v56  ;;  %v5729_v52 = vmov 0.0   ;;  %vm3451_vm12 = vsmask.f32 2304 }
 0x26b   : > { %3261 = vst.msk [vmem:[#allocation3 + $0x68] sm:$0xff] %vm3247_vm6, %v3232_v13  ;;  %v3622_v60 = vsel %vm5825_vm4, %v3620_v40, %v3621_v36  ;;  %5556 = vmatprep.subr.bf16.mxu1 %v5729_v52 }
 0x271   : > { %v3291_v17 = vld [vmem:[#allocation3 + $0x70] ss:$2 sm:$0xff]  ;;  %v3317_v25 = vld [vmem:[#allocation3 + $0x71] ss:$2 sm:$0xff] }
 0x272   : > { %v7334_v38 = vmax.f32 %v3291_v17, %v3317_v25  ;;  %v3289_v57 = vld [vmem:[#allocation3 + $0x60] ss:$2 sm:$0xff]  ;;  %v3315_v33 = vld [vmem:[#allocation3 + $0x61] ss:$2 sm:$0xff]  ;;  %v3903_v17 = vrot.slane %v3901_v34, 4 }
 0x273   : > { %v3334_v61 = vmax.f32 %v3289_v57, %v3315_v33  ;;  %v7426_v34 = vld [vmem:[%s8221_s3] ss:$0 sm:$0xff] }
 0x275   : > { %v3354_v28 = vmax.f32 %v7280_v10, %v3334_v61  ;;  %v3355_v53 = vmax.f32 %v3334_v61, %v7334_v38  ;;  %v4038_v10 = vor.u32 %v4037_v1, %v4034_v63 }
 0x277   : > { %v5475_v30 = vpack.c.bf16 %v3354_v28, %v3354_v28  ;;  %v5476_v12 = vpack.c.bf16 %v3355_v53, %v3355_v53  ;;  %v4039_v26 = vrot.slane %v4038_v10, 4 }
 0x279   : > { %v3555_v62 = vpop.permute.xlu0 %3554  ;;  %3421 = vst.msk [vmem:[#allocation4 + $0x14] sm:$0xf] %vm3415_vm2, %v5475_v30  ;;  %3422 = vst.msk [vmem:[#allocation4 + $0x18] sm:$0xf] %vm3415_vm2, %v5476_v12 }
 0x27a   : > { %3582 = vst.msk [vmem:[#allocation2] sm:$0xf] %vm3581_vm11, %v3555_v62 }
 0x27d   : > { %v3557_v19 = vpop.permute.xlu1 %3556  ;;  %v3640_v15 = vpop.permute.xlu0 %3639 }
 0x27e   : > { %3583 = vst.msk [vmem:[#allocation2 + $0x8] sm:$0xf] %vm3581_vm11, %v3557_v19 }
 0x27f   : > { %3667 = vst.msk [vmem:[#allocation2] sm:$0xf] %vm3666_vm9, %v3640_v15 }
 0x280   : > { %v3964_v0 = vld [vmem:[#allocation4 + $0x14] sm:$0xf]  ;;  %v3462_v23 = vld [vmem:[#allocation4 + $0x18] sm:$0xf] }
 0x281   : > { %v3642_v16 = vpop.permute.xlu1 %3641  ;;  %v3699_v50 = vpop.permute.xlu0 %3698  ;;  %v7343_v32 = vld [vmem:[#allocation4 + $0x14] sm:$0xf]  ;;  %3983 = vrot.lane.b32.xlu1 %v3964_v0, %s5726_s14  ;;  %v3525_v49 = vshll.u32 %v3462_v23, 16  ;;  %v3529_v51 = vshrl.u32 %v3462_v23, 16  ;;  %v3439_v45 = vld [vmem:[#allocation4 + $0x18] sm:$0xf] }
 0x282   : > { %3668 = vst.msk [vmem:[#allocation2 + $0x8] sm:$0xf] %vm3666_vm9, %v3642_v16  ;;  %v4041_v18 = vshll.u32 %v7343_v32, 16  ;;  %v7349_v20 = vld [vmem:[#allocation4 + $0x14] sm:$0xf] }
 0x283   : > { %3726 = vst.msk [vmem:[#allocation2] sm:$0xf] %vm3725_vm7, %v3699_v50  ;;  %v4181_v27 = vrot.slane %v7349_v20, 5  ;;  %v7373_v14 = vrot.slane %v3525_v49, 5  ;;  %v3438_v44 = vld [vmem:[#allocation4 + $0x14] sm:$0xf] }
 0x284   : > { %v7353_v24 = vrot.slane %v4041_v18, 5  ;;  %3447 = vst.msk [vmem:[#allocation2 + $0x28] sm:$0xf] %vm3415_vm2, %v3438_v44  ;;  %3448 = vst.msk [vmem:[#allocation2 + $0x30] sm:$0xf] %vm3415_vm2, %v3439_v45  ;;  %v7384_v5 = vrot.slane %v3529_v51, 4 }
 0x285   : > { %v4182_v9 = vsel %vm5825_vm4, %v5410_v2, %v4181_v27  ;;  %v7382_v55 = vld [vmem:[#allocation4 + $0x14] sm:$0xf]  ;;  %v3965_v53 = vld [vmem:[#allocation4 + $0x18] sm:$0xf]  ;;  %v5652_v51 = vld [vmem:[%s8222_s4] sm:$0xff]  }
 0x286   : > { %v4044_v41 = vsel %vm5860_vm5, %v4039_v26, %v7353_v24  ;;  %v3532_v54 = vor.u32 %v7384_v5, %v7373_v14  ;;  %v3778_v29 = vshll.u32 %v7382_v55, 16  ;;  %v7399_v46 = vld [vmem:[#allocation4 + $0x14] sm:$0xf]  ;;  %v4024_v26 = vld [vmem:[#allocation4 + $0x18] sm:$0xf]  ;;  %5557 = vmatpush3.bf16.msra.mxu1 %v5652_v51  ;;  %v5656_v20 = vld [vmem:[%s8222_s4 + $0x20] sm:$0xff]  }
 0x287   : > { %4120 = vrot.lane.b32.xlu1 %v4044_v41, %s5727_s15  ;;  %v3904_v13 = vrot.slane %v7399_v46, 5  ;;  %v4051_v31 = vshll.u32 %v4024_v26, 16  ;;  %5558 = vmatprep.subr.bf16.mxu1 %v5729_v52  ;;  %v7587_v37 = vld [vmem:[#allocation4 + $0x18] sm:$0xf] }
 0x288   : > { %v7396_v48 = vrot.slane %v3778_v29, 5 }
 0x289   : > { %v3905_v25 = vsel %vm5825_vm4, %v3903_v17, %v3904_v13  ;;  %v7454_v44 = vrot.slane %v4051_v31, 5 }
 0x28a   : > { %v3781_v6 = vsel %vm5860_vm5, %v3776_v58, %v7396_v48 }
 0x28b   : > { %4205 = vrot.lane.b32.xlu1 %v4182_v9, %s5728_s16  ;;  %v4055_v9 = vshrl.u32 %v4024_v26, 16 }
 0x28d   : > { %v4057_v45 = vrot.slane %v4055_v9, 4 }
 0x28f   : > { %3558 = vrot.lane.b32.xlu1 %v3498_v47, %s5721_s26  ;;  %v4045_v47 = vshrl.u32 %v7343_v32, 16  ;;  %v4058_v29 = vor.u32 %v4057_v45, %v7454_v44 }
 0x293   : > { %3643 = vrot.lane.b32.xlu1 %v3622_v60, %s5722_s27  ;;  %v3461_v60 = vld [vmem:[#allocation4 + $0x14] sm:$0xf] }
 0x297   : > { %3702 = vrot.lane.b32.xlu1 %v3682_v3, %s5723_s29 }
 0x29b   : > { %3841 = vrot.lane.b32.xlu1 %v3781_v6, %s5724_s30 }
 0x29e   : > { %v5546_v57 = vpop.f32.mrb[16].mxu0 }
 0x29f   : > { %3926 = vrot.lane.b32.xlu1 %v3905_v25, %s5725_s13  ;;  %v3118_v59 = vadd.f32 %v7419_v11, %v5546_v57  ;;  %v3109_v22 = vpop.f32.mrb[17].mxu0  ;;  %v4047_v25 = vrot.slane %v4045_v47, 4  ;;  %v3515_v57 = vshll.u32 %v3461_v60, 16 }
 0x2a0   : > { %v3110_v33 = vadd.f32 %v7419_v11, %v3109_v22  ;;  %v5547_v7 = vpop.f32.mrb[18].mxu0 }
 0x2a1   : > { %vm3174_vm8 = vcmp.gt.f32.partialorder %v3118_v59, 0.0  ;;  %v3209_v61 = vmul.f32 %v7426_v34, %v3118_v59  ;;  %v3121_v42 = vadd.f32 %v7419_v11, %v5547_v7  ;;  %v3112_v28 = vpop.f32.mrb[19].mxu0  ;;  %v3519_v7 = vshrl.u32 %v3461_v60, 16  ;;  %v7509_v60 = vld [vmem:[#allocation4 + $0x18] sm:$0xf] }
 0x2a2   : > { %vm3172_vm3 = vcmp.gt.f32.partialorder %v3110_v33, 0.0  ;;  %v3207_v30 = vmul.f32 %v7426_v34, %v3110_v33  ;;  %v3113_v39 = vadd.f32 %v7419_v11, %v3112_v28  ;;  %v4059_v28 = vrot.slane %v4058_v29, 4 }
 0x2a3   : > { %3985 = vrot.lane.b32.xlu1 %v3965_v53, %s5726_s14  ;;  %v3237_v35 = vsel %vm3174_vm8, %v3118_v59, %v3209_v61  ;;  %vm3175_vm10 = vcmp.gt.f32.partialorder %v3121_v42, 0.0  ;;  %v3210_v12 = vmul.f32 %v7426_v34, %v3121_v42  ;;  %v3499_v61 = vshrl.u32 %v7351_v21, 16  ;;  %vm7517_vm8 = vmand %vm3450_vm1, %vm3451_vm12 }
 0x2a4   : > { %3266 = vst.msk [vmem:[#allocation3 + $0x90] sm:$0xff] %vm3247_vm6, %v3237_v35  ;;  %v3235_v62 = vsel %vm3172_vm3, %v3110_v33, %v3207_v30  ;;  %vm3173_vm13 = vcmp.gt.f32.partialorder %v3113_v39, 0.0  ;;  %v3208_v63 = vmul.f32 %v7426_v34, %v3113_v39  ;;  %v4183_v29 = vrot.slane %v4181_v27, 4 }
 0x2a5   : > { %3264 = vst.msk [vmem:[#allocation3 + $0x80] sm:$0xff] %vm3247_vm6, %v3235_v62  ;;  %v3238_v1 = vsel %vm3175_vm10, %v3121_v42, %v3210_v12  ;;  %v3501_v26 = vrot.slane %v3499_v61, 4  ;;  %v4184_v61 = vrot.slane %v7509_v60, 5  ;;  %vm8246_vm3 = vcmask 1044480  }
 0x2a6   : > { %3267 = vst.msk [vmem:[#allocation3 + $0x98] sm:$0xff] %vm3247_vm6, %v3238_v1  ;;  %v3236_v19 = vsel %vm3173_vm13, %v3113_v39, %v3208_v63  ;;  %v4048_v63 = vor.u32 %v4047_v25, %v7353_v24  ;;  %v7476_v1 = vrot.slane %v3515_v57, 5  ;;  %v5654_v24 = vld [vmem:[%s8222_s4 + $0x10] sm:$0xff]   ;;  %vm5730_vm10 = vmmov 0  }
 0x2a7   : > { %3265 = vst.msk [vmem:[#allocation3 + $0x88] sm:$0xff] %vm3247_vm6, %v3236_v19  ;;  %5568 = vmatprep.mubr.msk.bf16.mxu1 %vm5730_vm10, %v5729_v52 }
 0x2a8   : > { %v4049_v31 = vrot.slane %v4048_v63, 4 }
 0x2aa   : > { %v4054_v25 = vsel %vm5860_vm5, %v4049_v31, %v7454_v44  ;;  %v5657_v44 = vld [vmem:[%s8222_s4 + $0x28] sm:$0x1f]   ;;  %v7569_v31 = vld [vmem:[#allocation4 + $0x10] sm:$0xf] }
 0x2ad   : > { %v3295_v15 = vld [vmem:[#allocation3 + $0x90] ss:$2 sm:$0xff]  ;;  %v3321_v10 = vld [vmem:[#allocation3 + $0x91] ss:$2 sm:$0xff] }
 0x2ae   : > { %v7439_v16 = vmax.f32 %v3295_v15, %v3321_v10  ;;  %v3293_v50 = vld [vmem:[#allocation3 + $0x80] ss:$2 sm:$0xff]  ;;  %v3319_v0 = vld [vmem:[#allocation3 + $0x81] ss:$2 sm:$0xff] }
 0x2af   : > { %v3336_v18 = vmax.f32 %v3293_v50, %v3319_v0  ;;  %v3521_v50 = vrot.slane %v3519_v7, 4 }
 0x2b1   : > { %v3356_v8 = vmax.f32 %v7334_v38, %v3336_v18  ;;  %v3357_v41 = vmax.f32 %v3336_v18, %v7439_v16  ;;  %v5653_v38 = vld [vmem:[%s8222_s4 + $0x8] sm:$0xff]   ;;  %v3522_v51 = vor.u32 %v3521_v50, %v7476_v1 }
 0x2b2   : > { %5559 = vmatpush3.bf16.msra.mxu1 %v5653_v38  ;;  %v7503_v38 = vld [vmem:[#allocation4 + $0x10] sm:$0xf] }
 0x2b3   : > { %v5477_v23 = vpack.c.bf16 %v3356_v8, %v3356_v8  ;;  %v5478_v2 = vpack.c.bf16 %v3357_v41, %v3357_v41  ;;  %5560 = vmatprep.subr.bf16.mxu1 %v5729_v52  ;;  %v7489_v8 = vld [vmem:[#allocation4 + $0x14] sm:$0xf] }
 0x2b4   : > { %v3701_v49 = vpop.permute.xlu1 %3700 }
 0x2b5   : > { %3727 = vst.msk [vmem:[#allocation2 + $0x8] sm:$0xf] %vm3725_vm7, %v3701_v49  ;;  %v5655_v49 = vld [vmem:[%s8222_s4 + $0x18] sm:$0xff]  }
 0x2b6   : > { %3423 = vst.msk [vmem:[#allocation4 + $0x1c] sm:$0xf] %vm3415_vm2, %v5477_v23  ;;  %3424 = vst.msk [vmem:[#allocation4 + $0x20] sm:$0xf] %vm3415_vm2, %v5478_v2  ;;  %5561 = vmatpush3.bf16.msra.mxu1 %v5654_v24 }
 0x2b7   : > { %5562 = vmatprep.subr.bf16.mxu1 %v5729_v52 }
 0x2ba   : > { %v3838_v40 = vpop.permute.xlu0 %3837  ;;  %5563 = vmatpush3.bf16.msra.mxu1 %v5655_v49  ;;  %v3623_v49 = vrot.slane %v3621_v36, 4 }
 0x2bb   : > { %3865 = vst.msk [vmem:[#allocation2] sm:$0xf] %vm8236_vm14, %v3838_v40  ;;  %5564 = vmatprep.subr.bf16.mxu1 %v5729_v52 }
 0x2bd   : > { %v7460_v6 = vld [vmem:[#allocation4 + $0x1c] sm:$0xf]  ;;  %v3464_v17 = vld [vmem:[#allocation4 + $0x20] sm:$0x7] }
 0x2be   : > { %v3840_v3 = vpop.permute.xlu1 %3839  ;;  %v3923_v58 = vpop.permute.xlu0 %3922  ;;  %v4061_v32 = vshll.u32 %v7460_v6, 16  ;;  %v3545_v59 = vshll.u32 %v3464_v17, 16  ;;  %v3549_v22 = vshrl.u32 %v3464_v17, 16  ;;  %v7465_v33 = vld [vmem:[#allocation4 + $0x20] sm:$0xf]  ;;  %5565 = vmatpush3.bf16.msra.mxu1 %v5656_v20 }
 0x2bf   : > { %3866 = vst.msk [vmem:[#allocation2 + $0x8] sm:$0xf] %vm8236_vm14, %v3840_v3  ;;  %v7468_v42 = vld [vmem:[#allocation4 + $0x1c] sm:$0xf]  ;;  %v3636_v62 = vrot.slane %v7465_v33, 5  ;;  %v3502_v3 = vor.u32 %v3501_v26, %v7365_v56  ;;  %5566 = vmatprep.subr.bf16.mxu1 %v5729_v52 }
 0x2c0   : > { %3950 = vst.msk [vmem:[#allocation2] sm:$0xf] %vm8235_vm15, %v3923_v58  ;;  %v7470_v53 = vrot.slane %v4061_v32, 5  ;;  %v7472_v30 = vrot.slane %v3545_v59, 5  ;;  %v3551_v39 = vrot.slane %v3549_v22, 4  ;;  %v4187_v10 = vrot.slane %v7468_v42, 5 }
 0x2c1   : > { %v3745_v19 = vld [vmem:[#allocation4 + $0x20] sm:$0xf]  ;;  %v3638_v41 = vrot.slane %v3636_v62, 4  ;;  %v3744_v45 = vld [vmem:[#allocation4 + $0x1c] sm:$0xf]  ;;  %v3627_v58 = vrot.slane %v7489_v8, 5 }
 0x2c2   : > { %v3925_v35 = vpop.permute.xlu1 %3924  ;;  %v3982_v12 = vpop.permute.xlu0 %3981  ;;  %v4064_v21 = vsel %vm5860_vm5, %v4059_v28, %v7470_v53  ;;  %v3552_v15 = vor.u32 %v3551_v39, %v7472_v30  ;;  %v3808_v0 = vshll.u32 %v3745_v19, 16  ;;  %v7493_v23 = vld [vmem:[#allocation4 + $0x20] sm:$0xf]  ;;  %v3812_v2 = vshrl.u32 %v3745_v19, 16  ;;  %v3440_v27 = vld [vmem:[#allocation4 + $0x1c] sm:$0xf] }
 0x2c3   : > { %3951 = vst.msk [vmem:[#allocation2 + $0x8] sm:$0xf] %vm8235_vm15, %v3925_v35  ;;  %4124 = vrot.lane.b32.xlu1 %v4064_v21, %s5727_s15  ;;  %v4189_v9 = vrot.slane %v4187_v10, 4  ;;  %v4190_v40 = vrot.slane %v7493_v23, 5  ;;  %v3441_v32 = vld [vmem:[#allocation4 + $0x20] sm:$0x7]  ;;  %v4185_v21 = vsel %vm5825_vm4, %v4183_v29, %v4184_v61 }
 0x2c4   : > { %4009 = vst.msk [vmem:[#allocation2] sm:$0xf] %vm8234_vm0, %v3982_v12  ;;  %v3553_v18 = vrot.slane %v3552_v15, 4  ;;  %v7505_v47 = vrot.slane %v3808_v0, 5  ;;  %v7524_v57 = vrot.slane %v3812_v2, 4  ;;  %v3523_v59 = vrot.slane %v3522_v51, 4 }
 0x2c5   : > { %v4191_v56 = vsel %vm5825_vm4, %v4189_v9, %v4190_v40  ;;  %v3798_v22 = vshll.u32 %v3744_v45, 16  ;;  %v3802_v7 = vshrl.u32 %v3744_v45, 16  ;;  %3449 = vst.msk [vmem:[#allocation2 + $0x38] sm:$0xf] %vm3415_vm2, %v3440_v27  ;;  %v3505_v28 = vshll.u32 %v7503_v38, 16 }
 0x2c6   : > { %3570 = vrot.lane.b32.xlu0 %v3553_v18, %s5721_s26  ;;  %v3815_v39 = vor.u32 %v7524_v57, %v7505_v47  ;;  %v3453_v35 = vld [vmem:[#allocation2 + $0x40] sm:$0x7]  ;;  %v3503_v12 = vrot.slane %v3502_v3, 4  ;;  %v3782_v19 = vshrl.u32 %v7382_v55, 16  ;;  %v7551_v15 = vld [vmem:[#allocation4 + $0x18] sm:$0xf]  ;;  %v3528_v0 = vsel %vm5860_vm5, %v3523_v59, %v7373_v14 }
 0x2c7   : > { %3655 = vrot.lane.b32.xlu1 %v3638_v41, %s5722_s27  ;;  %v3454_v63 = vsel %vm7517_vm8, %v3441_v32, %v3453_v35  ;;  %v3629_v50 = vrot.slane %v3627_v58, 4  ;;  %v7559_v24 = vrot.slane %v3798_v22, 5  ;;  %v3804_v55 = vrot.slane %v3802_v7, 4  ;;  %v7585_v3 = vld [vmem:[#allocation4 + $0x1c] sm:$0xf] }
 0x2c8   : > { %3455 = vst [vmem:[#allocation2 + $0x40] sm:$0x7] %v3454_v63  ;;  %v4349_v18 = vsel %vm8246_vm3, %v5657_v44, 0  ;;  %v7564_v26 = vrot.slane %v3505_v28, 5  ;;  %v3630_v41 = vrot.slane %v7551_v15, 5  ;;  %v3784_v9 = vrot.slane %v3782_v19, 4 }
 0x2c9   : > { %5567 = vmatpush3.bf16.msra.mxu1 %v4349_v18  ;;  %v3805_v45 = vor.u32 %v3804_v55, %v7559_v24  ;;  %v3624_v29 = vrot.slane %v7569_v31, 5  ;;  %v3910_v20 = vrot.slane %v7585_v3, 5  ;;  %v3788_v27 = vshll.u32 %v7587_v37, 16  ;;  %v3683_v59 = vld [vmem:[#allocation4 + $0x14] sm:$0xf] }
 0x2ca   : > { %4122 = vrot.lane.b32.xlu0 %v4054_v25, %s5727_s15  ;;  %v3508_v2 = vsel %vm5860_vm5, %v3503_v12, %v7564_v26  ;;  %v3631_v51 = vsel %vm5825_vm4, %v3629_v50, %v3630_v41  ;;  %5588 = vmatprep.subr.bf16.mxu1 %v5729_v52  ;;  %v3785_v17 = vor.u32 %v3784_v9, %v7396_v48  ;;  %v3685_v25 = vld [vmem:[#allocation4 + $0x1c] sm:$0xf]  ;;  %v7599_v7 = vld [vmem:[#allocation4 + $0x20] sm:$0xf]  ;;  %v3906_v63 = vrot.slane %v3904_v13, 4 }
 0x2cb   : > { %4211 = vrot.lane.b32.xlu1 %v4191_v56, %s5728_s16  ;;  %v3625_v36 = vsel %vm5825_vm4, %v3623_v49, %v3624_v29  ;;  %v3806_v32 = vrot.slane %v3805_v45, 4  ;;  %v4065_v56 = vshrl.u32 %v7460_v6, 16  ;;  %v3912_v44 = vrot.slane %v3910_v20, 4  ;;  %v7611_v6 = vld [vmem:[#allocation4 + $0x18] sm:$0xf] }
 0x2cc   : > { %v3786_v22 = vrot.slane %v3785_v17, 4  ;;  %v7608_v28 = vrot.slane %v3788_v27, 5  ;;  %v3913_v35 = vrot.slane %v7599_v7, 5 }
 0x2cd   : > { %v3811_v48 = vsel %vm5860_vm5, %v3806_v32, %v7505_v47  ;;  %v4067_v19 = vrot.slane %v4065_v56, 4 }
 0x2ce   : > { %4207 = vrot.lane.b32.xlu0 %v4185_v21, %s5728_s16  ;;  %v3791_v12 = vsel %vm5860_vm5, %v3786_v22, %v7608_v28  ;;  %v3914_v21 = vsel %vm5825_vm4, %v3912_v44, %v3913_v35  ;;  %v3966_v22 = vld [vmem:[#allocation4 + $0x1c] sm:$0xf]  ;;  %v3915_v47 = vrot.slane %v3913_v35, 4 }
 0x2cf   : > { %3564 = vrot.lane.b32.xlu1 %v3528_v0, %s5721_s26  ;;  %v3907_v0 = vrot.slane %v7611_v6, 5  ;;  %v4068_v9 = vor.u32 %v4067_v19, %v7470_v53 }
 0x2d1   : > { %v3908_v49 = vsel %vm5825_vm4, %v3906_v63, %v3907_v0 }
 0x2d2   : > { %3560 = vrot.lane.b32.xlu0 %v3508_v2, %s5721_s26  ;;  %v7626_v2 = vld [vmem:[#allocation4 + $0x20] sm:$0xf] }
 0x2d3   : > { %3649 = vrot.lane.b32.xlu1 %v3631_v51, %s5722_s27  ;;  %v3509_v51 = vshrl.u32 %v7503_v38, 16  ;;  %v4071_v27 = vshll.u32 %v7626_v2, 16  ;;  %v4075_v8 = vshrl.u32 %v7626_v2, 16  ;;  %v3463_v2 = vld [vmem:[#allocation4 + $0x1c] sm:$0xf] }
 0x2d5   : > { %v7647_v63 = vrot.slane %v4071_v27, 5  ;;  %v3511_v19 = vrot.slane %v3509_v51, 4 }
 0x2d6   : > { %3645 = vrot.lane.b32.xlu0 %v3625_v36, %s5722_s27 }
 0x2d7   : > { %3708 = vrot.lane.b32.xlu1 %v3685_v25, %s5723_s29 }
 0x2da   : > { %3704 = vrot.lane.b32.xlu0 %v3683_v59, %s5723_s29 }
 0x2db   : > { %3847 = vrot.lane.b32.xlu1 %v3811_v48, %s5724_s30  ;;  %v4069_v48 = vrot.slane %v4068_v9, 4 }
 0x2de   : > { %3843 = vrot.lane.b32.xlu0 %v3791_v12, %s5724_s30 }
 0x2df   : > { %v5550_v50 = vpop.f32.mrb[20].mxu0  ;;  %3932 = vrot.lane.b32.xlu1 %v3914_v21, %s5725_s13  ;;  %v4074_v21 = vsel %vm5860_vm5, %v4069_v48, %v7647_v63  ;;  %v3909_v48 = vrot.slane %v3907_v0, 4 }
 0x2e0   : > { %v3134_v55 = vadd.f32 %v7419_v11, %v5550_v50  ;;  %v3125_v18 = vpop.f32.mrb[21].mxu0  ;;  %v4186_v50 = vrot.slane %v4184_v61, 4 }
 0x2e1   : > { %v3126_v46 = vadd.f32 %v7419_v11, %v3125_v18  ;;  %v5551_v13 = vpop.f32.mrb[22].mxu0 }
 0x2e2   : > { %vm3178_vm13 = vcmp.gt.f32.partialorder %v3134_v55, 0.0  ;;  %v3213_v45 = vmul.f32 %v7426_v34, %v3134_v55  ;;  %v3137_v36 = vadd.f32 %v7419_v11, %v5551_v13  ;;  %v3128_v17 = vpop.f32.mrb[23].mxu0  ;;  %3928 = vrot.lane.b32.xlu0 %v3908_v49, %s5725_s13  ;;  %v4188_v18 = vsel %vm5825_vm4, %v4186_v50, %v4187_v10 }
 0x2e3   : > { %vm3176_vm1 = vcmp.gt.f32.partialorder %v3126_v46, 0.0  ;;  %v3211_v25 = vmul.f32 %v7426_v34, %v3126_v46  ;;  %v3129_v32 = vadd.f32 %v7419_v11, %v3128_v17  ;;  %v3792_v49 = vshrl.u32 %v7587_v37, 16 }
 0x2e4   : > { %v3241_v56 = vsel %vm3178_vm13, %v3134_v55, %v3213_v45  ;;  %vm3179_vm8 = vcmp.gt.f32.partialorder %v3137_v36, 0.0  ;;  %v3214_v53 = vmul.f32 %v7426_v34, %v3137_v36  ;;  %v3512_v55 = vor.u32 %v3511_v19, %v7564_v26 }
 0x2e5   : > { %3270 = vst.msk [vmem:[#allocation3 + $0xb0] sm:$0xff] %vm3247_vm6, %v3241_v56  ;;  %v3239_v38 = vsel %vm3176_vm1, %v3126_v46, %v3211_v25  ;;  %vm3177_vm3 = vcmp.gt.f32.partialorder %v3129_v32, 0.0  ;;  %v3212_v59 = vmul.f32 %v7426_v34, %v3129_v32  ;;  %v3626_v26 = vrot.slane %v3624_v29, 4  ;;  %v3684_v29 = vld [vmem:[#allocation4 + $0x18] sm:$0xf] }
 0x2e6   : > { %3268 = vst.msk [vmem:[#allocation3 + $0xa0] sm:$0xff] %vm3247_vm6, %v3239_v38  ;;  %v3242_v44 = vsel %vm3179_vm8, %v3137_v36, %v3214_v53  ;;  %3987 = vrot.lane.b32.xlu0 %v3966_v22, %s5726_s14  ;;  %v3513_v36 = vrot.slane %v3512_v55, 4  ;;  %v3794_v37 = vrot.slane %v3792_v49, 4  ;;  %vm4147_vm13 = vcmask 650800  }
 0x2e7   : > { %3271 = vst.msk [vmem:[#allocation3 + $0xb8] sm:$0xff] %vm3247_vm6, %v3242_v44  ;;  %v3240_v12 = vsel %vm3177_vm3, %v3129_v32, %v3212_v59  ;;  %vm4232_vm1 = vcmask 732800   ;;  %v4077_v44 = vrot.slane %v4075_v8, 4  ;;  %v3535_v49 = vshll.u32 %v3463_v2, 16 }
 0x2e8   : > { %3269 = vst.msk [vmem:[#allocation3 + $0xa8] sm:$0xff] %vm3247_vm6, %v3240_v12  ;;  %v3518_v61 = vsel %vm5860_vm5, %v3513_v36, %v7476_v1  ;;  %v3628_v1 = vsel %vm5825_vm4, %v3626_v26, %v3627_v58  ;;  %v3967_v36 = vld [vmem:[#allocation4 + $0x20] sm:$0xf] }
 0x2ea   : > { %4126 = vrot.lane.b32.xlu0 %v4074_v21, %s5727_s15 }
 0x2ee   : > { %v3299_v46 = vld [vmem:[#allocation3 + $0xb0] ss:$2 sm:$0xff]  ;;  %v3325_v13 = vld [vmem:[#allocation3 + $0xb1] ss:$2 sm:$0xff]  ;;  %4209 = vrot.lane.b32.xlu0 %v4188_v18, %s5728_s16  ;;  %v3911_v18 = vsel %vm5825_vm4, %v3909_v48, %v3910_v20 }
 0x2ef   : > { %v7663_v9 = vmax.f32 %v3299_v46, %v3325_v13  ;;  %v3297_v51 = vld [vmem:[#allocation3 + $0xa0] ss:$2 sm:$0xff]  ;;  %v3323_v45 = vld [vmem:[#allocation3 + $0xa1] ss:$2 sm:$0xff] }
 0x2f0   : > { %v3338_v60 = vmax.f32 %v3297_v51, %v3323_v45  ;;  %v3539_v51 = vshrl.u32 %v3463_v2, 16  ;;  %v4078_v45 = vor.u32 %v4077_v44, %v7647_v63  ;;  %v3537_v63 = vrot.slane %v3535_v49, 5 }
 0x2f2   : > { %v3359_v42 = vmax.f32 %v3338_v60, %v7663_v9  ;;  %3562 = vrot.lane.b32.xlu0 %v3518_v61, %s5721_s26  ;;  %v3358_v10 = vmax.f32 %v7439_v16, %v3338_v60  ;;  %v3795_v16 = vor.u32 %v3794_v37, %v7608_v28 }
 0x2f3   : > { %v3984_v25 = vpop.permute.xlu1 %3983 }
 0x2f4   : > { %v5480_v17 = vpack.c.bf16 %v3359_v42, %v3359_v42  ;;  %v5479_v32 = vpack.c.bf16 %v3358_v10, %v3358_v10  ;;  %4010 = vst.msk [vmem:[#allocation2 + $0x8] sm:$0xf] %vm8234_vm0, %v3984_v25  ;;  %v3796_v27 = vrot.slane %v3795_v16, 4  ;;  %v4079_v25 = vrot.slane %v4078_v45, 4 }
 0x2f6   : > { %3426 = vst.msk [vmem:[#allocation4 + $0x28] sm:$0xf] %vm3415_vm2, %v5480_v17  ;;  %3647 = vrot.lane.b32.xlu0 %v3628_v1, %s5722_s27  ;;  %3425 = vst.msk [vmem:[#allocation4 + $0x24] sm:$0xf] %vm3415_vm2, %v5479_v32  ;;  %v3801_v53 = vsel %vm5860_vm5, %v3796_v27, %v7559_v24  ;;  %v3541_v17 = vrot.slane %v3539_v51, 4  ;;  %v4192_v27 = vrot.slane %v4190_v40, 4 }
 0x2f8   : > { %v3542_v8 = vor.u32 %v3541_v17, %v3537_v63 }
 0x2f9   : > { %v4121_v31 = vpop.permute.xlu1 %4120 }
 0x2fa   : > { %4148 = vst.msk [vmem:[#allocation2] sm:$0xf] %vm4147_vm13, %v4121_v31  ;;  %3706 = vrot.lane.b32.xlu0 %v3684_v29, %s5723_s29 }
 0x2fd   : > { %v4206_v58 = vpop.permute.xlu1 %4205  ;;  %v3968_v56 = vld [vmem:[#allocation4 + $0x24] sm:$0xf]  ;;  %v7688_v59 = vld [vmem:[#allocation4 + $0x28] sm:$0xf] }
 0x2fe   : > { %v4027_v38 = vld [vmem:[#allocation4 + $0x24] sm:$0xf]  ;;  %4233 = vst.msk [vmem:[#allocation2] sm:$0xf] %vm4232_vm1, %v4206_v58  ;;  %3991 = vrot.lane.b32.xlu1 %v3968_v56, %s5726_s14  ;;  %3845 = vrot.lane.b32.xlu0 %v3801_v53, %s5724_s30  ;;  %v3747_v19 = vld [vmem:[#allocation4 + $0x28] sm:$0x7] }
 0x2ff   : > { %v4081_v28 = vshll.u32 %v4027_v38, 16  ;;  %v4085_v22 = vshrl.u32 %v4027_v38, 16  ;;  %v4166_v12 = vld [vmem:[#allocation4 + $0x24] sm:$0xf]  ;;  %v4091_v50 = vshll.u32 %v7688_v59, 16  ;;  %v3828_v46 = vshll.u32 %v3747_v19, 16 }
 0x300   : > { %v3832_v13 = vshrl.u32 %v3747_v19, 16  ;;  %v4193_v0 = vrot.slane %v4166_v12, 5  ;;  %v7705_v42 = vld [vmem:[#allocation4 + $0x28] sm:$0xf]  ;;  %v3543_v38 = vrot.slane %v3542_v8, 4  ;;  %v3533_v12 = vrot.slane %v3532_v54, 4 }
 0x301   : > { %v4083_v21 = vrot.slane %v4081_v28, 5  ;;  %v4087_v24 = vrot.slane %v4085_v22, 4  ;;  %v3559_v55 = vpop.permute.xlu1 %3558  ;;  %v7703_v61 = vrot.slane %v4091_v50, 5  ;;  %v7707_v20 = vrot.slane %v3828_v46, 5  ;;  %v3602_v28 = vld [vmem:[#allocation4 + $0x1c] sm:$0xf] }
 0x302   : > { %3584 = vst.msk [vmem:[#allocation2 + $0x10] sm:$0xf] %vm3581_vm11, %v3559_v55  ;;  %3930 = vrot.lane.b32.xlu0 %v3911_v18, %s5725_s13  ;;  %v3834_v10 = vrot.slane %v3832_v13, 4  ;;  %v4195_v37 = vrot.slane %v4193_v0, 4  ;;  %v4196_v32 = vrot.slane %v7705_v42, 5  ;;  %v4194_v56 = vsel %vm5825_vm4, %v4192_v27, %v4193_v0 }
 0x303   : > { %v4088_v6 = vor.u32 %v4087_v24, %v4083_v21  ;;  %v4084_v16 = vsel %vm5860_vm5, %v4079_v25, %v4083_v21  ;;  %v3688_v2 = vld [vmem:[#allocation4 + $0x28] sm:$0x7]  ;;  %v3548_v23 = vsel %vm5860_vm5, %v3543_v38, %v7472_v30  ;;  %v3633_v40 = vrot.slane %v3602_v28, 5  ;;  %v3746_v44 = vld [vmem:[#allocation4 + $0x24] sm:$0xf] }
 0x304   : > { %v3835_v31 = vor.u32 %v3834_v10, %v7707_v20  ;;  %v4197_v29 = vsel %vm5825_vm4, %v4195_v37, %v4196_v32  ;;  %v7733_v48 = vld [vmem:[#allocation4 + $0x28] sm:$0xf]  ;;  %v3632_v19 = vrot.slane %v3630_v41, 4  ;;  %v3538_v50 = vsel %vm5860_vm5, %v3533_v12, %v3537_v63  ;;  %v3686_v41 = vld [vmem:[#allocation4 + $0x20] sm:$0xf] }
 0x305   : > { %v4089_v60 = vrot.slane %v4088_v6, 4  ;;  %v3644_v3 = vpop.permute.xlu1 %3643  ;;  %v3919_v21 = vrot.slane %v7733_v48, 5  ;;  %v3818_v55 = vshll.u32 %v3746_v44, 16  ;;  %v3822_v18 = vshrl.u32 %v3746_v44, 16  ;;  %v3885_v46 = vld [vmem:[#allocation4 + $0x24] sm:$0xf] }
 0x306   : > { %3669 = vst.msk [vmem:[#allocation2 + $0x10] sm:$0xf] %vm3666_vm9, %v3644_v3  ;;  %3989 = vrot.lane.b32.xlu0 %v3967_v36, %s5726_s14  ;;  %v3836_v53 = vrot.slane %v3835_v31, 4  ;;  %v3634_v30 = vsel %vm5825_vm4, %v3632_v19, %v3633_v40  ;;  %v3635_v5 = vrot.slane %v3633_v40, 4  ;;  %v3816_v13 = vrot.slane %v3815_v39, 4 }
 0x307   : > { %v4094_v26 = vsel %vm5860_vm5, %v4089_v60, %v7703_v61  ;;  %v3921_v14 = vrot.slane %v3919_v21, 4  ;;  %v3820_v54 = vrot.slane %v3818_v55, 5  ;;  %v3824_v15 = vrot.slane %v3822_v18, 4  ;;  %v3430_v40 = vld [vmem:[#allocation4 + $0x30] sm:$0xf] }
 0x308   : > { %4130 = vrot.lane.b32.xlu1 %v4094_v26, %s5727_s15  ;;  %v3637_v6 = vsel %vm5825_vm4, %v3635_v5, %v3636_v62  ;;  %v3916_v51 = vrot.slane %v3885_v46, 5  ;;  %v3687_v62 = vld [vmem:[#allocation4 + $0x24] sm:$0xf]  ;;  %v4095_v12 = vshrl.u32 %v7688_v59, 16 }
 0x309   : > { %v3703_v1 = vpop.permute.xlu1 %3702  ;;  %v3825_v0 = vor.u32 %v3824_v15, %v3820_v54  ;;  %v3821_v49 = vsel %vm5860_vm5, %v3816_v13, %v3820_v54 }
 0x30a   : > { %3728 = vst.msk [vmem:[#allocation2 + $0x10] sm:$0xf] %vm3725_vm7, %v3703_v1  ;;  %4128 = vrot.lane.b32.xlu0 %v4084_v16, %s5727_s15  ;;  %v3917_v37 = vsel %vm5825_vm4, %v3915_v47, %v3916_v51  ;;  %v3918_v25 = vrot.slane %v3916_v51, 4 }
 0x30b   : > { %v3826_v39 = vrot.slane %v3825_v0, 4 }
 0x30c   : > { %4215 = vrot.lane.b32.xlu1 %v4197_v29, %s5728_s16  ;;  %v3969_v29 = vld [vmem:[#allocation4 + $0x28] sm:$0xf] }
 0x30d   : > { %v3842_v58 = vpop.permute.xlu1 %3841  ;;  %v3831_v31 = vsel %vm5860_vm5, %v3826_v39, %v7707_v20 }
 0x30e   : > { %3867 = vst.msk [vmem:[#allocation2 + $0x10] sm:$0xf] %vm8236_vm14, %v3842_v58  ;;  %4213 = vrot.lane.b32.xlu0 %v4194_v56, %s5728_s16 }
 0x310   : > { %3853 = vrot.lane.b32.xlu1 %v3836_v53, %s5724_s30 }
 0x311   : > { %v3927_v22 = vpop.permute.xlu1 %3926 }
 0x312   : > { %3952 = vst.msk [vmem:[#allocation2 + $0x10] sm:$0xf] %vm8235_vm15, %v3927_v22  ;;  %3714 = vrot.lane.b32.xlu0 %v3688_v2, %s5723_s29 }
 0x314   : > { %3568 = vrot.lane.b32.xlu1 %v3548_v23, %s5721_s26 }
 0x315   : > { %v3986_v24 = vpop.permute.xlu1 %3985 }
 0x316   : > { %4011 = vst.msk [vmem:[#allocation2 + $0x10] sm:$0xf] %vm8234_vm0, %v3986_v24  ;;  %3566 = vrot.lane.b32.xlu0 %v3538_v50, %s5721_s26  ;;  %vm3275_vm0 = vcmask 78848   ;;  %v3592_v50 = vld [vmem:[#allocation2 + $0x40] sm:$0x7] }
 0x318   : > { %3651 = vrot.lane.b32.xlu1 %v3634_v30, %s5722_s27  ;;  %v4097_v30 = vrot.slane %v4095_v12, 4 }
 0x31a   : > { %3938 = vrot.lane.b32.xlu0 %v3921_v14, %s5725_s13  ;;  %v4098_v5 = vor.u32 %v4097_v30, %v7703_v61 }
 0x31c   : > { %3710 = vrot.lane.b32.xlu1 %v3686_v41, %s5723_s29 }
 0x31e   : > { %3653 = vrot.lane.b32.xlu0 %v3637_v6, %s5722_s27  ;;  %v5554_v45 = vpop.f32.mrb[24].mxu0 }
 0x31f   : > { %v3150_v36 = vadd.f32 %v7419_v11, %v5554_v45  ;;  %v3141_v60 = vpop.f32.mrb[25].mxu0 }
 0x320   : > { %3849 = vrot.lane.b32.xlu1 %v3821_v49, %s5724_s30  ;;  %v3142_v33 = vadd.f32 %v7419_v11, %v3141_v60  ;;  %v5555_v57 = vpop.f32.mrb[26].mxu0 }
 0x321   : > { %vm3182_vm8 = vcmp.gt.f32.partialorder %v3150_v36, 0.0  ;;  %v3217_v3 = vmul.f32 %v7426_v34, %v3150_v36  ;;  %v3153_v10 = vadd.f32 %v7419_v11, %v5555_v57  ;;  %v3144_v26 = vpop.f32.mrb[27].mxu0 }
 0x322   : > { %3712 = vrot.lane.b32.xlu0 %v3687_v62, %s5723_s29  ;;  %vm3180_vm3 = vcmp.gt.f32.partialorder %v3142_v33, 0.0  ;;  %v3215_v7 = vmul.f32 %v7426_v34, %v3142_v33  ;;  %v3145_v35 = vadd.f32 %v7419_v11, %v3144_v26  ;;  %s5737_s29 = smov 112  }
 0x323   : > { %v3245_v63 = vsel %vm3182_vm8, %v3150_v36, %v3217_v3  ;;  %vm3183_vm15 = vcmp.gt.f32.partialorder %v3153_v10, 0.0  ;;  %v3218_v17 = vmul.f32 %v7426_v34, %v3153_v10  ;;  %vm3675_vm8 = vcmask 239776  }
 0x324   : > { %3934 = vrot.lane.b32.xlu1 %v3917_v37, %s5725_s13  ;;  %3274 = vst.msk [vmem:[#allocation3 + $0xd0] sm:$0xff] %vm3247_vm6, %v3245_v63  ;;  %v3243_v1 = vsel %vm3180_vm3, %v3142_v33, %v3215_v7  ;;  %vm3181_vm14 = vcmp.gt.f32.partialorder %v3145_v35, 0.0  ;;  %v3216_v16 = vmul.f32 %v7426_v34, %v3145_v35  ;;  %v3920_v34 = vsel %vm5825_vm4, %v3918_v25, %v3919_v21  ;;  %vm7805_vm3 = vmand %vm3675_vm8, %vm3451_vm12 }
 0x325   : > { %3272 = vst.msk [vmem:[#allocation3 + $0xc0] sm:$0xff] %vm3247_vm6, %v3243_v1  ;;  %v3246_v11 = vsel %vm3183_vm15, %v3153_v10, %v3218_v17  ;;  %vm8247_vm15 = vsmask.f32 3328  ;;  %v4099_v36 = vrot.slane %v4098_v5, 4  ;;  %v4198_v7 = vrot.slane %v4196_v32, 4 }
 0x326   : > { %3851 = vrot.lane.b32.xlu0 %v3831_v31, %s5724_s30  ;;  %3276 = vst.msk [vmem:[#allocation3 + $0xd8] sm:$0x3f] %vm3275_vm0, %v3246_v11  ;;  %v3244_v8 = vsel %vm3181_vm14, %v3145_v35, %v3216_v16  ;;  %vm3590_vm14 = vcmask 157776   ;;  %vm8254_vm8 = vcmask 568800  }
 0x327   : > { %3273 = vst.msk [vmem:[#allocation3 + $0xc8] sm:$0xff] %vm3247_vm6, %v3244_v8  ;;  %vm3429_vm6 = vmand %vm3415_vm2, %vm8247_vm15 }
 0x328   : > { %3993 = vrot.lane.b32.xlu1 %v3969_v29, %s5726_s14  ;;  %vm3591_vm0 = vmand %vm3590_vm14, %vm3451_vm12  ;;  %vm8250_vm14 = vcmask 404800  }
 0x329   : > { %vm8251_vm15 = vmmov %vm8250_vm14 }
 0x32a   : > { %3936 = vrot.lane.b32.xlu0 %v3920_v34, %s5725_s13  ;;  %s5731_s13 = smov 32  }
 0x32d   : > { %v3343_v27 = vld [vmem:[#allocation3 + $0xd0] ss:$2 sm:$0x7f]  ;;  %v3346_v20 = vld [vmem:[#allocation3 + $0xd1] ss:$2 sm:$0x7f] }
 0x32e   : > { %v3348_v58 = vmax.f32 %v3343_v27, %v3346_v20  ;;  %v3301_v56 = vld [vmem:[#allocation3 + $0xc0] ss:$2 sm:$0x7f]  ;;  %v3327_v53 = vld [vmem:[#allocation3 + $0xc1] ss:$2 sm:$0x7f] }
 0x32f   : > { %v3340_v38 = vmax.f32 %v3301_v56, %v3327_v53  ;;  %v3341_v28 = vld [vmem:[#allocation3 + $0xc0] ss:$2 sm:$0xff]  ;;  %v3344_v22 = vld [vmem:[#allocation3 + $0xc1] ss:$2 sm:$0xff] }
 0x330   : > { %v3347_v2 = vmax.f32 %v3341_v28, %v3344_v22 }
 0x331   : > { %v3361_v48 = vmax.f32 %v3340_v38, %v3348_v58 }
 0x332   : > { %v3360_v23 = vmax.f32 %v7663_v9, %v3347_v2 }
 0x333   : > { %v5482_v44 = vpack.c.bf16 %v3361_v48, %v3361_v48 }
 0x334   : > { %v5481_v21 = vpack.c.bf16 %v3360_v23, %v3360_v23 }
 0x335   : > { %v4125_v19 = vpop.permute.xlu1 %4124  ;;  %v3431_v24 = vsel %vm3429_vm6, %v5482_v44, %v3430_v40  ;;  %vm8252_vm6 = vcmask 486800  }
 0x336   : > { %4150 = vst.msk [vmem:[#allocation2 + $0x10] sm:$0xf] %vm4147_vm13, %v4125_v19  ;;  %3432 = vst [vmem:[#allocation4 + $0x30] sm:$0xf] %v3431_v24 }
 0x337   : > { %3427 = vst.msk [vmem:[#allocation4 + $0x2c] sm:$0xf] %vm3415_vm2, %v5481_v21  ;;  %vm4332_vm2 = vcmask 736256  }
 0x338   : > { %v3571_v55 = vpop.permute.xlu0 %3570 }
 0x339   : > { %v3593_v9 = vsel %vm3591_vm0, %v3571_v55, %v3592_v50  ;;  %v3656_v18 = vpop.permute.xlu1 %3655  ;;  %vm8253_vm0 = vmmov %vm8252_vm6 }
 0x33a   : > { %3594 = vst [vmem:[#allocation2 + $0x40] sm:$0x7] %v3593_v9 }
 0x33c   : > { %v4123_v14 = vpop.permute.xlu0 %4122 }
 0x33d   : > { %4149 = vst.msk [vmem:[#allocation2 + $0x8] sm:$0xf] %vm4147_vm13, %v4123_v14  ;;  %v7801_v59 = vpop.permute.xlu1 %4211  ;;  %v4030_v6 = vld [vmem:[#allocation4 + $0x30] sm:$0x7] }
 0x33e   : > { %v3970_v54 = vld [vmem:[#allocation4 + $0x2c] sm:$0xf]  ;;  %v4111_v47 = vshll.u32 %v4030_v6, 16  ;;  %v4115_v57 = vshrl.u32 %v4030_v6, 16  ;;  %v4169_v26 = vld [vmem:[#allocation4 + $0x30] sm:$0xf] }
 0x33f   : > { %v4029_v15 = vld [vmem:[#allocation4 + $0x2c] sm:$0xf]  ;;  %3995 = vrot.lane.b32.xlu0 %v3970_v54, %s5726_s14  ;;  %v4202_v31 = vrot.slane %v4169_v26, 5  ;;  %v3971_v8 = vld [vmem:[#allocation4 + $0x30] sm:$0x7] }
 0x340   : > { %v4101_v46 = vshll.u32 %v4029_v15, 16  ;;  %v4105_v13 = vshrl.u32 %v4029_v15, 16  ;;  %v4208_v0 = vpop.permute.xlu0 %4207  ;;  %v4168_v49 = vld [vmem:[#allocation4 + $0x2c] sm:$0xf]  ;;  %v4113_v63 = vrot.slane %v4111_v47, 5  ;;  %v4117_v17 = vrot.slane %v4115_v57, 4 }
 0x341   : > { %v3677_v51 = vld [vmem:[#allocation2 + $0x40] sm:$0x7]  ;;  %4234 = vst.msk [vmem:[#allocation2 + $0x8] sm:$0xf] %vm4232_vm1, %v4208_v0  ;;  %v3565_v45 = vpop.permute.xlu1 %3564  ;;  %v4199_v39 = vrot.slane %v4168_v49, 5  ;;  %v4204_v58 = vrot.slane %v4202_v31, 4 }
 0x342   : > { %v4103_v61 = vrot.slane %v4101_v46, 5  ;;  %v4107_v60 = vrot.slane %v4105_v13, 4  ;;  %v3678_v33 = vsel %vm7805_vm3, %v3656_v18, %v3677_v51  ;;  %3587 = vst.msk [vmem:[#allocation2 + $0x28] sm:$0xf] %vm3581_vm11, %v3565_v45  ;;  %v4118_v29 = vor.u32 %v4117_v17, %v4113_v63  ;;  %vm8255_vm3 = vmmov %vm8254_vm8 }
 0x343   : > { %3679 = vst [vmem:[#allocation2 + $0x40] sm:$0x7] %v3678_v33  ;;  %v4200_v25 = vsel %vm5825_vm4, %v4198_v7, %v4199_v39  ;;  %v4201_v16 = vrot.slane %v4199_v39, 4 }
 0x344   : > { %v4104_v62 = vsel %vm5860_vm5, %v4099_v36, %v4103_v61  ;;  %v4108_v3 = vor.u32 %v4107_v60, %v4103_v61  ;;  %v3561_v10 = vpop.permute.xlu0 %3560  ;;  %v4119_v56 = vrot.slane %v4118_v29, 4 }
 0x345   : > { %4132 = vrot.lane.b32.xlu1 %v4104_v62, %s5727_s15  ;;  %3585 = vst.msk [vmem:[#allocation2 + $0x18] sm:$0xf] %vm3581_vm11, %v3561_v10  ;;  %v3650_v37 = vpop.permute.xlu1 %3649  ;;  %v4203_v34 = vsel %vm5825_vm4, %v4201_v16, %v4202_v31 }
 0x346   : > { %v4109_v35 = vrot.slane %v4108_v3, 4  ;;  %3672 = vst.msk [vmem:[#allocation2 + $0x28] sm:$0xf] %vm3666_vm9, %v3650_v37 }
 0x348   : > { %v4114_v1 = vsel %vm5860_vm5, %v4109_v35, %v4113_v63  ;;  %v3646_v42 = vpop.permute.xlu0 %3645  ;;  %v5658_v32 = vld [vmem:[#allocation2] ss:$8 sps:$4 sm:$0xff]  }
 0x349   : > { %4217 = vrot.lane.b32.xlu1 %v4200_v25, %s5728_s16  ;;  %4134 = vrot.lane.b32.xlu0 %v4114_v1, %s5727_s15  ;;  %3670 = vst.msk [vmem:[#allocation2 + $0x18] sm:$0xf] %vm3666_vm9, %v3646_v42  ;;  %v3709_v11 = vpop.permute.xlu1 %3708 }
 0x34a   : > { %3731 = vst.msk [vmem:[#allocation2 + $0x28] sm:$0xf] %vm3725_vm7, %v3709_v11  ;;  %5569 = vmatmul.mubr.msk.bf16.vlgmr.msra.gmra.mrb[0].mxu1 %vm4332_vm2, %v5658_v32 }
 0x34b   : > { %5572 = vmatprep.mubr.msk.bf16.mxu1 %vm5730_vm10, %v5729_v52  ;;  %5589 = vmatpush3.bf16.msra.mxu1 %v5680_v43 }
 0x34c   : > { %v3705_v27 = vpop.permute.xlu0 %3704  ;;  %5590 = vmatprep.subr.bf16.mxu1 %v5729_v52 }
 0x34d   : > { %3997 = vrot.lane.b32.xlu1 %v3971_v8, %s5726_s14  ;;  %4219 = vrot.lane.b32.xlu0 %v4203_v34, %s5728_s16  ;;  %3729 = vst.msk [vmem:[#allocation2 + $0x18] sm:$0xf] %vm3725_vm7, %v3705_v27  ;;  %v3848_v20 = vpop.permute.xlu1 %3847  ;;  %v7896_v8 = vld [vmem:[%s8223_s5] ss:$0 sm:$0xff]  ;;  %s5732_s14 = smov 48  }
 0x34e   : > { %3870 = vst.msk [vmem:[#allocation2 + $0x28] sm:$0xf] %vm8250_vm14, %v3848_v20  ;;  %v7901_v27 = vld [vmem:[%s8224_s6] ss:$0 sm:$0xff] }
 0x350   : > { %v3844_v53 = vpop.permute.xlu0 %3843 }
 0x351   : > { %4221 = vrot.lane.b32.xlu1 %v4204_v58, %s5728_s16  ;;  %4136 = vrot.lane.b32.xlu0 %v4119_v56, %s5727_s15  ;;  %3868 = vst.msk [vmem:[#allocation2 + $0x18] sm:$0xf] %vm8251_vm15, %v3844_v53  ;;  %v3933_v38 = vpop.permute.xlu1 %3932  ;;  %vm8256_vm15 = vmmov %vm8253_vm0  ;;  %s5733_s15 = smov 16  }
 0x352   : > { %3955 = vst.msk [vmem:[#allocation2 + $0x28] sm:$0xf] %vm8252_vm6, %v3933_v38  ;;  %vm8257_vm6 = vmmov %vm8255_vm3 }
 0x354   : > { %v3929_v28 = vpop.permute.xlu0 %3928 }
 0x355   : > { %3953 = vst.msk [vmem:[#allocation2 + $0x18] sm:$0xf] %vm8253_vm0, %v3929_v28  ;;  %vm3734_vm0 = vcmask 321776  }
 0x358   : > { %v3988_v22 = vpop.permute.xlu0 %3987 }
 0x359   : > { %4012 = vst.msk [vmem:[#allocation2 + $0x18] sm:$0xf] %vm8254_vm8, %v3988_v22  ;;  %vm3735_vm8 = vmand %vm3734_vm0, %vm3451_vm12  ;;  %vm8259_vm0 = vcmask 486800  }
 0x35c   : > { %v4127_v2 = vpop.permute.xlu0 %4126 }
 0x35d   : > { %4151 = vst.msk [vmem:[#allocation2 + $0x18] sm:$0xf] %vm4147_vm13, %v4127_v2 }
 0x35e   : > { %4236 = vst.msk [vmem:[#allocation2 + $0x18] sm:$0xf] %vm4232_vm1, %v7801_v59  ;;  %v3736_v59 = vld [vmem:[#allocation2 + $0x40] sm:$0x7] }
 0x360   : > { %v4210_v48 = vpop.permute.xlu0 %4209 }
 0x361   : > { %4235 = vst.msk [vmem:[#allocation2 + $0x10] sm:$0xf] %vm4232_vm1, %v4210_v48 }
 0x364   : > { %v3563_v23 = vpop.permute.xlu0 %3562 }
 0x365   : > { %3586 = vst.msk [vmem:[#allocation2 + $0x20] sm:$0xf] %vm3581_vm11, %v3563_v23 }
 0x368   : > { %v3648_v40 = vpop.permute.xlu0 %3647  ;;  %v5659_v44 = vld [vmem:[#allocation2 + $0x10] ss:$8 sps:$4 sm:$0xff]  }
 0x369   : > { %3671 = vst.msk [vmem:[#allocation2 + $0x20] sm:$0xf] %vm3666_vm9, %v3648_v40  ;;  %5573 = vmatmul.mubr.msk.bf16.gmra.mrb[4].mxu1 %vm4332_vm2, %v5659_v44 }
 0x36a   : > { %5576 = vmatprep.mubr.msk.bf16.mxu1 %vm5730_vm10, %v5729_v52 }
 0x36c   : > { %v3707_v12 = vpop.permute.xlu0 %3706 }
 0x36d   : > { %3730 = vst.msk [vmem:[#allocation2 + $0x20] sm:$0xf] %vm3725_vm7, %v3707_v12 }
 0x370   : > { %v3992_v19 = vpop.permute.xlu1 %3991  ;;  %v3846_v21 = vpop.permute.xlu0 %3845 }
 0x371   : > { %4014 = vst.msk [vmem:[#allocation2 + $0x28] sm:$0xf] %vm8255_vm3, %v3992_v19  ;;  %vm3873_vm3 = vcmask 403776  }
 0x372   : > { %3869 = vst.msk [vmem:[#allocation2 + $0x20] sm:$0xf] %vm8250_vm14, %v3846_v21  ;;  %vm3874_vm14 = vmand %vm3873_vm3, %vm3451_vm12  ;;  %vm8261_vm3 = vcmask 568800  }
 0x374   : > { %v3931_v24 = vpop.permute.xlu0 %3930 }
 0x375   : > { %3954 = vst.msk [vmem:[#allocation2 + $0x20] sm:$0xf] %vm8256_vm15, %v3931_v24  ;;  %vm3958_vm15 = vcmask 485776  }
 0x378   : > { %v3990_v50 = vpop.permute.xlu0 %3989 }
 0x379   : > { %4013 = vst.msk [vmem:[#allocation2 + $0x20] sm:$0xf] %vm8257_vm6, %v3990_v50  ;;  %vm3959_vm6 = vmand %vm3958_vm15, %vm3451_vm12 }
 0x37a   : > { %v4131_v55 = vpop.permute.xlu1 %4130 }
 0x37b   : > { %4153 = vst.msk [vmem:[#allocation2 + $0x28] sm:$0xf] %vm4147_vm13, %v4131_v55 }
 0x37c   : > { %v4129_v9 = vpop.permute.xlu0 %4128 }
 0x37d   : > { %4152 = vst.msk [vmem:[#allocation2 + $0x20] sm:$0xf] %vm4147_vm13, %v4129_v9 }
 0x37e   : > { %v4216_v18 = vpop.permute.xlu1 %4215 }
 0x37f   : > { %4238 = vst.msk [vmem:[#allocation2 + $0x28] sm:$0xf] %vm4232_vm1, %v4216_v18 }
 0x380   : > { %v4214_v30 = vpop.permute.xlu0 %4213 }
 0x381   : > { %4237 = vst.msk [vmem:[#allocation2 + $0x20] sm:$0xf] %vm4232_vm1, %v4214_v30 }
 0x382   : > { %v3854_v14 = vpop.permute.xlu1 %3853 }
 0x384   : > { %v3715_v5 = vpop.permute.xlu0 %3714 }
 0x385   : > { %v3737_v54 = vsel %vm3735_vm8, %v3715_v5, %v3736_v59 }
 0x386   : > { %v3569_v15 = vpop.permute.xlu1 %3568  ;;  %3738 = vst [vmem:[#allocation2 + $0x40] sm:$0x7] %v3737_v54 }
 0x387   : > { %3589 = vst.msk [vmem:[#allocation2 + $0x38] sm:$0xf] %vm3581_vm11, %v3569_v15 }
 0x388   : > { %v3567_v41 = vpop.permute.xlu0 %3566  ;;  %v5660_v46 = vld [vmem:[#allocation2 + $0x20] ss:$8 sps:$4 sm:$0xff]  }
 0x389   : > { %3588 = vst.msk [vmem:[#allocation2 + $0x30] sm:$0xf] %vm3581_vm11, %v3567_v41  ;;  %5577 = vmatmul.mubr.msk.bf16.gmra.mrb[8].mxu1 %vm4332_vm2, %v5660_v46  ;;  %vm8258_vm11 = vcmask 404800  }
 0x38a   : > { %v3652_v13 = vpop.permute.xlu1 %3651  ;;  %5580 = vmatprep.mubr.msk.bf16.mxu1 %vm5730_vm10, %v5729_v52  ;;  %vm8260_vm8 = vmmov %vm8258_vm11 }
 0x38b   : > { %3673 = vst.msk [vmem:[#allocation2 + $0x30] sm:$0xf] %vm3666_vm9, %v3652_v13 }
 0x38c   : > { %v3939_v6 = vpop.permute.xlu0 %3938 }
 0x38d   : > { %v3875_v0 = vld [vmem:[#allocation2 + $0x40] sm:$0x7] }
 0x38e   : > { %v3711_v49 = vpop.permute.xlu1 %3710  ;;  %v3876_v51 = vsel %vm3874_vm14, %v3854_v14, %v3875_v0  ;;  %vm8263_vm14 = vmmov %vm8261_vm3 }
 0x38f   : > { %3732 = vst.msk [vmem:[#allocation2 + $0x30] sm:$0xf] %vm3725_vm7, %v3711_v49  ;;  %3877 = vst [vmem:[#allocation2 + $0x40] sm:$0x7] %v3876_v51 }
 0x390   : > { %v3654_v45 = vpop.permute.xlu0 %3653 }
 0x391   : > { %3674 = vst.msk [vmem:[#allocation2 + $0x38] sm:$0xf] %vm3666_vm9, %v3654_v45  ;;  %vm8262_vm9 = vmmov %vm8259_vm0 }
 0x392   : > { %v3850_v36 = vpop.permute.xlu1 %3849 }
 0x393   : > { %3871 = vst.msk [vmem:[#allocation2 + $0x30] sm:$0xf] %vm8258_vm11, %v3850_v36  ;;  %vm4156_vm11 = vcmask 649776  }
 0x394   : > { %v3713_v61 = vpop.permute.xlu0 %3712 }
 0x395   : > { %3733 = vst.msk [vmem:[#allocation2 + $0x38] sm:$0xf] %vm3725_vm7, %v3713_v61  ;;  %vm4017_vm7 = vcmask 567776  }
 0x396   : > { %v3935_v60 = vpop.permute.xlu1 %3934  ;;  %v3960_v47 = vld [vmem:[#allocation2 + $0x40] sm:$0x7]  ;;  %vm4018_vm15 = vmand %vm4017_vm7, %vm3451_vm12 }
 0x397   : > { %3956 = vst.msk [vmem:[#allocation2 + $0x30] sm:$0xf] %vm8259_vm0, %v3935_v60  ;;  %v3961_v33 = vsel %vm3959_vm6, %v3939_v6, %v3960_v47  ;;  %vm4157_vm6 = vmand %vm4156_vm11, %vm3451_vm12  ;;  %vm4518_vm11 = vsmask.f32 1280 }
 0x398   : > { %3962 = vst [vmem:[#allocation2 + $0x40] sm:$0x7] %v3961_v33  ;;  %v3852_v57 = vpop.permute.xlu0 %3851 }
 0x399   : > { %3872 = vst.msk [vmem:[#allocation2 + $0x38] sm:$0xf] %vm8260_vm8, %v3852_v57 }
 0x39a   : > { %v3994_v62 = vpop.permute.xlu1 %3993 }
 0x39b   : > { %4015 = vst.msk [vmem:[#allocation2 + $0x30] sm:$0xf] %vm8261_vm3, %v3994_v62 }
 0x39c   : > { %v3937_v39 = vpop.permute.xlu0 %3936 }
 0x39d   : > { %3957 = vst.msk [vmem:[#allocation2 + $0x38] sm:$0xf] %vm8262_vm9, %v3937_v39 }
 0x39f   : > { %v4019_v35 = vld [vmem:[#allocation2 + $0x40] sm:$0x7] }
 0x3b1   : > { %v3996_v3 = vpop.permute.xlu0 %3995 }
 0x3b2   : > { %4016 = vst.msk [vmem:[#allocation2 + $0x38] sm:$0xf] %vm8263_vm14, %v3996_v3 }
 0x3b7   : > { %v4133_v10 = vpop.permute.xlu1 %4132 }
 0x3b8   : > { %4154 = vst.msk [vmem:[#allocation2 + $0x30] sm:$0xf] %vm4147_vm13, %v4133_v10 }
 0x3bb   : > { %v4218_v26 = vpop.permute.xlu1 %4217  ;;  %v4135_v37 = vpop.permute.xlu0 %4134 }
 0x3bc   : > { %4239 = vst.msk [vmem:[#allocation2 + $0x30] sm:$0xf] %vm4232_vm1, %v4218_v26 }
 0x3bd   : > { %4155 = vst.msk [vmem:[#allocation2 + $0x38] sm:$0xf] %vm4147_vm13, %v4135_v37  ;;  %vm4241_vm13 = vcmask 731776  }
 0x3be   : > { %vm4242_vm0 = vmand %vm4241_vm13, %vm3451_vm12 }
 0x3bf   : > { %v3998_v7 = vpop.permute.xlu1 %3997  ;;  %v4220_v63 = vpop.permute.xlu0 %4219 }
 0x3c0   : > { %v4020_v17 = vsel %vm4018_vm15, %v3998_v7, %v4019_v35  ;;  %4240 = vst.msk [vmem:[#allocation2 + $0x38] sm:$0xf] %vm4232_vm1, %v4220_v63  ;;  %vm4517_vm15 = vcmask 123904  }
 0x3c1   : > { %4021 = vst [vmem:[#allocation2 + $0x40] sm:$0x7] %v4020_v17 }
 0x3c3   : > { %v4137_v16 = vpop.permute.xlu0 %4136  ;;  %v4222_v42 = vpop.permute.xlu1 %4221 }
 0x3c7   : > { %v5661_v25 = vld [vmem:[#allocation2 + $0x30] ss:$8 sps:$4 sm:$0xff]  }
 0x3c8   : > { %v4158_v1 = vld [vmem:[#allocation2 + $0x40] sm:$0x7]  ;;  %5581 = vmatmul.mubr.msk.bf16.gmra.mrb[12].mxu1 %vm4332_vm2, %v5661_v25 }
 0x3c9   : > { %v4159_v31 = vsel %vm4157_vm6, %v4137_v16, %v4158_v1  ;;  %5584 = vmatprep.mubr.msk.bf16.mxu1 %vm5730_vm10, %v5729_v52  ;;  %vm7974_vm6 = vmand %vm4517_vm15, %vm4518_vm11  ;;  %vm4646_vm15 = vcmask 386304  }
 0x3ca   : > { %4160 = vst [vmem:[#allocation2 + $0x40] sm:$0x7] %v4159_v31 }
 0x3d1   : > { %v4243_v32 = vld [vmem:[#allocation2 + $0x40] sm:$0x7] }
 0x3d2   : > { %v4244_v11 = vsel %vm4242_vm0, %v4222_v42, %v4243_v32 }
 0x3d3   : > { %4245 = vst [vmem:[#allocation2 + $0x40] sm:$0x7] %v4244_v11 }
 0x3da   : > { %v5662_v29 = vld [vmem:[#allocation2 + $0x40] ss:$0 sps:$4 sm:$0x77]  }
 0x3db   : > { %5585 = vmatmul.mubr.msk.bf16.gmra.mrb[16].mxu1 %vm4332_vm2, %v5662_v29  ;;  %vm4494_vm2 = vcmask 125952  }
 0x3dc   : > { %5592 = vmatprep.mubr.msk.bf16.mxu1 %vm5730_vm10, %v5729_v52 }
 0x41d   : > { %v4385_v34 = vpop.f32.mrb[0].mxu1 }
 0x41e   : > { %v4386_v20 = vadd.f32 %v7896_v8, %v4385_v34  ;;  %v5570_v58 = vpop.f32.mrb[1].mxu1 }
 0x41f   : > { %v4388_v56 = vpop.f32.mrb[2].mxu1 }
 0x420   : > { %vm4423_vm1 = vcmp.gt.f32.partialorder %v4386_v20, 0.0  ;;  %v4439_v53 = vmul.f32 %v7901_v27, %v4386_v20  ;;  %v4389_v38 = vadd.f32 %v7896_v8, %v4388_v56  ;;  %v5571_v28 = vpop.f32.mrb[3].mxu1 }
 0x422   : > { %v4448_v22 = vsel %vm4423_vm1, %v4386_v20, %v4439_v53  ;;  %vm4424_vm8 = vcmp.gt.f32.partialorder %v4389_v38, 0.0  ;;  %v4440_v2 = vmul.f32 %v7901_v27, %v4389_v38  ;;  %vm4503_vm1 = vcmask 124928  }
 0x423   : > { %v5483_v48 = vpack.c.bf16 %v4448_v22, %v4448_v22 }
 0x424   : > { %v4449_v23 = vsel %vm4424_vm8, %v4389_v38, %v4440_v2 }
 0x425   : > { %4495 = vst.msk [vmem:[#allocation5] sm:$0xf] %vm4494_vm2, %v5483_v48  ;;  %v5484_v40 = vpack.c.bf16 %v4449_v23, %v4449_v23 }
 0x427   : > { %4496 = vst.msk [vmem:[#allocation5 + $0x4] sm:$0xf] %vm4494_vm2, %v5484_v40 }
 0x42c   : > { %v4602_v44 = vld [vmem:[#allocation5] sm:$0xe] }
 0x42d   : > { %v4508_v12 = vld [vmem:[#allocation5] sm:$0xf]  ;;  %v5438_v24 = vrot.slane %v4602_v44, 9 }
 0x42e   : > { %4513 = vst.msk [vmem:[#allocation2] sm:$0xf] %vm4494_vm2, %v4508_v12  ;;  %v4603_v19 = vld [vmem:[#allocation5 + $0x4] sm:$0xf]  ;;  %v4523_v9 = vld [vmem:[#allocation5] sm:$0xf] }
 0x42f   : > { %v4509_v21 = vld [vmem:[#allocation5 + $0x4] sm:$0xf]  ;;  %v4614_v50 = vrot.slane %v4603_v19, 5  ;;  %v4529_v5 = vshrl.u32 %v4523_v9, 16  ;;  %v4532_v54 = vshll.u32 %v4523_v9, 16 }
 0x430   : > { %4514 = vst.msk [vmem:[#allocation2 + $0x8] sm:$0xf] %vm4494_vm2, %v4509_v21  ;;  %v4524_v36 = vld [vmem:[#allocation5 + $0x4] sm:$0xf] }
 0x431   : > { %v4615_v55 = vsel %vm5825_vm4, %v5438_v24, %v4614_v50  ;;  %v4531_v49 = vrot.slane %v4529_v5, 4  ;;  %v4534_v51 = vrot.slane %v4532_v54, 5  ;;  %v4538_v47 = vshll.u32 %v4524_v36, 16 }
 0x432   : > { %4626 = vrot.lane.b32.xlu0 %v4615_v55, %s5731_s13  ;;  %v4542_v33 = vshrl.u32 %v4524_v36, 16  ;;  %v4616_v11 = vrot.slane %v4614_v50, 4 }
 0x433   : > { %v4535_v60 = vor.u32 %v4534_v51, %v4531_v49  ;;  %v4540_v62 = vrot.slane %v4538_v47, 5 }
 0x434   : > { %v4544_v39 = vrot.slane %v4542_v33, 4 }
 0x435   : > { %v4536_v57 = vrot.slane %v4535_v60, 4 }
 0x436   : > { %v4545_v29 = vor.u32 %v4544_v39, %v4540_v62 }
 0x437   : > { %v4541_v32 = vsel %vm5860_vm5, %v4536_v57, %v4540_v62 }
 0x438   : > { %v4546_v22 = vrot.slane %v4545_v29, 4 }
 0x43c   : > { %v4393_v18 = vpop.f32.mrb[4].mxu1 }
 0x43d   : > { %v4394_v30 = vadd.f32 %v7896_v8, %v4393_v18  ;;  %v5574_v14 = vpop.f32.mrb[5].mxu1 }
 0x43e   : > { %v4396_v59 = vpop.f32.mrb[6].mxu1 }
 0x43f   : > { %vm4425_vm3 = vcmp.gt.f32.partialorder %v4394_v30, 0.0  ;;  %v4441_v15 = vmul.f32 %v7901_v27, %v4394_v30  ;;  %v4397_v41 = vadd.f32 %v7896_v8, %v4396_v59  ;;  %v5575_v46 = vpop.f32.mrb[7].mxu1 }
 0x441   : > { %v4450_v13 = vsel %vm4425_vm3, %v4394_v30, %v4441_v15  ;;  %vm4426_vm9 = vcmp.gt.f32.partialorder %v4397_v41, 0.0  ;;  %v4442_v6 = vmul.f32 %v7901_v27, %v4397_v41  ;;  %vm4504_vm3 = vmand %vm4503_vm1, %vm3451_vm12  ;;  %vm4592_vm12 = vcmask 257152  }
 0x442   : > { %v5485_v0 = vpack.c.bf16 %v4450_v13, %v4450_v13  ;;  %vm4681_vm1 = vcmask 517504  }
 0x443   : > { %v4451_v45 = vsel %vm4426_vm9, %v4397_v41, %v4442_v6  ;;  %vm4641_vm9 = vcmask 388352  }
 0x444   : > { %4497 = vst.msk [vmem:[#allocation5 + $0x8] sm:$0xf] %vm4494_vm2, %v5485_v0  ;;  %v5486_v61 = vpack.c.bf16 %v4451_v45, %v4451_v45 }
 0x446   : > { %4498 = vst.msk [vmem:[#allocation5 + $0xc] sm:$0xf] %vm4494_vm2, %v5486_v61 }
 0x44b   : > { %v4651_v3 = vld [vmem:[#allocation5 + $0x8] sm:$0xf] }
 0x44c   : > { %v7920_v10 = vld [vmem:[#allocation5 + $0x8] sm:$0xf]  ;;  %4661 = vrot.lane.b32.xlu0 %v4651_v3, %s5732_s14 }
 0x44d   : > { %v4686_v26 = vld [vmem:[#allocation5 + $0x8] sm:$0xf]  ;;  %v4652_v63 = vld [vmem:[#allocation5 + $0xc] sm:$0xf]  ;;  %v4617_v17 = vrot.slane %v7920_v10, 5  ;;  %v5664_v10 = vld [vmem:[%s8225_s7 + $0x8] sm:$0xff]  }
 0x44e   : > { %v4692_v37 = vshrl.u32 %v4686_v26, 16  ;;  %v4695_v7 = vshll.u32 %v4686_v26, 16  ;;  %v7923_v35 = vld [vmem:[#allocation5 + $0x8] sm:$0xf]  ;;  %v4687_v25 = vld [vmem:[#allocation5 + $0xc] sm:$0xf]  ;;  %4663 = vrot.lane.b32.xlu1 %v4652_v63, %s5732_s14 }
 0x44f   : > { %v4548_v1 = vshll.u32 %v7923_v35, 16  ;;  %v4701_v42 = vshll.u32 %v4687_v25, 16  ;;  %v4618_v20 = vsel %vm5825_vm4, %v4616_v11, %v4617_v17  ;;  %v4510_v56 = vld [vmem:[#allocation5 + $0x8] sm:$0xf]  ;;  %v4511_v28 = vld [vmem:[#allocation5 + $0xc] sm:$0xf] }
 0x450   : > { %v4694_v16 = vrot.slane %v4692_v37, 4  ;;  %v4697_v31 = vrot.slane %v4695_v7, 5  ;;  %4577 = vrot.lane.b32.xlu0 %v4541_v32, %s5733_s15  ;;  %4515 = vst.msk [vmem:[#allocation2 + $0x10] sm:$0xf] %vm4494_vm2, %v4510_v56  ;;  %4516 = vst.msk [vmem:[#allocation2 + $0x18] sm:$0xf] %vm4494_vm2, %v4511_v28 }
 0x451   : > { %v7935_v58 = vrot.slane %v4548_v1, 5  ;;  %v4703_v38 = vrot.slane %v4701_v42, 5  ;;  %v4705_v14 = vshrl.u32 %v4687_v25, 16  ;;  %v4552_v49 = vshrl.u32 %v7923_v35, 16  ;;  %v4766_v45 = vld [vmem:[#allocation5 + $0xc] sm:$0xf] }
 0x452   : > { %v4698_v34 = vor.u32 %v4697_v31, %v4694_v16  ;;  %4628 = vrot.lane.b32.xlu1 %v4618_v20, %s5731_s13  ;;  %v4526_v47 = vld [vmem:[#allocation5 + $0xc] sm:$0xf]  ;;  %v4777_v3 = vrot.slane %v4766_v45, 5  ;;  %v4765_v26 = vld [vmem:[#allocation5 + $0x8] sm:$0xe]  ;;  %v5665_v45 = vld [vmem:[%s8225_s7 + $0x10] sm:$0xff]  }
 0x453   : > { %v4551_v48 = vsel %vm5860_vm5, %v4546_v22, %v7935_v58  ;;  %v4707_v59 = vrot.slane %v4705_v14, 4  ;;  %v4554_v37 = vrot.slane %v4552_v49, 4  ;;  %v4558_v7 = vshll.u32 %v4526_v47, 16 }
 0x454   : > { %v4699_v53 = vrot.slane %v4698_v34, 4  ;;  %v4562_v35 = vshrl.u32 %v4526_v47, 16  ;;  %v4779_v11 = vrot.slane %v4777_v3, 4  ;;  %v5439_v29 = vrot.slane %v4765_v26, 9  ;;  %v4520_v34 = vld [vmem:[#allocation2 + $0x20] sm:$0x3] }
 0x455   : > { %v4708_v13 = vor.u32 %v4707_v59, %v4703_v38  ;;  %v4560_v56 = vrot.slane %v4558_v7, 5  ;;  %v4555_v22 = vor.u32 %v4554_v37, %v7935_v58  ;;  %v5663_v59 = vld [vmem:[%s8225_s7] sm:$0xff]  }
 0x456   : > { %v4704_v2 = vsel %vm5860_vm5, %v4699_v53, %v4703_v38  ;;  %4579 = vrot.lane.b32.xlu1 %v4551_v48, %s5733_s15  ;;  %v4564_v53 = vrot.slane %v4562_v35, 4 }
 0x457   : > { %4740 = vrot.lane.b32.xlu0 %v4704_v2, %s5734_s17  ;;  %v4709_v62 = vrot.slane %v4708_v13, 4  ;;  %v4778_v2 = vsel %vm5825_vm4, %v5439_v29, %v4777_v3  ;;  %v4556_v58 = vrot.slane %v4555_v22, 4  ;;  %v5668_v29 = vld [vmem:[%s8225_s7 + $0x28] sm:$0xff]  }
 0x45c   : > { %v4401_v23 = vpop.f32.mrb[8].mxu1 }
 0x45d   : > { %v4402_v40 = vadd.f32 %v7896_v8, %v4401_v23  ;;  %v5578_v44 = vpop.f32.mrb[9].mxu1 }
 0x45e   : > { %v4404_v12 = vpop.f32.mrb[10].mxu1  ;;  %v4605_v44 = vld [vmem:[#allocation5 + $0xc] sm:$0xf] }
 0x45f   : > { %vm4427_vm14 = vcmp.gt.f32.partialorder %v4402_v40, 0.0  ;;  %v4443_v19 = vmul.f32 %v7901_v27, %v4402_v40  ;;  %v4405_v21 = vadd.f32 %v7896_v8, %v4404_v12  ;;  %v5579_v24 = vpop.f32.mrb[11].mxu1 }
 0x461   : > { %v4452_v50 = vsel %vm4427_vm14, %v4402_v40, %v4443_v19  ;;  %vm4428_vm7 = vcmp.gt.f32.partialorder %v4405_v21, 0.0  ;;  %v4444_v55 = vmul.f32 %v7901_v27, %v4405_v21  ;;  %v4565_v40 = vor.u32 %v4564_v53, %v4560_v56 }
 0x462   : > { %v5487_v9 = vpack.c.bf16 %v4452_v50, %v4452_v50  ;;  %vm4676_vm14 = vcmask 519552  }
 0x463   : > { %v4453_v18 = vsel %vm4428_vm7, %v4405_v21, %v4444_v55  ;;  %v4566_v50 = vrot.slane %v4565_v40, 4  ;;  %v4619_v55 = vrot.slane %v4617_v17, 4  ;;  %vm4804_vm7 = vcmask 781952  }
 0x464   : > { %4499 = vst.msk [vmem:[#allocation5 + $0x10] sm:$0xf] %vm4494_vm2, %v5487_v9  ;;  %v5488_v30 = vpack.c.bf16 %v4453_v18, %v4453_v18  ;;  %v4620_v9 = vrot.slane %v4605_v44, 5  ;;  %v4561_v18 = vsel %vm5860_vm5, %v4556_v58, %v4560_v56 }
 0x466   : > { %4500 = vst.msk [vmem:[#allocation5 + $0x14] sm:$0xf] %vm4494_vm2, %v5488_v30  ;;  %v4622_v17 = vrot.slane %v4620_v9, 4 }
 0x46b   : > { %v7953_v5 = vld [vmem:[#allocation5 + $0x10] sm:$0x7] }
 0x46c   : > { %v7955_v54 = vld [vmem:[#allocation5 + $0x10] sm:$0xf]  ;;  %v4623_v15 = vrot.slane %v7953_v5, 5  ;;  %v5666_v5 = vld [vmem:[%s8225_s7 + $0x18] sm:$0xff]  }
 0x46d   : > { %v4711_v41 = vshll.u32 %v7955_v54, 16  ;;  %v4527_v46 = vld [vmem:[#allocation5 + $0x10] sm:$0x3]  ;;  %v7967_v57 = vld [vmem:[#allocation5 + $0x14] sm:$0xf] }
 0x46e   : > { %v4568_v6 = vshll.u32 %v4527_v46, 16  ;;  %v4572_v0 = vshrl.u32 %v4527_v46, 16  ;;  %v4625_v51 = vrot.slane %v4623_v15, 4  ;;  %v7965_v33 = vld [vmem:[#allocation5 + $0x10] sm:$0xf]  ;;  %v4940_v32 = vrot.slane %v7967_v57, 5 }
 0x46f   : > { %v7962_v36 = vrot.slane %v4711_v41, 5  ;;  %v4928_v63 = vld [vmem:[#allocation5 + $0x10] sm:$0xe]  ;;  %v4780_v16 = vrot.slane %v7965_v33, 5  ;;  %v4815_v24 = vld [vmem:[#allocation5 + $0x14] sm:$0xf]  ;;  %v4624_v49 = vsel %vm5825_vm4, %v4622_v17, %v4623_v15 }
 0x470   : > { %v4570_v61 = vrot.slane %v4568_v6, 5  ;;  %v4574_v60 = vrot.slane %v4572_v0, 4  ;;  %4634 = vrot.lane.b32.xlu1 %v4625_v51, %s5731_s13  ;;  %v4512_v42 = vld [vmem:[#allocation5 + $0x10] sm:$0x3]  ;;  %v5440_v20 = vrot.slane %v4928_v63, 9  ;;  %v5736_v46 = vmov 0  }
 0x471   : > { %v4714_v25 = vsel %vm5860_vm5, %v4709_v62, %v7962_v36  ;;  %v4521_v38 = vsel %vm7974_vm6, %v4512_v42, %v4520_v34  ;;  %v4781_v28 = vsel %vm5825_vm4, %v4779_v11, %v4780_v16  ;;  %v4849_v48 = vld [vmem:[#allocation5 + $0x10] sm:$0xf]  ;;  %5082 = vmatprep.subr.bf16.mxu0 %v5736_v46  ;;  %v4850_v13 = vld [vmem:[#allocation5 + $0x14] sm:$0xf]  ;;  %v4621_v6 = vsel %vm5825_vm4, %v4619_v55, %v4620_v9 }
 0x472   : > { %v4575_v39 = vor.u32 %v4574_v60, %v4570_v61  ;;  %4522 = vst [vmem:[#allocation2 + $0x20] sm:$0x3] %v4521_v38  ;;  %v4941_v23 = vsel %vm5825_vm4, %v5440_v20, %v4940_v32  ;;  %v4814_v12 = vld [vmem:[#allocation5 + $0x10] sm:$0xf]  ;;  %v4855_v19 = vshrl.u32 %v4849_v48, 16  ;;  %v4858_v21 = vshll.u32 %v4849_v48, 16  ;;  %5083 = vmatpush1.bf16.msra.mxu0 %v5663_v59 }
 0x473   : > { %4957 = vst.msk [vmem:[#allocation2 + $0x4] sm:$0xf] %vm4494_vm2, %v4941_v23  ;;  %v4571_v41 = vsel %vm5860_vm5, %v4566_v50, %v4570_v61  ;;  %5084 = vmatprep.subr.bf16.mxu0 %v5736_v46  ;;  %v4864_v51 = vshll.u32 %v4850_v13, 16  ;;  %v4653_v61 = vld [vmem:[#allocation5 + $0x10] sm:$0xf]  ;;  %v4715_v20 = vshrl.u32 %v7955_v54, 16 }
 0x474   : > { %v4576_v1 = vrot.slane %v4575_v39, 4  ;;  %4742 = vrot.lane.b32.xlu1 %v4714_v25, %s5734_s17  ;;  %v4857_v30 = vrot.slane %v4855_v19, 4  ;;  %v4860_v14 = vrot.slane %v4858_v21, 5  ;;  %v5667_v63 = vld [vmem:[%s8225_s7 + $0x20] sm:$0xff]   ;;  %v4689_v56 = vld [vmem:[#allocation5 + $0x14] sm:$0xf] }
 0x475   : > { %v8028_v47 = vrot.slane %v4864_v51, 5  ;;  %v4868_v53 = vshrl.u32 %v4850_v13, 16  ;;  %v4717_v38 = vrot.slane %v4715_v20, 4  ;;  %v4725_v54 = vshrl.u32 %v4689_v56, 16  ;;  %v5671_v20 = vld [vmem:[%s8225_s7 + $0x40] sm:$0xff]  }
 0x476   : > { %4585 = vrot.lane.b32.xlu0 %v4576_v1, %s5733_s15  ;;  %v4861_v0 = vor.u32 %v4860_v14, %v4857_v30  ;;  %5085 = vmatpush1.bf16.msra.mxu0 %v5664_v10  ;;  %v4942_v9 = vrot.slane %v4940_v32, 4  ;;  %v4654_v30 = vld [vmem:[#allocation5 + $0x14] sm:$0xf] }
 0x477   : > { %5086 = vmatprep.subr.bf16.mxu0 %v5736_v46  ;;  %v4718_v14 = vor.u32 %v4717_v38, %v7962_v36  ;;  %v4727_v36 = vrot.slane %v4725_v54, 4 }
 0x478   : > { %4791 = vrot.lane.b32.xlu1 %v4781_v28, %s5728_s16  ;;  %v4862_v60 = vrot.slane %v4861_v0, 4  ;;  %v4721_v28 = vshll.u32 %v4689_v56, 16 }
 0x47a   : > { %4789 = vrot.lane.b32.xlu0 %v4778_v2, %s5728_s16  ;;  %5087 = vmatpush1.bf16.msra.mxu0 %v5665_v45  ;;  %v4867_v15 = vsel %vm5860_vm5, %v4862_v60, %v8028_v47  ;;  %v4723_v32 = vrot.slane %v4721_v28, 5 }
 0x47b   : > { %5088 = vmatprep.subr.bf16.mxu0 %v5736_v46 }
 0x47c   : > { %4824 = vrot.lane.b32.xlu1 %v4814_v12, %s5735_s18 }
 0x47e   : > { %4826 = vrot.lane.b32.xlu0 %v4815_v24, %s5735_s18  ;;  %5089 = vmatpush1.bf16.msra.mxu0 %v5666_v5  ;;  %v4870_v24 = vrot.slane %v4868_v53, 4  ;;  %v4719_v5 = vrot.slane %v4718_v14, 4 }
 0x47f   : > { %5090 = vmatprep.subr.bf16.mxu0 %v5736_v46 }
 0x480   : > { %4581 = vrot.lane.b32.xlu1 %v4561_v18, %s5733_s15 }
 0x482   : > { %4583 = vrot.lane.b32.xlu0 %v4571_v41, %s5733_s15  ;;  %5091 = vmatpush1.bf16.msra.mxu0 %v5667_v63 }
 0x483   : > { %5092 = vmatprep.subr.bf16.mxu0 %v5736_v46 }
 0x484   : > { %4630 = vrot.lane.b32.xlu1 %v4621_v6, %s5731_s13 }
 0x486   : > { %4632 = vrot.lane.b32.xlu0 %v4624_v49, %s5731_s13  ;;  %5093 = vmatpush1.bf16.msra.mxu0 %v5668_v29  ;;  %v4871_v49 = vor.u32 %v4870_v24, %v8028_v47 }
 0x487   : > { %5094 = vmatprep.subr.bf16.mxu0 %v5736_v46 }
 0x488   : > { %4665 = vrot.lane.b32.xlu1 %v4653_v61, %s5732_s14 }
 0x48c   : > { %4903 = vrot.lane.b32.xlu1 %v4867_v15, %s5737_s29 }
 0x49b   : > { %v4409_v62 = vpop.f32.mrb[12].mxu1 }
 0x49c   : > { %v4410_v39 = vadd.f32 %v7896_v8, %v4409_v62  ;;  %v5582_v3 = vpop.f32.mrb[13].mxu1  ;;  %v4768_v62 = vld [vmem:[#allocation5 + $0x14] sm:$0xf] }
 0x49d   : > { %v4412_v26 = vpop.f32.mrb[14].mxu1  ;;  %v4783_v63 = vrot.slane %v4768_v62, 5 }
 0x49e   : > { %vm4429_vm13 = vcmp.gt.f32.partialorder %v4410_v39, 0.0  ;;  %v4445_v37 = vmul.f32 %v7901_v27, %v4410_v39  ;;  %v4413_v7 = vadd.f32 %v7896_v8, %v4412_v26  ;;  %v5583_v35 = vpop.f32.mrb[15].mxu1  ;;  %v4872_v26 = vrot.slane %v4871_v49, 4 }
 0x49f   : > { %v4782_v35 = vrot.slane %v4780_v16, 4 }
 0x4a0   : > { %v4454_v25 = vsel %vm4429_vm13, %v4410_v39, %v4445_v37  ;;  %vm4430_vm0 = vcmp.gt.f32.partialorder %v4413_v7, 0.0  ;;  %v4446_v1 = vmul.f32 %v7901_v27, %v4413_v7  ;;  %v4728_v37 = vor.u32 %v4727_v36, %v4723_v32  ;;  %vm4647_vm13 = vmand %vm4646_vm15, %vm4518_vm11 }
 0x4a1   : > { %v5489_v42 = vpack.c.bf16 %v4454_v25, %v4454_v25  ;;  %v4784_v56 = vsel %vm5825_vm4, %v4782_v35, %v4783_v63 }
 0x4a2   : > { %v4455_v11 = vsel %vm4430_vm0, %v4413_v7, %v4446_v1  ;;  %v5670_v7 = vld [vmem:[%s8225_s7 + $0x38] sm:$0xff]   ;;  %v4729_v33 = vrot.slane %v4728_v37, 4  ;;  %vm4918_vm0 = vcmask 1044352  }
 0x4a3   : > { %4501 = vst.msk [vmem:[#allocation5 + $0x18] sm:$0xf] %vm4494_vm2, %v5489_v42  ;;  %v5490_v34 = vpack.c.bf16 %v4455_v11, %v4455_v11  ;;  %v4724_v42 = vsel %vm5860_vm5, %v4719_v5, %v4723_v32  ;;  %v4599_v5 = vld [vmem:[#allocation2 + $0x20] sm:$0x3] }
 0x4a4   : > { %v4627_v28 = vpop.permute.xlu0 %4626 }
 0x4a5   : > { %4502 = vst.msk [vmem:[#allocation5 + $0x1c] sm:$0xf] %vm4494_vm2, %v5490_v34 }
 0x4aa   : > { %v4930_v22 = vld [vmem:[#allocation5 + $0x18] sm:$0xf] }
 0x4ab   : > { %v4655_v2 = vld [vmem:[#allocation5 + $0x18] sm:$0x3]  ;;  %v4943_v23 = vrot.slane %v4930_v22, 5  ;;  %v4785_v22 = vrot.slane %v4783_v63, 4 }
 0x4ac   : > { %v4690_v48 = vld [vmem:[#allocation5 + $0x18] sm:$0x3]  ;;  %4669 = vrot.lane.b32.xlu0 %v4655_v2, %s5732_s14  ;;  %v8057_v58 = vld [vmem:[#allocation5 + $0x1c] sm:$0xf] }
 0x4ad   : > { %v4731_v40 = vshll.u32 %v4690_v48, 16  ;;  %v4735_v44 = vshrl.u32 %v4690_v48, 16  ;;  %v8055_v12 = vld [vmem:[#allocation5 + $0x18] sm:$0x7]  ;;  %v4945_v41 = vrot.slane %v4943_v23, 4  ;;  %v4946_v10 = vrot.slane %v8057_v58, 5 }
 0x4ae   : > { %v4786_v19 = vrot.slane %v8055_v12, 5  ;;  %v8060_v21 = vld [vmem:[#allocation5 + $0x18] sm:$0xf]  ;;  %v4417_v18 = vpop.f32.mrb[16].mxu1  ;;  %v4944_v60 = vsel %vm5825_vm4, %v4942_v9, %v4943_v23  ;;  %v4852_v25 = vld [vmem:[#allocation5 + $0x1c] sm:$0xf] }
 0x4af   : > { %v8062_v50 = vrot.slane %v4731_v40, 5  ;;  %v4737_v55 = vrot.slane %v4735_v44, 4  ;;  %v4874_v59 = vshll.u32 %v8060_v21, 16  ;;  %v4418_v17 = vadd.f32 %v7896_v8, %v4417_v18  ;;  %v5586_v13 = vpop.f32.mrb[17].mxu1  ;;  %v5669_v8 = vld [vmem:[%s8225_s7 + $0x30] sm:$0xff]  }
 0x4b0   : > { %4667 = vrot.lane.b32.xlu0 %v4654_v30, %s5732_s14  ;;  %v4420_v0 = vpop.f32.mrb[18].mxu1  ;;  %v4788_v57 = vrot.slane %v4786_v19, 4  ;;  %4958 = vst.msk [vmem:[#allocation2 + $0xc] sm:$0xf] %vm4494_vm2, %v4944_v60  ;;  %v4947_v39 = vsel %vm5825_vm4, %v4945_v41, %v4946_v10  ;;  %5095 = vmatpush1.bf16.msra.mxu0 %v5669_v8  ;;  %v4878_v29 = vshrl.u32 %v8060_v21, 16  ;;  %v4884_v16 = vshll.u32 %v4852_v25, 16 }
 0x4b1   : > { %v4738_v6 = vor.u32 %v4737_v55, %v8062_v50  ;;  %vm4431_vm8 = vcmp.gt.f32.partialorder %v4418_v17, 0.0  ;;  %v4447_v51 = vmul.f32 %v7901_v27, %v4418_v17  ;;  %v5587_v45 = vpop.f32.mrb[19].mxu1  ;;  %v8081_v15 = vrot.slane %v4874_v59, 5  ;;  %v4505_v27 = vld [vmem:[#allocation5 + $0x20] sm:$0x7]  ;;  %5096 = vmatprep.subr.bf16.mxu0 %v5736_v46 }
 0x4b2   : > { %4959 = vst.msk [vmem:[#allocation2 + $0x14] sm:$0xf] %vm4494_vm2, %v4947_v39  ;;  %v4888_v34 = vshrl.u32 %v4852_v25, 16  ;;  %v4734_v53 = vsel %vm5860_vm5, %v4729_v33, %v8062_v50  ;;  %v4880_v38 = vrot.slane %v4878_v29, 4  ;;  %v4886_v2 = vrot.slane %v4884_v16, 5  ;;  %v5681_v45 = vld [vmem:[%s8228_s10 + $0x8] sm:$0xff]  }
 0x4b3   : > { %v4739_v61 = vrot.slane %v4738_v6, 4  ;;  %v4456_v47 = vsel %vm4431_vm8, %v4418_v17, %v4447_v51  ;;  %v4877_v11 = vsel %vm5860_vm5, %v4872_v26, %v8081_v15  ;;  %v4816_v23 = vld [vmem:[#allocation5 + $0x18] sm:$0xf]  ;;  %v4948_v21 = vrot.slane %v4946_v10, 4  ;;  %v4961_v18 = vld [vmem:[#allocation2 + $0x24] sm:$0x3]  ;;  %5591 = vmatpush3.bf16.msra.mxu1 %v5681_v45  ;;  %vm4682_vm8 = vmand %vm4681_vm1, %vm4518_vm11 }
 0x4b4   : > { %4797 = vrot.lane.b32.xlu0 %v4788_v57, %s5728_s16  ;;  %v5491_v3 = vpack.c.bf16 %v4456_v47, %v4456_v47  ;;  %5097 = vmatpush1.bf16.msra.mxu0 %v5670_v7  ;;  %v4890_v48 = vrot.slane %v4888_v34, 4  ;;  %v4881_v40 = vor.u32 %v4880_v38, %v8081_v15  ;;  %v4817_v58 = vld [vmem:[#allocation5 + $0x1c] sm:$0xf] }
 0x4b5   : > { %4748 = vrot.lane.b32.xlu1 %v4739_v61, %s5734_s17  ;;  %5098 = vmatprep.subr.bf16.mxu0 %v5736_v46  ;;  %v4787_v46 = vsel %vm5825_vm4, %v4785_v22, %v4786_v19 }
 0x4b6   : > { %v4506_v1 = vsel %vm4504_vm3, %v5491_v3, %v4505_v27  ;;  %v4891_v12 = vor.u32 %v4890_v48, %v4886_v2  ;;  %v4882_v17 = vrot.slane %v4881_v40, 4  ;;  %vm4760_vm3 = vcmask 648704  }
 0x4b7   : > { %4507 = vst [vmem:[#allocation5 + $0x20] sm:$0x7] %v4506_v1 }
 0x4b8   : > { %4905 = vrot.lane.b32.xlu0 %v4877_v11, %s5737_s29  ;;  %5099 = vmatpush1.bf16.msra.mxu0 %v5671_v20  ;;  %v4892_v0 = vrot.slane %v4891_v12, 4  ;;  %v4887_v32 = vsel %vm5860_vm5, %v4882_v17, %v4886_v2 }
 0x4b9   : > { %4744 = vrot.lane.b32.xlu1 %v4724_v42, %s5734_s17 }
 0x4bc   : > { %4746 = vrot.lane.b32.xlu0 %v4734_v53, %s5734_s17 }
 0x4bd   : > { %4793 = vrot.lane.b32.xlu1 %v4784_v56, %s5728_s16 }
 0x4be   : > { %v4853_v44 = vld [vmem:[#allocation5 + $0x20] sm:$0x3]  ;;  %v4662_v24 = vpop.permute.xlu0 %4661 }
 0x4bf   : > { %v4932_v54 = vld [vmem:[#allocation5 + $0x20] sm:$0x7]  ;;  %v4894_v50 = vshll.u32 %v4853_v44, 16  ;;  %v4898_v55 = vshrl.u32 %v4853_v44, 16  ;;  %v5674_v44 = vld [vmem:[#allocation2 + $0x4] ss:$8 sps:$4 sm:$0xff]  }
 0x4c0   : > { %4795 = vrot.lane.b32.xlu0 %v4787_v46, %s5728_s16  ;;  %v4949_v9 = vrot.slane %v4932_v54, 5  ;;  %v4664_v30 = vpop.permute.xlu1 %4663  ;;  %v4818_v10 = vld [vmem:[#allocation5 + $0x20] sm:$0x3] }
 0x4c1   : > { %4828 = vrot.lane.b32.xlu1 %v4816_v23, %s5735_s18  ;;  %v4896_v19 = vrot.slane %v4894_v50, 5  ;;  %v4900_v14 = vrot.slane %v4898_v55, 4 }
 0x4c2   : > { %v4951_v59 = vrot.slane %v4949_v9, 4  ;;  %v4950_v41 = vsel %vm5825_vm4, %v4948_v21, %v4949_v9  ;;  %v4578_v13 = vpop.permute.xlu0 %4577  ;;  %vm4755_vm4 = vcmask 650752  }
 0x4c3   : > { %4960 = vst.msk [vmem:[#allocation2 + $0x1c] sm:$0xf] %vm4494_vm2, %v4950_v41  ;;  %v4901_v57 = vor.u32 %v4900_v14, %v4896_v19  ;;  %v4897_v49 = vsel %vm5860_vm5, %v4892_v0, %v4896_v19  ;;  %vm4597_vm5 = vcmask 255104  }
 0x4c4   : > { %4830 = vrot.lane.b32.xlu0 %v4817_v58, %s5735_s18  ;;  %v4962_v6 = vsel %vm7974_vm6, %v4951_v59, %v4961_v18  ;;  %4593 = vst.msk [vmem:[#allocation2] sm:$0xf] %vm4592_vm12, %v4578_v13  ;;  %v4629_v4 = vpop.permute.xlu1 %4628  ;;  %vm4598_vm2 = vmand %vm4597_vm5, %vm4518_vm11  ;;  %vm4839_vm6 = vcmask 913152   ;;  %v5460_v13 = vld [vmem:[%s8227_s9] ss:$0 sm:$0xff] }
 0x4c5   : > { %4832 = vrot.lane.b32.xlu1 %v4818_v10, %s5735_s18  ;;  %4963 = vst [vmem:[#allocation2 + $0x24] sm:$0x3] %v4962_v6  ;;  %4642 = vst.msk [vmem:[#allocation2] sm:$0xf] %vm4641_vm9, %v4627_v28  ;;  %v4902_v51 = vrot.slane %v4901_v57, 4 }
 0x4c6   : > { %4677 = vst.msk [vmem:[#allocation2] sm:$0xf] %vm4676_vm14, %v4662_v24  ;;  %v5441_v10 = vld [vmem:[%s8226_s8] ss:$0 sm:$0xff] }
 0x4c8   : > { %4907 = vrot.lane.b32.xlu0 %v4887_v32, %s5737_s29  ;;  %v4580_v36 = vpop.permute.xlu1 %4579 }
 0x4c9   : > { %4909 = vrot.lane.b32.xlu1 %v4897_v49, %s5737_s29  ;;  %v4741_v31 = vpop.permute.xlu0 %4740  ;;  %4594 = vst.msk [vmem:[#allocation2 + $0x8] sm:$0xf] %vm4592_vm12, %v4580_v36 }
 0x4ca   : > { %4756 = vst.msk [vmem:[#allocation2] sm:$0xf] %vm4755_vm4, %v4741_v31  ;;  %v5675_v19 = vld [vmem:[#allocation2 + $0x14] ss:$8 sps:$4 sm:$0xff]  }
 0x4cb   : > { %4643 = vst.msk [vmem:[#allocation2 + $0x8] sm:$0xf] %vm4641_vm9, %v4629_v4 }
 0x4cc   : > { %4911 = vrot.lane.b32.xlu0 %v4902_v51, %s5737_s29  ;;  %4678 = vst.msk [vmem:[#allocation2 + $0x8] sm:$0xf] %vm4676_vm14, %v4664_v30 }
 0x4e2   : > { %v4635_v61 = vpop.permute.xlu1 %4634 }
 0x4e6   : > { %v4743_v8 = vpop.permute.xlu1 %4742 }
 0x4e7   : > { %4757 = vst.msk [vmem:[#allocation2 + $0x8] sm:$0xf] %vm4755_vm4, %v4743_v8 }
 0x4e8   : > { %v4586_v60 = vpop.permute.xlu0 %4585 }
 0x4e9   : > { %v4600_v15 = vsel %vm4598_vm2, %v4586_v60, %v4599_v5  ;;  %vm4844_vm2 = vcmask 911104  }
 0x4ea   : > { %4601 = vst [vmem:[#allocation2 + $0x20] sm:$0x3] %v4600_v15  ;;  %v4792_v62 = vpop.permute.xlu1 %4791 }
 0x4eb   : > { %4806 = vst.msk [vmem:[#allocation2 + $0x8] sm:$0xf] %vm4804_vm7, %v4792_v62 }
 0x4ec   : > { %v4790_v47 = vpop.permute.xlu0 %4789 }
 0x4ed   : > { %4805 = vst.msk [vmem:[#allocation2] sm:$0xf] %vm4804_vm7, %v4790_v47 }
 0x4ee   : > { %v4825_v27 = vpop.permute.xlu1 %4824 }
 0x4ef   : > { %4840 = vst.msk [vmem:[#allocation2] sm:$0xf] %vm4839_vm6, %v4825_v27 }
 0x4f0   : > { %v4827_v39 = vpop.permute.xlu0 %4826 }
 0x4f1   : > { %v4648_v3 = vld [vmem:[#allocation2 + $0x20] sm:$0x3]  ;;  %4841 = vst.msk [vmem:[#allocation2 + $0x8] sm:$0xf] %vm4839_vm6, %v4827_v39 }
 0x4f2   : > { %v4649_v26 = vsel %vm4647_vm13, %v4635_v61, %v4648_v3  ;;  %v4582_v37 = vpop.permute.xlu1 %4581  ;;  %vm5186_vm13 = vcmask 261120  }
 0x4f3   : > { %4650 = vst [vmem:[#allocation2 + $0x20] sm:$0x3] %v4649_v26  ;;  %4595 = vst.msk [vmem:[#allocation2 + $0x10] sm:$0xf] %vm4592_vm12, %v4582_v37 }
 0x4f4   : > { %v4584_v7 = vpop.permute.xlu0 %4583 }
 0x4f5   : > { %4596 = vst.msk [vmem:[#allocation2 + $0x18] sm:$0xf] %vm4592_vm12, %v4584_v7  ;;  %vm4761_vm12 = vmand %vm4760_vm3, %vm4518_vm11  ;;  %vm5290_vm3 = vcmask 39936  }
 0x4f6   : > { %v4631_v35 = vpop.permute.xlu1 %4630 }
 0x4f7   : > { %4644 = vst.msk [vmem:[#allocation2 + $0x10] sm:$0xf] %vm4641_vm9, %v4631_v35 }
 0x4f8   : > { %v4633_v63 = vpop.permute.xlu0 %4632 }
 0x4f9   : > { %4645 = vst.msk [vmem:[#allocation2 + $0x18] sm:$0xf] %vm4641_vm9, %v4633_v63  ;;  %vm4809_vm9 = vcmask 779904  }
 0x4fa   : > { %v4666_v25 = vpop.permute.xlu1 %4665  ;;  %v4683_v42 = vld [vmem:[#allocation2 + $0x20] sm:$0x3]  ;;  %vm4810_vm5 = vmand %vm4809_vm9, %vm4518_vm11 }
 0x4fb   : > { %4679 = vst.msk [vmem:[#allocation2 + $0x10] sm:$0xf] %vm4676_vm14, %v4666_v25 }
 0x4fe   : > { %v4904_v1 = vpop.permute.xlu1 %4903 }
 0x4ff   : > { %4919 = vst.msk [vmem:[#allocation2] sm:$0xf] %vm4918_vm0, %v4904_v1 }
 0x51e   : > { %v4670_v11 = vpop.permute.xlu0 %4669 }
 0x51f   : > { %v4684_v29 = vsel %vm4682_vm8, %v4670_v11, %v4683_v42  ;;  %v5461_v11 = vld [vmem:[%s8229_s11] ss:$0 sm:$0xff] }
 0x520   : > { %4685 = vst [vmem:[#allocation2 + $0x20] sm:$0x3] %v4684_v29 }
 0x522   : > { %v4668_v33 = vpop.permute.xlu0 %4667 }
 0x523   : > { %4680 = vst.msk [vmem:[#allocation2 + $0x18] sm:$0xf] %vm4676_vm14, %v4668_v33  ;;  %vm5072_vm14 = vcmask 130048  }
 0x524   : > { %5457 = vmatprep.mubr.msk.bf16.mxu0 %vm5072_vm14, %v5674_v44  ;;  %v5252_v44 = vlaneseq }
 0x526   : > { %v4798_v34 = vpop.permute.xlu0 %4797 }
 0x527   : > { %v4749_v16 = vpop.permute.xlu1 %4748  ;;  %v4762_v20 = vld [vmem:[#allocation2 + $0x20] sm:$0x3] }
 0x528   : > { %v4763_v56 = vsel %vm4761_vm12, %v4749_v16, %v4762_v20  ;;  %vm5295_vm12 = vcmask 34816  }
 0x529   : > { %4764 = vst [vmem:[#allocation2 + $0x20] sm:$0x3] %v4763_v56 }
 0x52a   : > { %v4906_v38 = vpop.permute.xlu0 %4905 }
 0x52b   : > { %v4745_v53 = vpop.permute.xlu1 %4744  ;;  %4920 = vst.msk [vmem:[#allocation2 + $0x8] sm:$0xf] %vm4918_vm0, %v4906_v38 }
 0x52c   : > { %4758 = vst.msk [vmem:[#allocation2 + $0x10] sm:$0xf] %vm4755_vm4, %v4745_v53 }
 0x52e   : > { %v4747_v22 = vpop.permute.xlu0 %4746 }
 0x52f   : > { %v4794_v28 = vpop.permute.xlu1 %4793  ;;  %4759 = vst.msk [vmem:[#allocation2 + $0x18] sm:$0xf] %vm4755_vm4, %v4747_v22  ;;  %vm4845_vm4 = vmand %vm4844_vm2, %vm4518_vm11 }
 0x530   : > { %4807 = vst.msk [vmem:[#allocation2 + $0x10] sm:$0xf] %vm4804_vm7, %v4794_v28  ;;  %v4811_v2 = vld [vmem:[#allocation2 + $0x20] sm:$0x3] }
 0x531   : > { %v4812_v48 = vsel %vm4810_vm5, %v4798_v34, %v4811_v2 }
 0x532   : > { %4813 = vst [vmem:[#allocation2 + $0x20] sm:$0x3] %v4812_v48  ;;  %v4796_v46 = vpop.permute.xlu0 %4795  ;;  %v5672_v40 = vld [vmem:[#allocation2] ss:$8 sps:$4 sm:$0xff]  }
 0x533   : > { %v4829_v23 = vpop.permute.xlu1 %4828  ;;  %4808 = vst.msk [vmem:[#allocation2 + $0x18] sm:$0xf] %vm4804_vm7, %v4796_v46  ;;  %5115 = vmatmul.mubr.bf16.vlgmr.msra.gmra.mrb[28].mxu0 %v5672_v40  ;;  %vm4923_vm7 = vcmask 1042304  }
 0x534   : > { %4842 = vst.msk [vmem:[#allocation2 + $0x10] sm:$0xf] %vm4839_vm6, %v4829_v23  ;;  %vm4924_vm15 = vmand %vm4923_vm7, %vm4518_vm11  ;;  %5458 = vmatprep.mubr.msk.bf16.mxu0 %vm5072_vm14, %v5675_v19 }
 0x536   : > { %v4831_v54 = vpop.permute.xlu0 %4830 }
 0x537   : > { %v4833_v21 = vpop.permute.xlu1 %4832  ;;  %4843 = vst.msk [vmem:[#allocation2 + $0x18] sm:$0xf] %vm4839_vm6, %v4831_v54 }
 0x539   : > { %v4846_v24 = vld [vmem:[#allocation2 + $0x20] sm:$0x3] }
 0x53a   : > { %v4847_v50 = vsel %vm4845_vm4, %v4833_v21, %v4846_v24  ;;  %v4908_v55 = vpop.permute.xlu0 %4907 }
 0x53b   : > { %v4910_v9 = vpop.permute.xlu1 %4909  ;;  %4848 = vst [vmem:[#allocation2 + $0x20] sm:$0x3] %v4847_v50  ;;  %4921 = vst.msk [vmem:[#allocation2 + $0x10] sm:$0xf] %vm4918_vm0, %v4908_v55 }
 0x53c   : > { %4922 = vst.msk [vmem:[#allocation2 + $0x18] sm:$0xf] %vm4918_vm0, %v4910_v9 }
 0x53e   : > { %v4912_v12 = vpop.permute.xlu0 %4911 }
 0x542   : > { %v4925_v18 = vld [vmem:[#allocation2 + $0x20] sm:$0x3] }
 0x543   : > { %v4926_v30 = vsel %vm4924_vm15, %v4912_v12, %v4925_v18  ;;  %v5677_v14 = vld [vmem:[#allocation2 + $0x10] ss:$8 sps:$4 sm:$0xff]   ;;  %v5253_v18 = vand.u32 127, %v5252_v44 }
 0x544   : > { %4927 = vst [vmem:[#allocation2 + $0x20] sm:$0x3] %v4926_v30  ;;  %5123 = vmatmul.mubr.bf16.gmra.mrb[32].mxu0 %v5677_v14 }
 0x54b   : > { %v4968_v59 = vld [vmem:[#allocation2 + $0x20] sm:$0x33] }
 0x54c   : > { %v5447_v41 = vcombine.high %v4968_v59, %v4968_v59  ;;  %v5446_v58 = vcombine.low %v4968_v59, %v4968_v59 }
 0x54e   : > { %5459 = vmatprep.mubr.msk.bf16.mxu0 %vm5072_vm14, %v5447_v41 }
 0x54f   : > { %5131 = vmatmul.mubr.bf16.gmra.mrb[36].mxu0 %v5446_v58 }
 0x606   : > { %v5116_v17 = vpop.f32.mrb[28].mxu0 }
 0x607   : > { %v5117_v6 = vadd.f32 %v5441_v10, %v5116_v17  ;;  %v5118_v0 = vpop.f32.mrb[29].mxu0 }
 0x608   : > { %v5119_v4 = vpop.f32.mrb[30].mxu0 }
 0x609   : > { %v5150_v57 = vmul.f32 %v5460_v13, %v5117_v6  ;;  %v5120_v32 = vadd.f32 %v5441_v10, %v5119_v4  ;;  %v5121_v49 = vpop.f32.mrb[31].mxu0  ;;  %vm5138_vm11 = vcmp.gt.f32.partialorder %v5117_v6, 0.0 }
 0x60b   : > { %vm5139_vm6 = vcmp.gt.f32.partialorder %v5120_v32, 0.0  ;;  %v5151_v31 = vmul.f32 %v5460_v13, %v5120_v32  ;;  %v5155_v36 = vsel %vm5138_vm11, %v5117_v6, %v5150_v57 }
 0x60d   : > { %v5156_v51 = vsel %vm5139_vm6, %v5120_v32, %v5151_v31 }
 0x60e   : > { %v5160_v43 = vpack.c.bf16 %v5156_v51, %v5155_v36 }
 0x610   : > { %5593 = vmatmul.mubr.msk.bf16.vlgmr.msra.gmra.mrb[20].mxu1 %vm5186_vm13, %v5160_v43 }
 0x611   : > { %5596 = vmatprep.mubr.msk.bf16.mxu1 %vm5730_vm10, %v5729_v52 }
 0x617   : > { %v5124_v45 = vpop.f32.mrb[32].mxu0 }
 0x618   : > { %v5125_v61 = vadd.f32 %v5441_v10, %v5124_v45  ;;  %v5126_v8 = vpop.f32.mrb[33].mxu0 }
 0x619   : > { %v5127_v60 = vpop.f32.mrb[34].mxu0 }
 0x61a   : > { %v5152_v5 = vmul.f32 %v5460_v13, %v5125_v61  ;;  %v5128_v15 = vadd.f32 %v5441_v10, %v5127_v60  ;;  %v5129_v62 = vpop.f32.mrb[35].mxu0  ;;  %vm5140_vm0 = vcmp.gt.f32.partialorder %v5125_v61, 0.0 }
 0x61c   : > { %vm5141_vm1 = vcmp.gt.f32.partialorder %v5128_v15, 0.0  ;;  %v5153_v47 = vmul.f32 %v5460_v13, %v5128_v15  ;;  %v5157_v27 = vsel %vm5140_vm0, %v5125_v61, %v5152_v5 }
 0x61e   : > { %v5158_v39 = vsel %vm5141_vm1, %v5128_v15, %v5153_v47 }
 0x61f   : > { %v5161_v3 = vpack.c.bf16 %v5158_v39, %v5157_v27 }
 0x621   : > { %5597 = vmatmul.mubr.msk.bf16.gmra.mrb[24].mxu1 %vm5186_vm13, %v5161_v3 }
 0x622   : > { %v5132_v26 = vpop.f32.mrb[36].mxu0  ;;  %5600 = vmatprep.mubr.msk.bf16.mxu1 %vm5730_vm10, %v5729_v52  ;;  %vm5284_vm10 = vcmp.eq.s32.totalorder %v5253_v18, 0 }
 0x623   : > { %v5133_v37 = vadd.f32 %v5441_v10, %v5132_v26  ;;  %v5134_v7 = vpop.f32.mrb[37].mxu0 }
 0x624   : > { %v5135_v35 = vpop.f32.mrb[38].mxu0 }
 0x625   : > { %vm5142_vm8 = vcmp.gt.f32.partialorder %v5133_v37, 0.0  ;;  %v5154_v63 = vmul.f32 %v5460_v13, %v5133_v37  ;;  %v5136_v25 = vpop.f32.mrb[39].mxu0 }
 0x627   : > { %v5159_v1 = vsel %vm5142_vm8, %v5133_v37, %v5154_v63 }
 0x628   : > { %v5162_v42 = vpack.c.bf16 %v5159_v1, %v5159_v1 }
 0x62a   : > { %5601 = vmatmul.mubr.msk.bf16.gmra.mrb[28].mxu1 %vm5186_vm13, %v5162_v42 }
 0x6e3   : > { %v5230_v29 = vpop.f32.mrb[20].mxu1 }
 0x6e4   : > { %v5231_v33 = vadd.f32 %v5461_v11, %v5230_v29  ;;  %v5594_v16 = vpop.f32.mrb[21].mxu1 }
 0x6e5   : > { %v5233_v34 = vpop.f32.mrb[22].mxu1 }
 0x6e6   : > { %v5254_v20 = vsub.f32 0.0, %v5231_v33  ;;  %v5234_v56 = vadd.f32 %v5461_v11, %v5233_v34  ;;  %v5595_v53 = vpop.f32.mrb[23].mxu1 }
 0x6e8   : > { %v5259_v38 = vmul.f32 1.442695, %v5254_v20  ;;  %v5255_v52 = vsub.f32 0.0, %v5234_v56 }
 0x6ea   : > { %5682 = vpow2.f32 %v5259_v38  ;;  %v5261_v28 = vmul.f32 1.442695, %v5255_v52 }
 0x6ec   : > { %5684 = vpow2.f32 %v5261_v28 }
 0x6f4   : > { %v5683_v22 = vpop.eup %5682  ;;  %v5238_v2 = vpop.f32.mrb[24].mxu1 }
 0x6f5   : > { %v5269_v48 = vadd.f32 1.0, %v5683_v22  ;;  %v5239_v23 = vadd.f32 %v5461_v11, %v5238_v2  ;;  %v5598_v46 = vpop.f32.mrb[25].mxu1 }
 0x6f6   : > { %v5685_v40 = vpop.eup %5684  ;;  %v5241_v54 = vpop.f32.mrb[26].mxu1 }
 0x6f7   : > { %5686 = vrcp.f32 %v5269_v48  ;;  %v5270_v21 = vadd.f32 1.0, %v5685_v40  ;;  %v5256_v24 = vsub.f32 0.0, %v5239_v23  ;;  %v5242_v50 = vadd.f32 %v5461_v11, %v5241_v54  ;;  %v5599_v55 = vpop.f32.mrb[27].mxu1 }
 0x6f9   : > { %5688 = vrcp.f32 %v5270_v21  ;;  %v5263_v9 = vmul.f32 1.442695, %v5256_v24  ;;  %v5257_v12 = vsub.f32 0.0, %v5242_v50 }
 0x6fb   : > { %5690 = vpow2.f32 %v5263_v9  ;;  %v5265_v30 = vmul.f32 1.442695, %v5257_v12 }
 0x6fd   : > { %v5246_v19 = vpop.f32.mrb[28].mxu1  ;;  %5692 = vpow2.f32 %v5265_v30 }
 0x6fe   : > { %v5247_v14 = vadd.f32 %v5461_v11, %v5246_v19  ;;  %v5602_v59 = vpop.f32.mrb[29].mxu1 }
 0x6ff   : > { %v5249_v41 = vpop.f32.mrb[30].mxu1 }
 0x700   : > { %v5258_v58 = vsub.f32 0.0, %v5247_v14  ;;  %v5603_v10 = vpop.f32.mrb[31].mxu1 }
 0x701   : > { %v5687_v17 = vpop.eup %5686 }
 0x702   : > { %v5267_v13 = vmul.f32 1.442695, %v5258_v58  ;;  %v5285_v6 = vsel %vm5284_vm10, %v5687_v17, %v5231_v33 }
 0x703   : > { %v5689_v0 = vpop.eup %5688  ;;  %5291 = vst.msk [vmem:[%s413_s24] sm:$0xff] %vm5290_vm3, %v5285_v6 }
 0x704   : > { %5694 = vpow2.f32 %v5267_v13  ;;  %v5286_v4 = vsel %vm5284_vm10, %v5689_v0, %v5234_v56 }
 0x705   : > { %v5691_v57 = vpop.eup %5690  ;;  %5292 = vst.msk [vmem:[%s413_s24 + $0x8] sm:$0xff] %vm5290_vm3, %v5286_v4 }
 0x706   : > { %v5271_v32 = vadd.f32 1.0, %v5691_v57 }
 0x707   : > { %v5693_v49 = vpop.eup %5692 }
 0x708   : > { %5696 = vrcp.f32 %v5271_v32  ;;  %v5272_v31 = vadd.f32 1.0, %v5693_v49 }
 0x70a   : > { %5698 = vrcp.f32 %v5272_v31 }
 0x70e   : > { %v5695_v36 = vpop.eup %5694 }
 0x70f   : > { %v5273_v51 = vadd.f32 1.0, %v5695_v36 }
 0x711   : > { %5700 = vrcp.f32 %v5273_v51 }
 0x712   : > { %v5697_v43 = vpop.eup %5696 }
 0x713   : > { %v5287_v45 = vsel %vm5284_vm10, %v5697_v43, %v5239_v23 }
 0x714   : > { %v5699_v61 = vpop.eup %5698  ;;  %5293 = vst.msk [vmem:[%s413_s24 + $0x10] sm:$0xff] %vm5290_vm3, %v5287_v45 }
 0x715   : > { %v5288_v8 = vsel %vm5284_vm10, %v5699_v61, %v5242_v50 }
 0x716   : > { %5294 = vst.msk [vmem:[%s413_s24 + $0x18] sm:$0xff] %vm5290_vm3, %v5288_v8 }
 0x71b   : > { %v5701_v60 = vpop.eup %5700 }
 0x71c   : > { %v5289_v5 = vsel %vm5284_vm10, %v5701_v60, %v5247_v14 }
 0x71d   : > { %5296 = vst.msk [vmem:[%s413_s24 + $0x20] sm:$0x7] %vm5295_vm12, %v5289_v5 }
 0x71e PF: > { %s22_s21 = sadd.s32 1, %s5710_s21  }
 0x71f   : > { %p19_p4 = scmp.ge.s32.totalorder %s22_s21, 4  }
 0x721   :  { %21 = sbr.rel (!%p19_p4) target bundleno = 1 (0x1), region = 125 }

</bundles_post_ra>
